<compile_context>
chip_gen: v7x
topology: tpu7x:2x2x1
jax: 0.10.0
libtpu: 0.0.40
codegen_flags: <defaults>
</compile_context>

<pallas_src>
import jax
import jax.numpy as jnp
from jax import lax
from jax.experimental import pallas as pl
from jax.experimental.pallas import tpu as pltpu


# PyTorch stores gates as [i, f, g, o]; kernel layout is [i, f, o, g] so the
# three sigmoid gates are contiguous (one EUP sigmoid pass over 3*Hp lanes).
_GATE_ORDER = (0, 1, 3, 2)


# --------------------------------------------------------------------------
# Kernel
# --------------------------------------------------------------------------
def _gate_update(gates, c, Hp):
    """gates: (B, 4Hp) f32 pre-activations in [i,f,o,g] order; c: (B, Hp) f32."""
    sig = jax.nn.sigmoid(gates[:, :3 * Hp])      # i | f | o in one EUP pass
    g_g = jnp.tanh(gates[:, 3 * Hp:])
    i_g = sig[:, 0 * Hp:1 * Hp]
    f_g = sig[:, 1 * Hp:2 * Hp]
    o_g = sig[:, 2 * Hp:3 * Hp]
    c_new = f_g * c + i_g * g_g
    h_new = o_g * jnp.tanh(c_new)
    return h_new, c_new


def make_eda_kernel(tT, tB, Hp, S, nt, T_true):
    """1-D grid over time with nt+1 steps (projection skewed one step ahead):
       step t:  project xs tile t into proj slot t%2      (t <  nt)
                recurrence on xs tile t-1 (slot (t-1)%2)  (t >= 1)
                decoder                                   (t == nt)
    """
    has_tail = (nt * tT != T_true)      # zero-padded tail time steps exist
    blk = tT * tB                       # rows of one projected tile

    def kernel(xs_ref, wih_e_ref, whh_e_ref, b_e_ref, whh_d_ref, b_d_ref,
               att_ref, h_ref, c_ref, proj_ref):
        t = pl.program_id(0)

        # ---- encoder state init (once) ------------------------------------
        @pl.when(t == 0)
        def _init():
            h_ref[...] = jnp.zeros_like(h_ref)
            c_ref[...] = jnp.zeros_like(c_ref)

        # ---- skewed input projection: tile t -> proj slot t % 2 -----------
        # One MXU-friendly (tT*tB, Hp) x (Hp, 4Hp) matmul per tile, bias
        # folded in; independent of the recurrence below (which consumes the
        # slot written on the previous grid step).
        @pl.when(t < nt)
        def _project():
            x2 = xs_ref[...].reshape(blk, Hp)
            dst = pl.multiple_of((t % 2) * blk, blk)
            proj_ref[pl.ds(dst, blk), :] = (
                jnp.dot(x2, wih_e_ref[...], preferred_element_type=jnp.float32)
                + b_e_ref[...])

        # ---- serial encoder recurrence on tile t-1 (+ decoder at the end) -
        @pl.when(t > 0)
        def _recur():
            whh_e = whh_e_ref[...]
            cdt = whh_e.dtype
            slot_base = ((t - 1) % 2) * blk
            time_base = (t - 1) * tT          # absolute time of row 0

            def enc_body(i, carry):
                h, c = carry
                row = pl.multiple_of(slot_base + i * tB, tB)
                gates = proj_ref[pl.ds(row, tB), :] + jnp.dot(
                    h.astype(cdt), whh_e, preferred_element_type=jnp.float32)
                h_new, c_new = _gate_update(gates, c, Hp)
                if has_tail:                  # mask zero-padded tail steps
                    valid = (time_base + i) < T_true
                    h_new = jnp.where(valid, h_new, h)
                    c_new = jnp.where(valid, c_new, c)
                return h_new, c_new

            h, c = lax.fori_loop(0, tT, enc_body, (h_ref[...], c_ref[...]),
                                 unroll=min(tT, 8))
            h_ref[...] = h
            c_ref[...] = c

            # ---- decoder: runs once, after the last encoder tile ----------
            # Decoder input is all-zeros (as in the PyTorch module), so the
            # x @ W_ih_dec term vanishes and W_ih_dec is never needed.
            @pl.when(t == nt)
            def _decode():
                whh_d = whh_d_ref[...]
                b_d = jnp.broadcast_to(b_d_ref[...], (tB, 4 * Hp))  # hoisted
                h_d, c_d = h, c
                for s in range(S):            # small static S -> unrolled
                    gates = b_d + jnp.dot(h_d.astype(cdt), whh_d,
                                          preferred_element_type=jnp.float32)
                    h_d, c_d = _gate_update(gates, c_d, Hp)
                    att_ref[s] = h_d          # full (tB, Hp) slab store

    return kernel


# --------------------------------------------------------------------------
# Padding / tiling helpers
# --------------------------------------------------------------------------
def _round_up(x, m):
    return ((x + m - 1) // m) * m


def _device_vmem_bytes():
    """Physical VMEM capacity of the attached TPU (conservative fallback)."""
    try:
        cap = int(pltpu.get_tpu_info().vmem_capacity_bytes)
        if cap > 0:
            return cap
    except Exception:
        pass
    return 64 * 1024 * 1024       # v7x per-TensorCore size; safe lower bound


def _pad_gate_cols(w4, H, Hp):
    """Reorder stacked gates [i,f,g,o]->[i,f,o,g]; zero-pad each block H->Hp."""
    parts = []
    for k in _GATE_ORDER:
        p = w4[..., k * H:(k + 1) * H]
        if Hp != H:
            pad = [(0, 0)] * (p.ndim - 1) + [(0, Hp - H)]
            p = jnp.pad(p, pad)
        parts.append(p)
    return jnp.concatenate(parts, axis=-1)


def _pad_lstm_w(w, H, Hp):
    """(H, 4H) -> (Hp, 4Hp) with zero padding (exact for LSTM math)."""
    w = _pad_gate_cols(w, H, Hp)                  # (H, 4Hp)
    if Hp != H:
        w = jnp.pad(w, ((0, Hp - H), (0, 0)))     # (Hp, 4Hp)
    return w


# --------------------------------------------------------------------------
# Wrapper
# --------------------------------------------------------------------------
def eda_forward(xs, n_attractors, params, compute_dtype=jnp.bfloat16,
                max_time_tile=64):
    """Equivalent to EncoderDecoderAttractor.forward(xs, zeros) where `zeros`
    is an all-zeros (B, n_attractors, H) decoder input (as the module always
    passes). xs: (B, T, H) float -> attractors (B, n_attractors, H) float32."""
    B, T, H = xs.shape
    S = int(n_attractors)
    Hp = _round_up(H, 128)
    Bp = _round_up(B, 8)
    tB = Bp              # no batch grid split (single-TC friendly); see header

    # Balanced, capped time tiling with a masked tail (never one giant tile).
    nt = pl.cdiv(T, max_time_tile)
    tT = pl.cdiv(T, nt)
    T_pad = nt * tT

    itemsize = jnp.dtype(compute_dtype).itemsize

    # Pad batch / hidden / time, cast, and go time-major so the recurrence
    # indexes the leading dim.  Padded hidden LANES stay exactly zero through
    # the LSTM; padded batch ROWS and padded time steps do not (bias drives
    # them) -- batch rows are sliced off below, tail steps are masked in-kernel.
    xs_p = jnp.pad(xs.astype(jnp.float32),
                   ((0, Bp - B), (0, T_pad - T), (0, Hp - H)))
    xs_tm = jnp.transpose(xs_p, (1, 0, 2)).astype(compute_dtype)  # (T_pad,Bp,Hp)

    wih_e = _pad_lstm_w(params["wih_e"], H, Hp).astype(compute_dtype)
    whh_e = _pad_lstm_w(params["whh_e"], H, Hp).astype(compute_dtype)
    whh_d = _pad_lstm_w(params["whh_d"], H, Hp).astype(compute_dtype)
    b_e = _pad_gate_cols(params["b_e"], H, Hp).astype(jnp.float32)  # (1, 4Hp)
    b_d = _pad_gate_cols(params["b_d"], H, Hp).astype(jnp.float32)
    # NOTE: params["wih_d"] is intentionally unused (zero decoder input).

    # VMEM budget, clamped to the device's physical capacity (v7x = 64 MiB).
    vmem_est = (2 * tT * tB * Hp * itemsize            # xs tiles (x2 buffers)
                + 2 * 3 * Hp * 4 * Hp * itemsize       # wih_e, whh_e, whh_d
                + 2 * 2 * 4 * Hp * 4                   # biases
                + 2 * tT * tB * 4 * Hp * 4             # skewed proj scratch
                + 2 * tB * Hp * 4                      # h, c scratch
                + S * tB * Hp * 4)                     # output block
    vmem_limit = min(_device_vmem_bytes(),
                     max(32 * 1024 * 1024, int(1.5 * vmem_est)))

    kernel = make_eda_kernel(tT, tB, Hp, S, nt, T)
    att_p = pl.pallas_call(
        kernel,
        out_shape=jax.ShapeDtypeStruct((S, Bp, Hp), jnp.float32),
        grid_spec=pltpu.PrefetchScalarGridSpec(
            num_scalar_prefetch=0,
            grid=(nt + 1,),                            # +1: skew epilogue step
            in_specs=[
                # xs tile for grid step t (clamped: the epilogue step reuses
                # tile nt-1's block index, so no extra DMA is issued).
                pl.BlockSpec((tT, tB, Hp),
                             lambda t: (jnp.minimum(t, nt - 1), 0, 0)),
                pl.BlockSpec((Hp, 4 * Hp), lambda t: (0, 0)),      # wih_e
                pl.BlockSpec((Hp, 4 * Hp), lambda t: (0, 0)),      # whh_e
                pl.BlockSpec((1, 4 * Hp), lambda t: (0, 0)),       # b_e
                pl.BlockSpec((Hp, 4 * Hp), lambda t: (0, 0)),      # whh_d
                pl.BlockSpec((1, 4 * Hp), lambda t: (0, 0)),       # b_d
            ],
            out_specs=pl.BlockSpec((S, tB, Hp), lambda t: (0, 0, 0)),
            scratch_shapes=[
                pltpu.VMEM((tB, Hp), jnp.float32),               # h
                pltpu.VMEM((tB, Hp), jnp.float32),               # c
                pltpu.VMEM((2 * tT * tB, 4 * Hp), jnp.float32),  # proj x2 slot
            ]),
        compiler_params=pltpu.CompilerParams(
            dimension_semantics=("arbitrary",),        # serial recurrence
            vmem_limit_bytes=vmem_limit),
    )(xs_tm, wih_e, whh_e, b_e, whh_d, b_d)

    # (S, Bp, Hp) -> (B, S, H); padded batch rows / hidden lanes sliced off.
    return jnp.transpose(att_p, (1, 0, 2))[:B, :, :H]


def eda_estimate(xs, params, max_n_speakers=15, compute_dtype=jnp.bfloat16):
    """Mirrors EncoderDecoderAttractor.estimate: zero decoder input + counter."""
    attractors = eda_forward(xs, max_n_speakers, params, compute_dtype)
    # Counter head (tiny Linear(H, 1) + sigmoid) — plain-JAX glue.
    logits = jnp.einsum("bsh,h->bs", attractors, params["wc"][0]) + params["bc"][0]
    probs = jax.nn.sigmoid(logits)                                  # (B, S)
    return attractors, probs


# --------------------------------------------------------------------------
# Deterministic parameter init (PyTorch LSTM-style uniform(-1/sqrt(H), 1/sqrt(H)))
# --------------------------------------------------------------------------
def init_params(key, n_units):
    H = n_units
    bound = 1.0 / jnp.sqrt(jnp.float32(H))
    ks = jax.random.split(key, 12)

    def u(k, shape):
        return jax.random.uniform(k, shape, jnp.float32, -bound, bound)

    # PyTorch stores W_ih: (4H, H), W_hh: (4H, H), biases b_ih, b_hh: (4H,).
    # We pre-transpose to (H, 4H) and fold the two biases together.
    return {
        "wih_e": u(ks[0], (H, 4 * H)),
        "whh_e": u(ks[1], (H, 4 * H)),
        "b_e":   u(ks[2], (1, 4 * H)) + u(ks[3], (1, 4 * H)),
        "wih_d": u(ks[4], (H, 4 * H)),   # kept for parity; unused (zero input)
        "whh_d": u(ks[5], (H, 4 * H)),
        "b_d":   u(ks[6], (1, 4 * H)) + u(ks[7], (1, 4 * H)),
        "wc":    u(ks[8], (1, H)),       # counter Linear(H, 1) weight
        "bc":    u(ks[9], (1,)),         # counter bias
    }


# --------------------------------------------------------------------------
# Pure-JAX reference (general LSTM, PyTorch gate order, explicit zeros input)
# --------------------------------------------------------------------------
def _lstm_cell_ref(x_t, h, c, wih, whh, b, H):
    gates = (jnp.dot(x_t, wih, preferred_element_type=jnp.float32)
             + jnp.dot(h, whh, preferred_element_type=jnp.float32) + b)
    i = jax.nn.sigmoid(gates[:, 0 * H:1 * H])
    f = jax.nn.sigmoid(gates[:, 1 * H:2 * H])
    g = jnp.tanh(gates[:, 2 * H:3 * H])
    o = jax.nn.sigmoid(gates[:, 3 * H:4 * H])
    c_new = f * c + i * g
    return o * jnp.tanh(c_new), c_new


def _lstm_scan_ref(x_tm, h, c, wih, whh, b, H):
    def step(carry, x_t):
        h, c = carry
        h, c = _lstm_cell_ref(x_t, h, c, wih, whh, b, H)
        return (h, c), h
    (h, c), hs = lax.scan(step, (h, c), x_tm)
    return hs, h, c


def eda_forward_ref(xs, zeros_dec, params):
    B, T, H = xs.shape
    xs_t = jnp.transpose(xs, (1, 0, 2))
    zd_t = jnp.transpose(zeros_dec, (1, 0, 2))
    h0 = jnp.zeros((B, H), jnp.float32)
    c0 = jnp.zeros((B, H), jnp.float32)
    _, h, c = _lstm_scan_ref(xs_t, h0, c0,
                             params["wih_e"], params["whh_e"], params["b_e"], H)
    hs, _, _ = _lstm_scan_ref(zd_t, h, c,
                              params["wih_d"], params["whh_d"], params["b_d"], H)
    return jnp.transpose(hs, (1, 0, 2))


# --------------------------------------------------------------------------
if __name__ == "__main__":
    MAX_SPK = 8                 # decoder steps (max_n_speakers)
    B, H = 2, 32                # batch, n_units

    key = jax.random.PRNGKey(0)
    k_x, k_p, k_x2 = jax.random.split(key, 3)
    params = init_params(k_p, H)
    zeros_dec = jnp.zeros((B, MAX_SPK, H), jnp.float32)

    # ---- case 1: T divides evenly (single tile + skew epilogue) ------------
    T = 8
    xs = jax.random.normal(k_x, (B, T, H), jnp.float32)
    ref = jax.block_until_ready(eda_forward_ref(xs, zeros_dec, params))

    # f32 path: tight check (validates padding, skewed projection, gate
    # reorder, zero-input decoder simplification).
    att_f32 = jax.block_until_ready(
        eda_forward(xs, MAX_SPK, params, compute_dtype=jnp.float32))
    assert att_f32.shape == (B, MAX_SPK, H)
    assert jnp.allclose(att_f32, ref, atol=2e-4, rtol=2e-4)

    # bf16 path (default): f32 state/accumulation keeps drift tiny.
    attractors, probs = eda_estimate(xs, params, MAX_SPK,
                                     compute_dtype=jnp.bfloat16)
    attractors = jax.block_until_ready(attractors)
    probs = jax.block_until_ready(probs)
    assert attractors.shape == (B, MAX_SPK, H)
    assert probs.shape == (B, MAX_SPK)
    assert jnp.allclose(attractors, ref, atol=5e-2, rtol=5e-2)

    # ---- case 2: ragged T -> multiple tiles, skewed pipeline, masked tail --
    T2 = 13
    xs2 = jax.random.normal(k_x2, (B, T2, H), jnp.float32)
    zeros2 = jnp.zeros((B, MAX_SPK, H), jnp.float32)
    ref2 = jax.block_until_ready(eda_forward_ref(xs2, zeros2, params))
    att2 = jax.block_until_ready(
        eda_forward(xs2, MAX_SPK, params, compute_dtype=jnp.float32,
                    max_time_tile=8))       # nt=2, tT=7, one masked tail step
    assert att2.shape == (B, MAX_SPK, H)
    assert jnp.allclose(att2, ref2, atol=2e-4, rtol=2e-4)

    print("KERNEL_OK")
</pallas_src>

<mosaic_0001>
module attributes {stable_mosaic.version = 11 : i64} {
  func.func @kernel(%arg0: i32, %arg1: memref<8x8x128xf32, #tpu.memory_space<vmem>>, %arg2: memref<128x512xf32, #tpu.memory_space<vmem>>, %arg3: memref<128x512xf32, #tpu.memory_space<vmem>>, %arg4: memref<1x512xf32, #tpu.memory_space<vmem>>, %arg5: memref<128x512xf32, #tpu.memory_space<vmem>>, %arg6: memref<1x512xf32, #tpu.memory_space<vmem>>, %arg7: memref<8x8x128xf32, #tpu.memory_space<vmem>>, %arg8: memref<8x128xf32, #tpu.memory_space<vmem>>, %arg9: memref<8x128xf32, #tpu.memory_space<vmem>>, %arg10: memref<128x512xf32, #tpu.memory_space<vmem>>) attributes {dimension_semantics = [#tpu.dimension_semantics<arbitrary>], iteration_bounds = array<i64: 2>, scalar_prefetch = 0 : i64, scratch_operands = 3 : i64, tpu.core_type = #tpu.core_type<tc>, window_params = [{transform_indices = @transform_0, window_bounds = array<i64: 8, 8, 128>}, {pipeline_mode = #tpu.pipeline_mode<synchronous>, transform_indices = @transform_1, window_bounds = array<i64: 128, 512>}, {pipeline_mode = #tpu.pipeline_mode<synchronous>, transform_indices = @transform_2, window_bounds = array<i64: 128, 512>}, {pipeline_mode = #tpu.pipeline_mode<synchronous>, transform_indices = @transform_3, window_bounds = array<i64: 1, 512>}, {pipeline_mode = #tpu.pipeline_mode<synchronous>, transform_indices = @transform_4, window_bounds = array<i64: 128, 512>}, {pipeline_mode = #tpu.pipeline_mode<synchronous>, transform_indices = @transform_5, window_bounds = array<i64: 1, 512>}, {pipeline_mode = #tpu.pipeline_mode<synchronous>, transform_indices = @transform_6, window_bounds = array<i64: 8, 8, 128>}]} {
    %c0_i32 = arith.constant 0 : i32
    %0 = arith.cmpi eq, %arg0, %c0_i32 : i32
    %1 = arith.extui %0 : i1 to i32
    %c0_i32_0 = arith.constant 0 : i32
    %2 = arith.cmpi ne, %1, %c0_i32_0 : i32
    scf.if %2 {
      %cst = arith.constant 0.000000e+00 : f32
      %9 = vector.broadcast %cst : f32 to vector<8x128xf32>
      %c0 = arith.constant 0 : index
      %c0_4 = arith.constant 0 : index
      %10 = vector.load %arg8[%c0, %c0_4] : memref<8x128xf32, #tpu.memory_space<vmem>>, vector<8x128xf32>
      tpu.vector_store %arg8[%c0, %c0_4], %9 {strides = array<i32>} : memref<8x128xf32, #tpu.memory_space<vmem>>, vector<8x128xf32>,
      %cst_5 = arith.constant 0.000000e+00 : f32
      %11 = vector.broadcast %cst_5 : f32 to vector<8x128xf32>
      %c0_6 = arith.constant 0 : index
      %c0_7 = arith.constant 0 : index
      %12 = vector.load %arg9[%c0_6, %c0_7] : memref<8x128xf32, #tpu.memory_space<vmem>>, vector<8x128xf32>
      tpu.vector_store %arg9[%c0_6, %c0_7], %11 {strides = array<i32>} : memref<8x128xf32, #tpu.memory_space<vmem>>, vector<8x128xf32>,
    } else {
    }
    %c1_i32 = arith.constant 1 : i32
    %3 = arith.cmpi slt, %arg0, %c1_i32 : i32
    %4 = arith.extui %3 : i1 to i32
    %c0_i32_1 = arith.constant 0 : i32
    %5 = arith.cmpi ne, %4, %c0_i32_1 : i32
    scf.if %5 {
      %c0 = arith.constant 0 : index
      %c0_4 = arith.constant 0 : index
      %c0_5 = arith.constant 0 : index
      %9 = vector.load %arg1[%c0, %c0_4, %c0_5] : memref<8x8x128xf32, #tpu.memory_space<vmem>>, vector<8x8x128xf32>
      %10 = vector.shape_cast %9 : vector<8x8x128xf32> to vector<64x128xf32>
      %c2_i32 = arith.constant 2 : i32
      %c0_i32_6 = arith.constant 0 : i32
      %11 = arith.cmpi eq, %c2_i32, %c0_i32_6 : i32
      %c1_i32_7 = arith.constant 1 : i32
      %12 = arith.select %11, %c1_i32_7, %c2_i32 : i32
      %13 = arith.remsi %arg0, %12 : i32
      %c0_i32_8 = arith.constant 0 : i32
      %14 = arith.cmpi ne, %13, %c0_i32_8 : i32
      %c0_i32_9 = arith.constant 0 : i32
      %15 = arith.cmpi slt, %13, %c0_i32_9 : i32
      %c0_i32_10 = arith.constant 0 : i32
      %16 = arith.cmpi slt, %12, %c0_i32_10 : i32
      %17 = arith.xori %15, %16 : i1
      %18 = arith.andi %17, %14 : i1
      %19 = arith.addi %13, %12 : i32
      %20 = arith.select %18, %19, %13 : i32
      %c64_i32 = arith.constant 64 : i32
      %21 = arith.muli %20, %c64_i32 : i32
      %22 = tpu.assume_multiple %21, 64 : i32
      %c0_11 = arith.constant 0 : index
      %c0_12 = arith.constant 0 : index
      %23 = vector.load %arg2[%c0_11, %c0_12] : memref<128x512xf32, #tpu.memory_space<vmem>>, vector<128x512xf32>
      %cst = arith.constant dense<0.000000e+00> : vector<64x512xf32>
      %24 = tpu.matmul %10, %23, %cst {dimension_numbers = #tpu.dot_dimension_numbers<[1], [0], [0], [1], [0, 0, 1, 1], [], []>} : vector<64x128xf32>, vector<128x512xf32>, vector<64x512xf32> -> vector<64x512xf32>
      %c0_13 = arith.constant 0 : index
      %c0_14 = arith.constant 0 : index
      %25 = vector.load %arg4[%c0_13, %c0_14] : memref<1x512xf32, #tpu.memory_space<vmem>>, vector<1x512xf32>
      %26 = vector.broadcast %25 : vector<1x512xf32> to vector<64x512xf32>
      %27 = arith.addf %24, %26 : vector<64x512xf32>
      %28 = arith.index_cast %22 : i32 to index
      %c0_15 = arith.constant 0 : index
      %29 = vector.load %arg10[%28, %c0_15] : memref<128x512xf32, #tpu.memory_space<vmem>>, vector<64x512xf32>
      tpu.vector_store %arg10[%28, %c0_15], %27 {strides = array<i32>} : memref<128x512xf32, #tpu.memory_space<vmem>>, vector<64x512xf32>,
    } else {
    }
    %c0_i32_2 = arith.constant 0 : i32
    %6 = arith.cmpi sgt, %arg0, %c0_i32_2 : i32
    %7 = arith.extui %6 : i1 to i32
    %c0_i32_3 = arith.constant 0 : i32
    %8 = arith.cmpi ne, %7, %c0_i32_3 : i32
    scf.if %8 {
      %c0 = arith.constant 0 : index
      %c0_4 = arith.constant 0 : index
      %9 = vector.load %arg3[%c0, %c0_4] : memref<128x512xf32, #tpu.memory_space<vmem>>, vector<128x512xf32>
      %c1_i32_5 = arith.constant 1 : i32
      %10 = arith.subi %arg0, %c1_i32_5 : i32
      %c2_i32 = arith.constant 2 : i32
      %c0_i32_6 = arith.constant 0 : i32
      %11 = arith.cmpi eq, %c2_i32, %c0_i32_6 : i32
      %c1_i32_7 = arith.constant 1 : i32
      %12 = arith.select %11, %c1_i32_7, %c2_i32 : i32
      %13 = arith.remsi %10, %12 : i32
      %c0_i32_8 = arith.constant 0 : i32
      %14 = arith.cmpi ne, %13, %c0_i32_8 : i32
      %c0_i32_9 = arith.constant 0 : i32
      %15 = arith.cmpi slt, %13, %c0_i32_9 : i32
      %c0_i32_10 = arith.constant 0 : i32
      %16 = arith.cmpi slt, %12, %c0_i32_10 : i32
      %17 = arith.xori %15, %16 : i1
      %18 = arith.andi %17, %14 : i1
      %19 = arith.addi %13, %12 : i32
      %20 = arith.select %18, %19, %13 : i32
      %c64_i32 = arith.constant 64 : i32
      %21 = arith.muli %20, %c64_i32 : i32
      %c0_11 = arith.constant 0 : index
      %c0_12 = arith.constant 0 : index
      %22 = vector.load %arg8[%c0_11, %c0_12] : memref<8x128xf32, #tpu.memory_space<vmem>>, vector<8x128xf32>
      %c0_13 = arith.constant 0 : index
      %c0_14 = arith.constant 0 : index
      %23 = vector.load %arg9[%c0_13, %c0_14] : memref<8x128xf32, #tpu.memory_space<vmem>>, vector<8x128xf32>
      %c0_i32_15 = arith.constant 0 : i32
      %c8_i32 = arith.constant 8 : i32
      %24 = arith.muli %c0_i32_15, %c8_i32 : i32
      %25 = arith.addi %21, %24 : i32
      %26 = tpu.assume_multiple %25, 8 : i32
      %27 = arith.index_cast %26 : i32 to index
      %c0_16 = arith.constant 0 : index
      %28 = vector.load %arg10[%27, %c0_16] : memref<128x512xf32, #tpu.memory_space<vmem>>, vector<8x512xf32>
      %cst = arith.constant dense<0.000000e+00> : vector<8x512xf32>
      %29 = tpu.matmul %22, %9, %cst {dimension_numbers = #tpu.dot_dimension_numbers<[1], [0], [0], [1], [0, 0, 1, 1], [], []>} : vector<8x128xf32>, vector<128x512xf32>, vector<8x512xf32> -> vector<8x512xf32>
      %30 = arith.addf %28, %29 : vector<8x512xf32>
      %31 = vector.extract_strided_slice %30 {offsets = [0, 0], sizes = [8, 384], strides = [1, 1]} : vector<8x512xf32> to vector<8x384xf32>
      %32 = arith.negf %31 : vector<8x384xf32>
      %33 = math.exp %32 : vector<8x384xf32>
      %cst_17 = arith.constant 1.000000e+00 : f32
      %34 = vector.broadcast %cst_17 : f32 to vector<8x384xf32>
      %35 = arith.addf %34, %33 : vector<8x384xf32>
      %36 = arith.divf %34, %35 : vector<8x384xf32>
      %37 = vector.extract_strided_slice %30 {offsets = [0, 384], sizes = [8, 128], strides = [1, 1]} : vector<8x512xf32> to vector<8x128xf32>
      %38 = math.tanh %37 : vector<8x128xf32>
      %39 = vector.extract_strided_slice %36 {offsets = [0, 0], sizes = [8, 128], strides = [1, 1]} : vector<8x384xf32> to vector<8x128xf32>
      %40 = vector.extract_strided_slice %36 {offsets = [0, 128], sizes = [8, 128], strides = [1, 1]} : vector<8x384xf32> to vector<8x128xf32>
      %41 = vector.extract_strided_slice %36 {offsets = [0, 256], sizes = [8, 128], strides = [1, 1]} : vector<8x384xf32> to vector<8x128xf32>
      %42 = arith.mulf %40, %23 : vector<8x128xf32>
      %43 = arith.mulf %39, %38 : vector<8x128xf32>
      %44 = arith.addf %42, %43 : vector<8x128xf32>
      %45 = math.tanh %44 : vector<8x128xf32>
      %46 = arith.mulf %41, %45 : vector<8x128xf32>
      %c1_i32_18 = arith.constant 1 : i32
      %c8_i32_19 = arith.constant 8 : i32
      %47 = arith.muli %c1_i32_18, %c8_i32_19 : i32
      %48 = arith.addi %21, %47 : i32
      %49 = tpu.assume_multiple %48, 8 : i32
      %50 = arith.index_cast %49 : i32 to index
      %c0_20 = arith.constant 0 : index
      %51 = vector.load %arg10[%50, %c0_20] : memref<128x512xf32, #tpu.memory_space<vmem>>, vector<8x512xf32>
      %cst_21 = arith.constant dense<0.000000e+00> : vector<8x512xf32>
      %52 = tpu.matmul %46, %9, %cst_21 {dimension_numbers = #tpu.dot_dimension_numbers<[1], [0], [0], [1], [0, 0, 1, 1], [], []>} : vector<8x128xf32>, vector<128x512xf32>, vector<8x512xf32> -> vector<8x512xf32>
      %53 = arith.addf %51, %52 : vector<8x512xf32>
      %54 = vector.extract_strided_slice %53 {offsets = [0, 0], sizes = [8, 384], strides = [1, 1]} : vector<8x512xf32> to vector<8x384xf32>
      %55 = arith.negf %54 : vector<8x384xf32>
      %56 = math.exp %55 : vector<8x384xf32>
      %cst_22 = arith.constant 1.000000e+00 : f32
      %57 = vector.broadcast %cst_22 : f32 to vector<8x384xf32>
      %58 = arith.addf %57, %56 : vector<8x384xf32>
      %59 = arith.divf %57, %58 : vector<8x384xf32>
      %60 = vector.extract_strided_slice %53 {offsets = [0, 384], sizes = [8, 128], strides = [1, 1]} : vector<8x512xf32> to vector<8x128xf32>
      %61 = math.tanh %60 : vector<8x128xf32>
      %62 = vector.extract_strided_slice %59 {offsets = [0, 0], sizes = [8, 128], strides = [1, 1]} : vector<8x384xf32> to vector<8x128xf32>
      %63 = vector.extract_strided_slice %59 {offsets = [0, 128], sizes = [8, 128], strides = [1, 1]} : vector<8x384xf32> to vector<8x128xf32>
      %64 = vector.extract_strided_slice %59 {offsets = [0, 256], sizes = [8, 128], strides = [1, 1]} : vector<8x384xf32> to vector<8x128xf32>
      %65 = arith.mulf %63, %44 : vector<8x128xf32>
      %66 = arith.mulf %62, %61 : vector<8x128xf32>
      %67 = arith.addf %65, %66 : vector<8x128xf32>
      %68 = math.tanh %67 : vector<8x128xf32>
      %69 = arith.mulf %64, %68 : vector<8x128xf32>
      %c2_i32_23 = arith.constant 2 : i32
      %c8_i32_24 = arith.constant 8 : i32
      %70 = arith.muli %c2_i32_23, %c8_i32_24 : i32
      %71 = arith.addi %21, %70 : i32
      %72 = tpu.assume_multiple %71, 8 : i32
      %73 = arith.index_cast %72 : i32 to index
      %c0_25 = arith.constant 0 : index
      %74 = vector.load %arg10[%73, %c0_25] : memref<128x512xf32, #tpu.memory_space<vmem>>, vector<8x512xf32>
      %cst_26 = arith.constant dense<0.000000e+00> : vector<8x512xf32>
      %75 = tpu.matmul %69, %9, %cst_26 {dimension_numbers = #tpu.dot_dimension_numbers<[1], [0], [0], [1], [0, 0, 1, 1], [], []>} : vector<8x128xf32>, vector<128x512xf32>, vector<8x512xf32> -> vector<8x512xf32>
      %76 = arith.addf %74, %75 : vector<8x512xf32>
      %77 = vector.extract_strided_slice %76 {offsets = [0, 0], sizes = [8, 384], strides = [1, 1]} : vector<8x512xf32> to vector<8x384xf32>
      %78 = arith.negf %77 : vector<8x384xf32>
      %79 = math.exp %78 : vector<8x384xf32>
      %cst_27 = arith.constant 1.000000e+00 : f32
      %80 = vector.broadcast %cst_27 : f32 to vector<8x384xf32>
      %81 = arith.addf %80, %79 : vector<8x384xf32>
      %82 = arith.divf %80, %81 : vector<8x384xf32>
      %83 = vector.extract_strided_slice %76 {offsets = [0, 384], sizes = [8, 128], strides = [1, 1]} : vector<8x512xf32> to vector<8x128xf32>
      %84 = math.tanh %83 : vector<8x128xf32>
      %85 = vector.extract_strided_slice %82 {offsets = [0, 0], sizes = [8, 128], strides = [1, 1]} : vector<8x384xf32> to vector<8x128xf32>
      %86 = vector.extract_strided_slice %82 {offsets = [0, 128], sizes = [8, 128], strides = [1, 1]} : vector<8x384xf32> to vector<8x128xf32>
      %87 = vector.extract_strided_slice %82 {offsets = [0, 256], sizes = [8, 128], strides = [1, 1]} : vector<8x384xf32> to vector<8x128xf32>
      %88 = arith.mulf %86, %67 : vector<8x128xf32>
      %89 = arith.mulf %85, %84 : vector<8x128xf32>
      %90 = arith.addf %88, %89 : vector<8x128xf32>
      %91 = math.tanh %90 : vector<8x128xf32>
      %92 = arith.mulf %87, %91 : vector<8x128xf32>
      %c3_i32 = arith.constant 3 : i32
      %c8_i32_28 = arith.constant 8 : i32
      %93 = arith.muli %c3_i32, %c8_i32_28 : i32
      %94 = arith.addi %21, %93 : i32
      %95 = tpu.assume_multiple %94, 8 : i32
      %96 = arith.index_cast %95 : i32 to index
      %c0_29 = arith.constant 0 : index
      %97 = vector.load %arg10[%96, %c0_29] : memref<128x512xf32, #tpu.memory_space<vmem>>, vector<8x512xf32>
      %cst_30 = arith.constant dense<0.000000e+00> : vector<8x512xf32>
      %98 = tpu.matmul %92, %9, %cst_30 {dimension_numbers = #tpu.dot_dimension_numbers<[1], [0], [0], [1], [0, 0, 1, 1], [], []>} : vector<8x128xf32>, vector<128x512xf32>, vector<8x512xf32> -> vector<8x512xf32>
      %99 = arith.addf %97, %98 : vector<8x512xf32>
      %100 = vector.extract_strided_slice %99 {offsets = [0, 0], sizes = [8, 384], strides = [1, 1]} : vector<8x512xf32> to vector<8x384xf32>
      %101 = arith.negf %100 : vector<8x384xf32>
      %102 = math.exp %101 : vector<8x384xf32>
      %cst_31 = arith.constant 1.000000e+00 : f32
      %103 = vector.broadcast %cst_31 : f32 to vector<8x384xf32>
      %104 = arith.addf %103, %102 : vector<8x384xf32>
      %105 = arith.divf %103, %104 : vector<8x384xf32>
      %106 = vector.extract_strided_slice %99 {offsets = [0, 384], sizes = [8, 128], strides = [1, 1]} : vector<8x512xf32> to vector<8x128xf32>
      %107 = math.tanh %106 : vector<8x128xf32>
      %108 = vector.extract_strided_slice %105 {offsets = [0, 0], sizes = [8, 128], strides = [1, 1]} : vector<8x384xf32> to vector<8x128xf32>
      %109 = vector.extract_strided_slice %105 {offsets = [0, 128], sizes = [8, 128], strides = [1, 1]} : vector<8x384xf32> to vector<8x128xf32>
      %110 = vector.extract_strided_slice %105 {offsets = [0, 256], sizes = [8, 128], strides = [1, 1]} : vector<8x384xf32> to vector<8x128xf32>
      %111 = arith.mulf %109, %90 : vector<8x128xf32>
      %112 = arith.mulf %108, %107 : vector<8x128xf32>
      %113 = arith.addf %111, %112 : vector<8x128xf32>
      %114 = math.tanh %113 : vector<8x128xf32>
      %115 = arith.mulf %110, %114 : vector<8x128xf32>
      %c4_i32 = arith.constant 4 : i32
      %c8_i32_32 = arith.constant 8 : i32
      %116 = arith.muli %c4_i32, %c8_i32_32 : i32
      %117 = arith.addi %21, %116 : i32
      %118 = tpu.assume_multiple %117, 8 : i32
      %119 = arith.index_cast %118 : i32 to index
      %c0_33 = arith.constant 0 : index
      %120 = vector.load %arg10[%119, %c0_33] : memref<128x512xf32, #tpu.memory_space<vmem>>, vector<8x512xf32>
      %cst_34 = arith.constant dense<0.000000e+00> : vector<8x512xf32>
      %121 = tpu.matmul %115, %9, %cst_34 {dimension_numbers = #tpu.dot_dimension_numbers<[1], [0], [0], [1], [0, 0, 1, 1], [], []>} : vector<8x128xf32>, vector<128x512xf32>, vector<8x512xf32> -> vector<8x512xf32>
      %122 = arith.addf %120, %121 : vector<8x512xf32>
      %123 = vector.extract_strided_slice %122 {offsets = [0, 0], sizes = [8, 384], strides = [1, 1]} : vector<8x512xf32> to vector<8x384xf32>
      %124 = arith.negf %123 : vector<8x384xf32>
      %125 = math.exp %124 : vector<8x384xf32>
      %cst_35 = arith.constant 1.000000e+00 : f32
      %126 = vector.broadcast %cst_35 : f32 to vector<8x384xf32>
      %127 = arith.addf %126, %125 : vector<8x384xf32>
      %128 = arith.divf %126, %127 : vector<8x384xf32>
      %129 = vector.extract_strided_slice %122 {offsets = [0, 384], sizes = [8, 128], strides = [1, 1]} : vector<8x512xf32> to vector<8x128xf32>
      %130 = math.tanh %129 : vector<8x128xf32>
      %131 = vector.extract_strided_slice %128 {offsets = [0, 0], sizes = [8, 128], strides = [1, 1]} : vector<8x384xf32> to vector<8x128xf32>
      %132 = vector.extract_strided_slice %128 {offsets = [0, 128], sizes = [8, 128], strides = [1, 1]} : vector<8x384xf32> to vector<8x128xf32>
      %133 = vector.extract_strided_slice %128 {offsets = [0, 256], sizes = [8, 128], strides = [1, 1]} : vector<8x384xf32> to vector<8x128xf32>
      %134 = arith.mulf %132, %113 : vector<8x128xf32>
      %135 = arith.mulf %131, %130 : vector<8x128xf32>
      %136 = arith.addf %134, %135 : vector<8x128xf32>
      %137 = math.tanh %136 : vector<8x128xf32>
      %138 = arith.mulf %133, %137 : vector<8x128xf32>
      %c5_i32 = arith.constant 5 : i32
      %c8_i32_36 = arith.constant 8 : i32
      %139 = arith.muli %c5_i32, %c8_i32_36 : i32
      %140 = arith.addi %21, %139 : i32
      %141 = tpu.assume_multiple %140, 8 : i32
      %142 = arith.index_cast %141 : i32 to index
      %c0_37 = arith.constant 0 : index
      %143 = vector.load %arg10[%142, %c0_37] : memref<128x512xf32, #tpu.memory_space<vmem>>, vector<8x512xf32>
      %cst_38 = arith.constant dense<0.000000e+00> : vector<8x512xf32>
      %144 = tpu.matmul %138, %9, %cst_38 {dimension_numbers = #tpu.dot_dimension_numbers<[1], [0], [0], [1], [0, 0, 1, 1], [], []>} : vector<8x128xf32>, vector<128x512xf32>, vector<8x512xf32> -> vector<8x512xf32>
      %145 = arith.addf %143, %144 : vector<8x512xf32>
      %146 = vector.extract_strided_slice %145 {offsets = [0, 0], sizes = [8, 384], strides = [1, 1]} : vector<8x512xf32> to vector<8x384xf32>
      %147 = arith.negf %146 : vector<8x384xf32>
      %148 = math.exp %147 : vector<8x384xf32>
      %cst_39 = arith.constant 1.000000e+00 : f32
      %149 = vector.broadcast %cst_39 : f32 to vector<8x384xf32>
      %150 = arith.addf %149, %148 : vector<8x384xf32>
      %151 = arith.divf %149, %150 : vector<8x384xf32>
      %152 = vector.extract_strided_slice %145 {offsets = [0, 384], sizes = [8, 128], strides = [1, 1]} : vector<8x512xf32> to vector<8x128xf32>
      %153 = math.tanh %152 : vector<8x128xf32>
      %154 = vector.extract_strided_slice %151 {offsets = [0, 0], sizes = [8, 128], strides = [1, 1]} : vector<8x384xf32> to vector<8x128xf32>
      %155 = vector.extract_strided_slice %151 {offsets = [0, 128], sizes = [8, 128], strides = [1, 1]} : vector<8x384xf32> to vector<8x128xf32>
      %156 = vector.extract_strided_slice %151 {offsets = [0, 256], sizes = [8, 128], strides = [1, 1]} : vector<8x384xf32> to vector<8x128xf32>
      %157 = arith.mulf %155, %136 : vector<8x128xf32>
      %158 = arith.mulf %154, %153 : vector<8x128xf32>
      %159 = arith.addf %157, %158 : vector<8x128xf32>
      %160 = math.tanh %159 : vector<8x128xf32>
      %161 = arith.mulf %156, %160 : vector<8x128xf32>
      %c6_i32 = arith.constant 6 : i32
      %c8_i32_40 = arith.constant 8 : i32
      %162 = arith.muli %c6_i32, %c8_i32_40 : i32
      %163 = arith.addi %21, %162 : i32
      %164 = tpu.assume_multiple %163, 8 : i32
      %165 = arith.index_cast %164 : i32 to index
      %c0_41 = arith.constant 0 : index
      %166 = vector.load %arg10[%165, %c0_41] : memref<128x512xf32, #tpu.memory_space<vmem>>, vector<8x512xf32>
      %cst_42 = arith.constant dense<0.000000e+00> : vector<8x512xf32>
      %167 = tpu.matmul %161, %9, %cst_42 {dimension_numbers = #tpu.dot_dimension_numbers<[1], [0], [0], [1], [0, 0, 1, 1], [], []>} : vector<8x128xf32>, vector<128x512xf32>, vector<8x512xf32> -> vector<8x512xf32>
      %168 = arith.addf %166, %167 : vector<8x512xf32>
      %169 = vector.extract_strided_slice %168 {offsets = [0, 0], sizes = [8, 384], strides = [1, 1]} : vector<8x512xf32> to vector<8x384xf32>
      %170 = arith.negf %169 : vector<8x384xf32>
      %171 = math.exp %170 : vector<8x384xf32>
      %cst_43 = arith.constant 1.000000e+00 : f32
      %172 = vector.broadcast %cst_43 : f32 to vector<8x384xf32>
      %173 = arith.addf %172, %171 : vector<8x384xf32>
      %174 = arith.divf %172, %173 : vector<8x384xf32>
      %175 = vector.extract_strided_slice %168 {offsets = [0, 384], sizes = [8, 128], strides = [1, 1]} : vector<8x512xf32> to vector<8x128xf32>
      %176 = math.tanh %175 : vector<8x128xf32>
      %177 = vector.extract_strided_slice %174 {offsets = [0, 0], sizes = [8, 128], strides = [1, 1]} : vector<8x384xf32> to vector<8x128xf32>
      %178 = vector.extract_strided_slice %174 {offsets = [0, 128], sizes = [8, 128], strides = [1, 1]} : vector<8x384xf32> to vector<8x128xf32>
      %179 = vector.extract_strided_slice %174 {offsets = [0, 256], sizes = [8, 128], strides = [1, 1]} : vector<8x384xf32> to vector<8x128xf32>
      %180 = arith.mulf %178, %159 : vector<8x128xf32>
      %181 = arith.mulf %177, %176 : vector<8x128xf32>
      %182 = arith.addf %180, %181 : vector<8x128xf32>
      %183 = math.tanh %182 : vector<8x128xf32>
      %184 = arith.mulf %179, %183 : vector<8x128xf32>
      %c7_i32 = arith.constant 7 : i32
      %c8_i32_44 = arith.constant 8 : i32
      %185 = arith.muli %c7_i32, %c8_i32_44 : i32
      %186 = arith.addi %21, %185 : i32
      %187 = tpu.assume_multiple %186, 8 : i32
      %188 = arith.index_cast %187 : i32 to index
      %c0_45 = arith.constant 0 : index
      %189 = vector.load %arg10[%188, %c0_45] : memref<128x512xf32, #tpu.memory_space<vmem>>, vector<8x512xf32>
      %cst_46 = arith.constant dense<0.000000e+00> : vector<8x512xf32>
      %190 = tpu.matmul %184, %9, %cst_46 {dimension_numbers = #tpu.dot_dimension_numbers<[1], [0], [0], [1], [0, 0, 1, 1], [], []>} : vector<8x128xf32>, vector<128x512xf32>, vector<8x512xf32> -> vector<8x512xf32>
      %191 = arith.addf %189, %190 : vector<8x512xf32>
      %192 = vector.extract_strided_slice %191 {offsets = [0, 0], sizes = [8, 384], strides = [1, 1]} : vector<8x512xf32> to vector<8x384xf32>
      %193 = arith.negf %192 : vector<8x384xf32>
      %194 = math.exp %193 : vector<8x384xf32>
      %cst_47 = arith.constant 1.000000e+00 : f32
      %195 = vector.broadcast %cst_47 : f32 to vector<8x384xf32>
      %196 = arith.addf %195, %194 : vector<8x384xf32>
      %197 = arith.divf %195, %196 : vector<8x384xf32>
      %198 = vector.extract_strided_slice %191 {offsets = [0, 384], sizes = [8, 128], strides = [1, 1]} : vector<8x512xf32> to vector<8x128xf32>
      %199 = math.tanh %198 : vector<8x128xf32>
      %200 = vector.extract_strided_slice %197 {offsets = [0, 0], sizes = [8, 128], strides = [1, 1]} : vector<8x384xf32> to vector<8x128xf32>
      %201 = vector.extract_strided_slice %197 {offsets = [0, 128], sizes = [8, 128], strides = [1, 1]} : vector<8x384xf32> to vector<8x128xf32>
      %202 = vector.extract_strided_slice %197 {offsets = [0, 256], sizes = [8, 128], strides = [1, 1]} : vector<8x384xf32> to vector<8x128xf32>
      %203 = arith.mulf %201, %182 : vector<8x128xf32>
      %204 = arith.mulf %200, %199 : vector<8x128xf32>
      %205 = arith.addf %203, %204 : vector<8x128xf32>
      %206 = math.tanh %205 : vector<8x128xf32>
      %207 = arith.mulf %202, %206 : vector<8x128xf32>
      %c8_i32_48 = arith.constant 8 : i32
      %c0_49 = arith.constant 0 : index
      %c0_50 = arith.constant 0 : index
      %208 = vector.load %arg8[%c0_49, %c0_50] : memref<8x128xf32, #tpu.memory_space<vmem>>, vector<8x128xf32>
      tpu.vector_store %arg8[%c0_49, %c0_50], %207 {strides = array<i32>} : memref<8x128xf32, #tpu.memory_space<vmem>>, vector<8x128xf32>,
      %c0_51 = arith.constant 0 : index
      %c0_52 = arith.constant 0 : index
      %209 = vector.load %arg9[%c0_51, %c0_52] : memref<8x128xf32, #tpu.memory_space<vmem>>, vector<8x128xf32>
      tpu.vector_store %arg9[%c0_51, %c0_52], %205 {strides = array<i32>} : memref<8x128xf32, #tpu.memory_space<vmem>>, vector<8x128xf32>,
      %c1_i32_53 = arith.constant 1 : i32
      %210 = arith.cmpi eq, %arg0, %c1_i32_53 : i32
      %211 = arith.extui %210 : i1 to i32
      %c0_i32_54 = arith.constant 0 : i32
      %212 = arith.cmpi ne, %211, %c0_i32_54 : i32
      scf.if %212 {
        %c0_55 = arith.constant 0 : index
        %c0_56 = arith.constant 0 : index
        %213 = vector.load %arg5[%c0_55, %c0_56] : memref<128x512xf32, #tpu.memory_space<vmem>>, vector<128x512xf32>
        %c0_57 = arith.constant 0 : index
        %c0_58 = arith.constant 0 : index
        %214 = vector.load %arg6[%c0_57, %c0_58] : memref<1x512xf32, #tpu.memory_space<vmem>>, vector<1x512xf32>
        %215 = vector.shape_cast %214 : vector<1x512xf32> to vector<1x512xf32>
        %216 = vector.broadcast %215 : vector<1x512xf32> to vector<8x512xf32>
        %cst_59 = arith.constant dense<0.000000e+00> : vector<8x512xf32>
        %217 = tpu.matmul %207, %213, %cst_59 {dimension_numbers = #tpu.dot_dimension_numbers<[1], [0], [0], [1], [0, 0, 1, 1], [], []>} : vector<8x128xf32>, vector<128x512xf32>, vector<8x512xf32> -> vector<8x512xf32>
        %218 = arith.addf %216, %217 : vector<8x512xf32>
        %219 = vector.extract_strided_slice %218 {offsets = [0, 0], sizes = [8, 384], strides = [1, 1]} : vector<8x512xf32> to vector<8x384xf32>
        %220 = arith.negf %219 : vector<8x384xf32>
        %221 = math.exp %220 : vector<8x384xf32>
        %cst_60 = arith.constant 1.000000e+00 : f32
        %222 = vector.broadcast %cst_60 : f32 to vector<8x384xf32>
        %223 = arith.addf %222, %221 : vector<8x384xf32>
        %224 = arith.divf %222, %223 : vector<8x384xf32>
        %225 = vector.extract_strided_slice %218 {offsets = [0, 384], sizes = [8, 128], strides = [1, 1]} : vector<8x512xf32> to vector<8x128xf32>
        %226 = math.tanh %225 : vector<8x128xf32>
        %227 = vector.extract_strided_slice %224 {offsets = [0, 0], sizes = [8, 128], strides = [1, 1]} : vector<8x384xf32> to vector<8x128xf32>
        %228 = vector.extract_strided_slice %224 {offsets = [0, 128], sizes = [8, 128], strides = [1, 1]} : vector<8x384xf32> to vector<8x128xf32>
        %229 = vector.extract_strided_slice %224 {offsets = [0, 256], sizes = [8, 128], strides = [1, 1]} : vector<8x384xf32> to vector<8x128xf32>
        %230 = arith.mulf %228, %205 : vector<8x128xf32>
        %231 = arith.mulf %227, %226 : vector<8x128xf32>
        %232 = arith.addf %230, %231 : vector<8x128xf32>
        %233 = math.tanh %232 : vector<8x128xf32>
        %234 = arith.mulf %229, %233 : vector<8x128xf32>
        %c0_61 = arith.constant 0 : index
        %c0_62 = arith.constant 0 : index
        %c0_63 = arith.constant 0 : index
        %235 = vector.load %arg7[%c0_61, %c0_62, %c0_63] : memref<8x8x128xf32, #tpu.memory_space<vmem>>, vector<1x8x128xf32>
        %236 = vector.shape_cast %235 : vector<1x8x128xf32> to vector<8x128xf32>
        %237 = vector.shape_cast %234 : vector<8x128xf32> to vector<1x8x128xf32>
        tpu.vector_store %arg7[%c0_61, %c0_62, %c0_63], %237 {strides = array<i32>} : memref<8x8x128xf32, #tpu.memory_space<vmem>>, vector<1x8x128xf32>,
        %cst_64 = arith.constant dense<0.000000e+00> : vector<8x512xf32>
        %238 = tpu.matmul %234, %213, %cst_64 {dimension_numbers = #tpu.dot_dimension_numbers<[1], [0], [0], [1], [0, 0, 1, 1], [], []>} : vector<8x128xf32>, vector<128x512xf32>, vector<8x512xf32> -> vector<8x512xf32>
        %239 = arith.addf %216, %238 : vector<8x512xf32>
        %240 = vector.extract_strided_slice %239 {offsets = [0, 0], sizes = [8, 384], strides = [1, 1]} : vector<8x512xf32> to vector<8x384xf32>
        %241 = arith.negf %240 : vector<8x384xf32>
        %242 = math.exp %241 : vector<8x384xf32>
        %cst_65 = arith.constant 1.000000e+00 : f32
        %243 = vector.broadcast %cst_65 : f32 to vector<8x384xf32>
        %244 = arith.addf %243, %242 : vector<8x384xf32>
        %245 = arith.divf %243, %244 : vector<8x384xf32>
        %246 = vector.extract_strided_slice %239 {offsets = [0, 384], sizes = [8, 128], strides = [1, 1]} : vector<8x512xf32> to vector<8x128xf32>
        %247 = math.tanh %246 : vector<8x128xf32>
        %248 = vector.extract_strided_slice %245 {offsets = [0, 0], sizes = [8, 128], strides = [1, 1]} : vector<8x384xf32> to vector<8x128xf32>
        %249 = vector.extract_strided_slice %245 {offsets = [0, 128], sizes = [8, 128], strides = [1, 1]} : vector<8x384xf32> to vector<8x128xf32>
        %250 = vector.extract_strided_slice %245 {offsets = [0, 256], sizes = [8, 128], strides = [1, 1]} : vector<8x384xf32> to vector<8x128xf32>
        %251 = arith.mulf %249, %232 : vector<8x128xf32>
        %252 = arith.mulf %248, %247 : vector<8x128xf32>
        %253 = arith.addf %251, %252 : vector<8x128xf32>
        %254 = math.tanh %253 : vector<8x128xf32>
        %255 = arith.mulf %250, %254 : vector<8x128xf32>
        %c1 = arith.constant 1 : index
        %c0_66 = arith.constant 0 : index
        %c0_67 = arith.constant 0 : index
        %256 = vector.load %arg7[%c1, %c0_66, %c0_67] : memref<8x8x128xf32, #tpu.memory_space<vmem>>, vector<1x8x128xf32>
        %257 = vector.shape_cast %256 : vector<1x8x128xf32> to vector<8x128xf32>
        %258 = vector.shape_cast %255 : vector<8x128xf32> to vector<1x8x128xf32>
        tpu.vector_store %arg7[%c1, %c0_66, %c0_67], %258 {strides = array<i32>} : memref<8x8x128xf32, #tpu.memory_space<vmem>>, vector<1x8x128xf32>,
        %cst_68 = arith.constant dense<0.000000e+00> : vector<8x512xf32>
        %259 = tpu.matmul %255, %213, %cst_68 {dimension_numbers = #tpu.dot_dimension_numbers<[1], [0], [0], [1], [0, 0, 1, 1], [], []>} : vector<8x128xf32>, vector<128x512xf32>, vector<8x512xf32> -> vector<8x512xf32>
        %260 = arith.addf %216, %259 : vector<8x512xf32>
        %261 = vector.extract_strided_slice %260 {offsets = [0, 0], sizes = [8, 384], strides = [1, 1]} : vector<8x512xf32> to vector<8x384xf32>
        %262 = arith.negf %261 : vector<8x384xf32>
        %263 = math.exp %262 : vector<8x384xf32>
        %cst_69 = arith.constant 1.000000e+00 : f32
        %264 = vector.broadcast %cst_69 : f32 to vector<8x384xf32>
        %265 = arith.addf %264, %263 : vector<8x384xf32>
        %266 = arith.divf %264, %265 : vector<8x384xf32>
        %267 = vector.extract_strided_slice %260 {offsets = [0, 384], sizes = [8, 128], strides = [1, 1]} : vector<8x512xf32> to vector<8x128xf32>
        %268 = math.tanh %267 : vector<8x128xf32>
        %269 = vector.extract_strided_slice %266 {offsets = [0, 0], sizes = [8, 128], strides = [1, 1]} : vector<8x384xf32> to vector<8x128xf32>
        %270 = vector.extract_strided_slice %266 {offsets = [0, 128], sizes = [8, 128], strides = [1, 1]} : vector<8x384xf32> to vector<8x128xf32>
        %271 = vector.extract_strided_slice %266 {offsets = [0, 256], sizes = [8, 128], strides = [1, 1]} : vector<8x384xf32> to vector<8x128xf32>
        %272 = arith.mulf %270, %253 : vector<8x128xf32>
        %273 = arith.mulf %269, %268 : vector<8x128xf32>
        %274 = arith.addf %272, %273 : vector<8x128xf32>
        %275 = math.tanh %274 : vector<8x128xf32>
        %276 = arith.mulf %271, %275 : vector<8x128xf32>
        %c2 = arith.constant 2 : index
        %c0_70 = arith.constant 0 : index
        %c0_71 = arith.constant 0 : index
        %277 = vector.load %arg7[%c2, %c0_70, %c0_71] : memref<8x8x128xf32, #tpu.memory_space<vmem>>, vector<1x8x128xf32>
        %278 = vector.shape_cast %277 : vector<1x8x128xf32> to vector<8x128xf32>
        %279 = vector.shape_cast %276 : vector<8x128xf32> to vector<1x8x128xf32>
        tpu.vector_store %arg7[%c2, %c0_70, %c0_71], %279 {strides = array<i32>} : memref<8x8x128xf32, #tpu.memory_space<vmem>>, vector<1x8x128xf32>,
        %cst_72 = arith.constant dense<0.000000e+00> : vector<8x512xf32>
        %280 = tpu.matmul %276, %213, %cst_72 {dimension_numbers = #tpu.dot_dimension_numbers<[1], [0], [0], [1], [0, 0, 1, 1], [], []>} : vector<8x128xf32>, vector<128x512xf32>, vector<8x512xf32> -> vector<8x512xf32>
        %281 = arith.addf %216, %280 : vector<8x512xf32>
        %282 = vector.extract_strided_slice %281 {offsets = [0, 0], sizes = [8, 384], strides = [1, 1]} : vector<8x512xf32> to vector<8x384xf32>
        %283 = arith.negf %282 : vector<8x384xf32>
        %284 = math.exp %283 : vector<8x384xf32>
        %cst_73 = arith.constant 1.000000e+00 : f32
        %285 = vector.broadcast %cst_73 : f32 to vector<8x384xf32>
        %286 = arith.addf %285, %284 : vector<8x384xf32>
        %287 = arith.divf %285, %286 : vector<8x384xf32>
        %288 = vector.extract_strided_slice %281 {offsets = [0, 384], sizes = [8, 128], strides = [1, 1]} : vector<8x512xf32> to vector<8x128xf32>
        %289 = math.tanh %288 : vector<8x128xf32>
        %290 = vector.extract_strided_slice %287 {offsets = [0, 0], sizes = [8, 128], strides = [1, 1]} : vector<8x384xf32> to vector<8x128xf32>
        %291 = vector.extract_strided_slice %287 {offsets = [0, 128], sizes = [8, 128], strides = [1, 1]} : vector<8x384xf32> to vector<8x128xf32>
        %292 = vector.extract_strided_slice %287 {offsets = [0, 256], sizes = [8, 128], strides = [1, 1]} : vector<8x384xf32> to vector<8x128xf32>
        %293 = arith.mulf %291, %274 : vector<8x128xf32>
        %294 = arith.mulf %290, %289 : vector<8x128xf32>
        %295 = arith.addf %293, %294 : vector<8x128xf32>
        %296 = math.tanh %295 : vector<8x128xf32>
        %297 = arith.mulf %292, %296 : vector<8x128xf32>
        %c3 = arith.constant 3 : index
        %c0_74 = arith.constant 0 : index
        %c0_75 = arith.constant 0 : index
        %298 = vector.load %arg7[%c3, %c0_74, %c0_75] : memref<8x8x128xf32, #tpu.memory_space<vmem>>, vector<1x8x128xf32>
        %299 = vector.shape_cast %298 : vector<1x8x128xf32> to vector<8x128xf32>
        %300 = vector.shape_cast %297 : vector<8x128xf32> to vector<1x8x128xf32>
        tpu.vector_store %arg7[%c3, %c0_74, %c0_75], %300 {strides = array<i32>} : memref<8x8x128xf32, #tpu.memory_space<vmem>>, vector<1x8x128xf32>,
        %cst_76 = arith.constant dense<0.000000e+00> : vector<8x512xf32>
        %301 = tpu.matmul %297, %213, %cst_76 {dimension_numbers = #tpu.dot_dimension_numbers<[1], [0], [0], [1], [0, 0, 1, 1], [], []>} : vector<8x128xf32>, vector<128x512xf32>, vector<8x512xf32> -> vector<8x512xf32>
        %302 = arith.addf %216, %301 : vector<8x512xf32>
        %303 = vector.extract_strided_slice %302 {offsets = [0, 0], sizes = [8, 384], strides = [1, 1]} : vector<8x512xf32> to vector<8x384xf32>
        %304 = arith.negf %303 : vector<8x384xf32>
        %305 = math.exp %304 : vector<8x384xf32>
        %cst_77 = arith.constant 1.000000e+00 : f32
        %306 = vector.broadcast %cst_77 : f32 to vector<8x384xf32>
        %307 = arith.addf %306, %305 : vector<8x384xf32>
        %308 = arith.divf %306, %307 : vector<8x384xf32>
        %309 = vector.extract_strided_slice %302 {offsets = [0, 384], sizes = [8, 128], strides = [1, 1]} : vector<8x512xf32> to vector<8x128xf32>
        %310 = math.tanh %309 : vector<8x128xf32>
        %311 = vector.extract_strided_slice %308 {offsets = [0, 0], sizes = [8, 128], strides = [1, 1]} : vector<8x384xf32> to vector<8x128xf32>
        %312 = vector.extract_strided_slice %308 {offsets = [0, 128], sizes = [8, 128], strides = [1, 1]} : vector<8x384xf32> to vector<8x128xf32>
        %313 = vector.extract_strided_slice %308 {offsets = [0, 256], sizes = [8, 128], strides = [1, 1]} : vector<8x384xf32> to vector<8x128xf32>
        %314 = arith.mulf %312, %295 : vector<8x128xf32>
        %315 = arith.mulf %311, %310 : vector<8x128xf32>
        %316 = arith.addf %314, %315 : vector<8x128xf32>
        %317 = math.tanh %316 : vector<8x128xf32>
        %318 = arith.mulf %313, %317 : vector<8x128xf32>
        %c4 = arith.constant 4 : index
        %c0_78 = arith.constant 0 : index
        %c0_79 = arith.constant 0 : index
        %319 = vector.load %arg7[%c4, %c0_78, %c0_79] : memref<8x8x128xf32, #tpu.memory_space<vmem>>, vector<1x8x128xf32>
        %320 = vector.shape_cast %319 : vector<1x8x128xf32> to vector<8x128xf32>
        %321 = vector.shape_cast %318 : vector<8x128xf32> to vector<1x8x128xf32>
        tpu.vector_store %arg7[%c4, %c0_78, %c0_79], %321 {strides = array<i32>} : memref<8x8x128xf32, #tpu.memory_space<vmem>>, vector<1x8x128xf32>,
        %cst_80 = arith.constant dense<0.000000e+00> : vector<8x512xf32>
        %322 = tpu.matmul %318, %213, %cst_80 {dimension_numbers = #tpu.dot_dimension_numbers<[1], [0], [0], [1], [0, 0, 1, 1], [], []>} : vector<8x128xf32>, vector<128x512xf32>, vector<8x512xf32> -> vector<8x512xf32>
        %323 = arith.addf %216, %322 : vector<8x512xf32>
        %324 = vector.extract_strided_slice %323 {offsets = [0, 0], sizes = [8, 384], strides = [1, 1]} : vector<8x512xf32> to vector<8x384xf32>
        %325 = arith.negf %324 : vector<8x384xf32>
        %326 = math.exp %325 : vector<8x384xf32>
        %cst_81 = arith.constant 1.000000e+00 : f32
        %327 = vector.broadcast %cst_81 : f32 to vector<8x384xf32>
        %328 = arith.addf %327, %326 : vector<8x384xf32>
        %329 = arith.divf %327, %328 : vector<8x384xf32>
        %330 = vector.extract_strided_slice %323 {offsets = [0, 384], sizes = [8, 128], strides = [1, 1]} : vector<8x512xf32> to vector<8x128xf32>
        %331 = math.tanh %330 : vector<8x128xf32>
        %332 = vector.extract_strided_slice %329 {offsets = [0, 0], sizes = [8, 128], strides = [1, 1]} : vector<8x384xf32> to vector<8x128xf32>
        %333 = vector.extract_strided_slice %329 {offsets = [0, 128], sizes = [8, 128], strides = [1, 1]} : vector<8x384xf32> to vector<8x128xf32>
        %334 = vector.extract_strided_slice %329 {offsets = [0, 256], sizes = [8, 128], strides = [1, 1]} : vector<8x384xf32> to vector<8x128xf32>
        %335 = arith.mulf %333, %316 : vector<8x128xf32>
        %336 = arith.mulf %332, %331 : vector<8x128xf32>
        %337 = arith.addf %335, %336 : vector<8x128xf32>
        %338 = math.tanh %337 : vector<8x128xf32>
        %339 = arith.mulf %334, %338 : vector<8x128xf32>
        %c5 = arith.constant 5 : index
        %c0_82 = arith.constant 0 : index
        %c0_83 = arith.constant 0 : index
        %340 = vector.load %arg7[%c5, %c0_82, %c0_83] : memref<8x8x128xf32, #tpu.memory_space<vmem>>, vector<1x8x128xf32>
        %341 = vector.shape_cast %340 : vector<1x8x128xf32> to vector<8x128xf32>
        %342 = vector.shape_cast %339 : vector<8x128xf32> to vector<1x8x128xf32>
        tpu.vector_store %arg7[%c5, %c0_82, %c0_83], %342 {strides = array<i32>} : memref<8x8x128xf32, #tpu.memory_space<vmem>>, vector<1x8x128xf32>,
        %cst_84 = arith.constant dense<0.000000e+00> : vector<8x512xf32>
        %343 = tpu.matmul %339, %213, %cst_84 {dimension_numbers = #tpu.dot_dimension_numbers<[1], [0], [0], [1], [0, 0, 1, 1], [], []>} : vector<8x128xf32>, vector<128x512xf32>, vector<8x512xf32> -> vector<8x512xf32>
        %344 = arith.addf %216, %343 : vector<8x512xf32>
        %345 = vector.extract_strided_slice %344 {offsets = [0, 0], sizes = [8, 384], strides = [1, 1]} : vector<8x512xf32> to vector<8x384xf32>
        %346 = arith.negf %345 : vector<8x384xf32>
        %347 = math.exp %346 : vector<8x384xf32>
        %cst_85 = arith.constant 1.000000e+00 : f32
        %348 = vector.broadcast %cst_85 : f32 to vector<8x384xf32>
        %349 = arith.addf %348, %347 : vector<8x384xf32>
        %350 = arith.divf %348, %349 : vector<8x384xf32>
        %351 = vector.extract_strided_slice %344 {offsets = [0, 384], sizes = [8, 128], strides = [1, 1]} : vector<8x512xf32> to vector<8x128xf32>
        %352 = math.tanh %351 : vector<8x128xf32>
        %353 = vector.extract_strided_slice %350 {offsets = [0, 0], sizes = [8, 128], strides = [1, 1]} : vector<8x384xf32> to vector<8x128xf32>
        %354 = vector.extract_strided_slice %350 {offsets = [0, 128], sizes = [8, 128], strides = [1, 1]} : vector<8x384xf32> to vector<8x128xf32>
        %355 = vector.extract_strided_slice %350 {offsets = [0, 256], sizes = [8, 128], strides = [1, 1]} : vector<8x384xf32> to vector<8x128xf32>
        %356 = arith.mulf %354, %337 : vector<8x128xf32>
        %357 = arith.mulf %353, %352 : vector<8x128xf32>
        %358 = arith.addf %356, %357 : vector<8x128xf32>
        %359 = math.tanh %358 : vector<8x128xf32>
        %360 = arith.mulf %355, %359 : vector<8x128xf32>
        %c6 = arith.constant 6 : index
        %c0_86 = arith.constant 0 : index
        %c0_87 = arith.constant 0 : index
        %361 = vector.load %arg7[%c6, %c0_86, %c0_87] : memref<8x8x128xf32, #tpu.memory_space<vmem>>, vector<1x8x128xf32>
        %362 = vector.shape_cast %361 : vector<1x8x128xf32> to vector<8x128xf32>
        %363 = vector.shape_cast %360 : vector<8x128xf32> to vector<1x8x128xf32>
        tpu.vector_store %arg7[%c6, %c0_86, %c0_87], %363 {strides = array<i32>} : memref<8x8x128xf32, #tpu.memory_space<vmem>>, vector<1x8x128xf32>,
        %cst_88 = arith.constant dense<0.000000e+00> : vector<8x512xf32>
        %364 = tpu.matmul %360, %213, %cst_88 {dimension_numbers = #tpu.dot_dimension_numbers<[1], [0], [0], [1], [0, 0, 1, 1], [], []>} : vector<8x128xf32>, vector<128x512xf32>, vector<8x512xf32> -> vector<8x512xf32>
        %365 = arith.addf %216, %364 : vector<8x512xf32>
        %366 = vector.extract_strided_slice %365 {offsets = [0, 0], sizes = [8, 384], strides = [1, 1]} : vector<8x512xf32> to vector<8x384xf32>
        %367 = arith.negf %366 : vector<8x384xf32>
        %368 = math.exp %367 : vector<8x384xf32>
        %cst_89 = arith.constant 1.000000e+00 : f32
        %369 = vector.broadcast %cst_89 : f32 to vector<8x384xf32>
        %370 = arith.addf %369, %368 : vector<8x384xf32>
        %371 = arith.divf %369, %370 : vector<8x384xf32>
        %372 = vector.extract_strided_slice %365 {offsets = [0, 384], sizes = [8, 128], strides = [1, 1]} : vector<8x512xf32> to vector<8x128xf32>
        %373 = math.tanh %372 : vector<8x128xf32>
        %374 = vector.extract_strided_slice %371 {offsets = [0, 0], sizes = [8, 128], strides = [1, 1]} : vector<8x384xf32> to vector<8x128xf32>
        %375 = vector.extract_strided_slice %371 {offsets = [0, 128], sizes = [8, 128], strides = [1, 1]} : vector<8x384xf32> to vector<8x128xf32>
        %376 = vector.extract_strided_slice %371 {offsets = [0, 256], sizes = [8, 128], strides = [1, 1]} : vector<8x384xf32> to vector<8x128xf32>
        %377 = arith.mulf %375, %358 : vector<8x128xf32>
        %378 = arith.mulf %374, %373 : vector<8x128xf32>
        %379 = arith.addf %377, %378 : vector<8x128xf32>
        %380 = math.tanh %379 : vector<8x128xf32>
        %381 = arith.mulf %376, %380 : vector<8x128xf32>
        %c7 = arith.constant 7 : index
        %c0_90 = arith.constant 0 : index
        %c0_91 = arith.constant 0 : index
        %382 = vector.load %arg7[%c7, %c0_90, %c0_91] : memref<8x8x128xf32, #tpu.memory_space<vmem>>, vector<1x8x128xf32>
        %383 = vector.shape_cast %382 : vector<1x8x128xf32> to vector<8x128xf32>
        %384 = vector.shape_cast %381 : vector<8x128xf32> to vector<1x8x128xf32>
        tpu.vector_store %arg7[%c7, %c0_90, %c0_91], %384 {strides = array<i32>} : memref<8x8x128xf32, #tpu.memory_space<vmem>>, vector<1x8x128xf32>,
      } else {
      }
    } else {
    }
    return
  }
  func.func @transform_0(%arg0: i32) -> (i32, i32, i32) {
    %c0_i32 = arith.constant 0 : i32
    %0 = arith.minsi %arg0, %c0_i32 : i32
    %c0_i32_0 = arith.constant 0 : i32
    %c0_i32_1 = arith.constant 0 : i32
    %c0_i32_2 = arith.constant 0 : i32
    return %0, %c0_i32_0, %c0_i32_1 : i32, i32, i32
  }
  func.func @transform_1(%arg0: i32) -> (i32, i32) {
    %c0_i32 = arith.constant 0 : i32
    %c0_i32_0 = arith.constant 0 : i32
    %c0_i32_1 = arith.constant 0 : i32
    return %c0_i32, %c0_i32_0 : i32, i32
  }
  func.func @transform_2(%arg0: i32) -> (i32, i32) {
    %c0_i32 = arith.constant 0 : i32
    %c0_i32_0 = arith.constant 0 : i32
    %c0_i32_1 = arith.constant 0 : i32
    return %c0_i32, %c0_i32_0 : i32, i32
  }
  func.func @transform_3(%arg0: i32) -> (i32, i32) {
    %c0_i32 = arith.constant 0 : i32
    %c0_i32_0 = arith.constant 0 : i32
    %c0_i32_1 = arith.constant 0 : i32
    return %c0_i32, %c0_i32_0 : i32, i32
  }
  func.func @transform_4(%arg0: i32) -> (i32, i32) {
    %c0_i32 = arith.constant 0 : i32
    %c0_i32_0 = arith.constant 0 : i32
    %c0_i32_1 = arith.constant 0 : i32
    return %c0_i32, %c0_i32_0 : i32, i32
  }
  func.func @transform_5(%arg0: i32) -> (i32, i32) {
    %c0_i32 = arith.constant 0 : i32
    %c0_i32_0 = arith.constant 0 : i32
    %c0_i32_1 = arith.constant 0 : i32
    return %c0_i32, %c0_i32_0 : i32, i32
  }
  func.func @transform_6(%arg0: i32) -> (i32, i32, i32) {
    %c0_i32 = arith.constant 0 : i32
    %c0_i32_0 = arith.constant 0 : i32
    %c0_i32_1 = arith.constant 0 : i32
    %c0_i32_2 = arith.constant 0 : i32
    return %c0_i32, %c0_i32_0, %c0_i32_1 : i32, i32, i32
  }
}

</mosaic_0001>

<bundles_post_ra>
// kernel: tpu_custom_call.1
= control target key start
LH: loop header
LB: loop body
LE: loop exit
PB: predicated region body
PF: predicated region fallthrough
CT: control target
= control target key end

     0   :  { %11 = vsyncpa [#allocation6], 0  ;;  %s6694_s0 = inlined_call_operand.hbm [shape: f32[8,8,128], index: 0, kind: input, shape index: {}]   ;;  %s6695_s1 = inlined_call_operand.hbm [shape: f32[128,512], index: 1, kind: input, shape index: {}]   ;;  %s6696_s2 = inlined_call_operand.hbm [shape: f32[128,512], index: 2, kind: input, shape index: {}]   ;;  %s6697_s3 = inlined_call_operand.vmem [shape: f32[1,512], index: 3, kind: input, shape index: {}]   ;;  %s6698_s4 = inlined_call_operand.hbm [shape: f32[128,512], index: 4, kind: input, shape index: {}]   ;;  %s6699_s5 = inlined_call_operand.vmem [shape: f32[1,512], index: 5, kind: input, shape index: {}]   ;;  %s6700_s6 = inlined_call_operand.hbm [shape: f32[8,8,128], index: 6, kind: output, shape index: {}]  }
   0x1   :  { %13 = vsyncpa [#allocation6 + $0x1], 0 }
   0x2   :  { %14 = vsyncpa [#allocation9], 0 }
   0x3   :  { %15 = vsyncpa [#allocation12], 0 }
   0x4   :  { %16 = vsyncpa [#allocation7], 0  ;;  %s5563_s21 = smov 0   ;;  %s5565_s22 = smov 0  }
   0x5   :  { %s5567_s23 = smov 0   ;;  %s5569_s24 = smov 0  }
   0x6 LB: > { %s5582_s25 = sadd.s32 4294967295, %s5511_s24   ;;  %p46_p0 = scmp.ne.s32.totalorder %s5503_s22, %s5499_s21  ;;  %s5511_s24 = sphi %s5569_s24, %s6719_s24   ;;  %s5507_s23 = sphi %s5567_s23, %s6718_s23   ;;  %s5503_s22 = sphi %s5565_s22, %s6717_s22   ;;  %s5499_s21 = sphi %s5563_s21, %s6716_s21  }
   0x7   : > { %p6701_p1 = scmp.eq.s32.totalorder %s5582_s25, 0  ;;  %p3788_p2 = scmp.ge.s32.totalorder %s5511_s24, 1 }
   0x8   : > { %p183_p3 = scmp.lt.s32.totalorder %s5511_s24, 3  ;;  %s5513_s28 = smov [#allocation8]  }
   0x9   : > { %p5591_p5 = por %p6701_p1, %p46_p0  ;;  %s195_s29 = sshll.u32 %s5513_s28, 4  ;;  %s5599_s29 = int_to_ptr.vmem [resolvable:$true] %s195_s29 }
   0xa   : > { %p5595_p6 = pnand %p3788_p2, %p183_p3  ;;  %s5514_s7 = smov [#allocation10]  }
   0xb   : > { %s6704_s26 = scalar_select %p5591_p5, 1, 0 }
   0xc   : > { %s6705_s27 = scalar_select %p5595_p6, 1, 0 }
   0xd   : > { %p5000_p7 = pneg %p5595_p6  ;;  %s208_s8 = sshll.u32 %s5514_s7, 4  ;;  %s5609_s8 = int_to_ptr.vmem [resolvable:$true] %s208_s8 }
   0xe   : > { %s5515_s9 = smov [#allocation11]   ;;  %s5325_s13 = scalar_lea.hbm %s6695_s1, 8192 }
   0xf   : > { %p5605_p8 = pnand %p5000_p7, %p6701_p1  ;;  %s5611_s10 = sshll.u32 %s5515_s9, 4  ;;  %s225_s10 = int_to_ptr.vmem [resolvable:$true] %s5611_s10 }
  0x10   : > { %p5326_p9 = scmp.ne.s32.totalorder %s6695_s1, %s5325_s13  ;;  %p5332_p13 = scmp.lt.u32.totalorder %s5325_s13, %s6695_s1 }
  0x11   : > { %p5621_p10 = pneg %p5605_p8 }
  0x13   : > { %p5328_p11 = pnand %p5621_p10, %p5326_p9 }
  0x15   : > { %p5329_p12 = pneg %p5328_p11 }
  0x17   : > { %p5334_p0 = pnand %p5332_p13, %p5329_p12 }
  0x19   : > { %5337 = shalt.err (!%p5334_p0)
}
  0x1a   : > { %s5338_s19 = scalar_lea.vmem %s5599_s29, 8192  ;;  %p5346_p4 = scmp.lt.s32.totalorder %s5599_s29, %s5599_s29 }
  0x1b   : > { %p5339_p2 = scmp.ne.s32.totalorder %s5599_s29, %s5338_s19  ;;  %p5347_p1 = scmp.lt.s32.totalorder %s5338_s19, %s5338_s19 }
  0x1d   : > { %p5341_p3 = pnand %p5339_p2, %p5621_p10  ;;  %p5348_p9 = por %p5347_p1, %p5346_p4 }
  0x1f   : > { %p5342_p7 = pneg %p5341_p3 }
  0x21   : > { %p5349_p11 = pnand %p5348_p9, %p5342_p7 }
  0x23   : > { %5352 = shalt.err (!%p5349_p11)
}
  0x24   : > { %s5516_s20 = smov 512   ;;  %s5517_s21 = smov 32  }
  0x25   : > { %5003 = dma.hbm_to_vmem [thread:$0]  (!%p5605_p8), %s6695_s1, 8192, %s5599_s29, [#allocation9], %s5516_s20, %s5516_s20, %s5517_s21  }
  0x26   : > { %s5353_s12 = scalar_lea.hbm %s6696_s2, 8192 }
  0x27   : > { %p5354_p1 = scmp.ne.s32.totalorder %s6696_s2, %s5353_s12  ;;  %p5360_p13 = scmp.lt.u32.totalorder %s5353_s12, %s6696_s2 }
  0x29   : > { %p5356_p4 = pnand %p5354_p1, %p5621_p10 }
  0x2b   : > { %p5357_p12 = pneg %p5356_p4 }
  0x2d   : > { %p5362_p0 = pnand %p5360_p13, %p5357_p12 }
  0x2f   : > { %5365 = shalt.err (!%p5362_p0)
}
  0x30   : > { %s5366_s29 = scalar_lea.vmem %s5609_s8, 8192  ;;  %p5374_p9 = scmp.lt.s32.totalorder %s5609_s8, %s5609_s8 }
  0x31   : > { %p5367_p2 = scmp.ne.s32.totalorder %s5609_s8, %s5366_s29  ;;  %p5375_p11 = scmp.lt.s32.totalorder %s5366_s29, %s5366_s29 }
  0x33   : > { %p5369_p3 = pnand %p5367_p2, %p5621_p10  ;;  %p5376_p1 = por %p5375_p11, %p5374_p9 }
  0x35   : > { %p5370_p7 = pneg %p5369_p3 }
  0x37   : > { %p5377_p4 = pnand %p5376_p1, %p5370_p7 }
  0x39   : > { %5380 = shalt.err (!%p5377_p4)
}
  0x3a   : > { %5006 = dma.hbm_to_vmem [thread:$0]  (!%p5605_p8), %s6696_s2, 8192, %s5609_s8, [#allocation9], %s5516_s20, %s5516_s20, %s5517_s21  }
  0x3b   : > { %s5381_s9 = scalar_lea.hbm %s6698_s4, 8192 }
  0x3c   : > { %p5382_p12 = scmp.ne.s32.totalorder %s6698_s4, %s5381_s9  ;;  %p5388_p2 = scmp.lt.u32.totalorder %s5381_s9, %s6698_s4 }
  0x3e   : > { %p5384_p13 = pnand %p5382_p12, %p5621_p10 }
  0x40   : > { %p5385_p0 = pneg %p5384_p13 }
  0x42   : > { %p5390_p3 = pnand %p5388_p2, %p5385_p0 }
  0x44   : > { %5393 = shalt.err (!%p5390_p3)
}
  0x45   : > { %s5394_s15 = scalar_lea.vmem %s225_s10, 8192  ;;  %p5402_p1 = scmp.lt.s32.totalorder %s225_s10, %s225_s10 }
  0x46   : > { %p5395_p7 = scmp.ne.s32.totalorder %s225_s10, %s5394_s15  ;;  %p5403_p4 = scmp.lt.s32.totalorder %s5394_s15, %s5394_s15 }
  0x48   : > { %p5397_p9 = pnand %p5395_p7, %p5621_p10  ;;  %p5404_p5 = por %p5403_p4, %p5402_p1 }
  0x4a   : > { %p5398_p11 = pneg %p5397_p9 }
  0x4c   : > { %p5405_p6 = pnand %p5404_p5, %p5398_p11 }
  0x4e   : > { %5408 = shalt.err (!%p5405_p6)
}
  0x4f   : > { %5009 = dma.hbm_to_vmem [thread:$0]  (!%p5605_p8), %s6698_s4, 8192, %s225_s10, [#allocation12], %s5516_s20, %s5516_s20, %s5517_s21  }
  0x50   : > { %s5694_s16 = sadd.s32 1, %s5511_s24   ;;  %p26_p5 = scmp.lt.s32.totalorder %s5511_s24, 0 }
  0x51   : > { %p28_p6 = scmp.lt.s32.totalorder %s5694_s16, 0  ;;  %s33_s30 = sadd.s32 1, %s5507_s23 }
  0x52   : > { %p40_p10 = scmp.ne.s32.totalorder %s5507_s23, %s5503_s22  ;;  %p41_p12 = scmp.eq.s32.totalorder %s5511_s24, 0 }
  0x53   : > { %s27_s29 = scalar_select %p26_p5, %s5511_s24, 0 }
  0x54   : > { %s29_s18 = scalar_select %p28_p6, %s5694_s16, 0 }
  0x55   : > { %p5017_p13 = scmp.lt.s32.totalorder %s5511_s24, 2  ;;  %s241_s28 = sand.u32 1, %s5507_s23  }
  0x56   : > { %s30_s19 = ssub.s32 %s27_s29, %s29_s18  ;;  %p42_p2 = por %p41_p12, %p40_p10 }
  0x57   : > { %p31_p0 = scmp.eq.s32.totalorder %s30_s19, 0  ;;  %s3793_s7 = sshll.u32 %s241_s28, 6 }
  0x58   : > { %s3884_s10 = sshll.u32 %s27_s29, 10  ;;  %s245_s12 = scalar_lea.vmem [#allocation5], %s3793_s7 }
  0x59   : > { %s5707_s9 = scalar_select %p31_p0, %s5507_s23, %s33_s30  }
  0x5a   : > { %s5712_s11 = scalar_lea.hbm %s6694_s0, %s3884_s10  ;;  %s254_s13 = sshll.u32 %s245_s12, 4  ;;  %s5714_s13 = int_to_ptr.vmem [resolvable:$true] %s254_s13 }
  0x5b   : > { %p5716_p8 = pnand %p5017_p13, %p42_p2  ;;  %s5720_s14 = scalar_lea.sflag [#allocation6], %s241_s28 }
  0x5c   : > { %s5409_s15 = scalar_lea.hbm %s5712_s11, 1024  ;;  %s5414_s30 = scalar_lea.hbm %s6694_s0, 1024 }
  0x5d   : > { %p5410_p3 = scmp.ne.s32.totalorder %s5712_s11, %s5409_s15  ;;  %p5411_p7 = pneg %p5716_p8 }
  0x5e   : > { %p5415_p1 = scmp.lt.u32.totalorder %s5712_s11, %s6694_s0  ;;  %p5416_p4 = scmp.lt.u32.totalorder %s5414_s30, %s5409_s15 }
  0x5f   : > { %p5412_p9 = pnand %p5411_p7, %p5410_p3  ;;  %p5418_p6 = scmp.lt.u32.totalorder %s5409_s15, %s5712_s11 }
  0x60   : > { %p5417_p5 = por %p5416_p4, %p5415_p1 }
  0x61   : > { %p5413_p11 = pneg %p5412_p9 }
  0x62   : > { %p5419_p10 = por %p5418_p6, %p5417_p5 }
  0x64   : > { %p5420_p12 = pnand %p5419_p10, %p5413_p11 }
  0x66   : > { %5423 = shalt.err (!%p5420_p12)
}
  0x67   : > { %s5424_s19 = scalar_lea.vmem %s5714_s13, 1024  ;;  %s5518_s28 = smov [#allocation5]  }
  0x68   : > { %p5425_p13 = scmp.ne.s32.totalorder %s5714_s13, %s5424_s19  ;;  %s5429_s7 = sshll.u32 %s5518_s28, 4  ;;  %s5430_s7 = int_to_ptr.vmem [resolvable:$false] %s5429_s7 }
  0x69   : > { %s5431_s10 = scalar_lea.vmem %s5430_s7, 2048  ;;  %p5432_p3 = scmp.lt.s32.totalorder %s5714_s13, %s5430_s7 }
  0x6a   : > { %p5427_p0 = pnand %p5425_p13, %p5411_p7  ;;  %p5433_p9 = scmp.lt.s32.totalorder %s5431_s10, %s5424_s19 }
  0x6c   : > { %p5428_p2 = pneg %p5427_p0  ;;  %p5434_p1 = por %p5433_p9, %p5432_p3 }
  0x6e   : > { %p5435_p4 = pnand %p5434_p1, %p5428_p2 }
  0x70   : > { %5438 = shalt.err (!%p5435_p4)
}
  0x71   : > { %s5519_s20 = smov 128   ;;  %s5520_s21 = smov 8  }
  0x72   : > { %5013 = dma.hbm_to_vmem [thread:$0]  (!%p5716_p8), %s5712_s11, 1024, %s5714_s13, %s5720_s14, %s5519_s20, %s5519_s20, %s5520_s21  }
  0x73   : > { %p6709_p7 = scmp.ne.s32.totalorder %s6705_s27, 0 }
  0x74   : > { %s268_s12 = sand.u32 (!%p6709_p7), 1, %s5503_s22   ;;  %p6710_p11 = scmp.ne.s32.totalorder (!%p6709_p7), %s6704_s26, 0 }
  0x75   : > { %266 = sbr.rel (%p6709_p7) target bundleno = 4626 (0x1212), region = 44  ;;  %s3797_s15 = sshll.u32 (!%p6709_p7), %s268_s12, 6 }
  0x76   : > { %s269_s8 = scalar_lea.sflag (!%p6709_p7), [#allocation6], %s268_s12  ;;  %s5751_s17 = scalar_lea.vmem (!%p6709_p7), [#allocation5], %s3797_s15 }
  0x7c   : > { %5482 = dma.done.wait (%p6710_p11), %s269_s8, 1024  }
  0x7d   : > { %5484 = vsyncadd (%p6710_p11), %s269_s8, 4294966272  ;;  %p6711_p5 = scmp.eq.s32.totalorder %s5582_s25, 0 }
  0x7f   : > { %5486 = dma.done.wait (%p6711_p5), [#allocation9], 16384   ;;  %p6712_p8 = pmov %p6711_p5 }
  0x80   : > { %p6713_p6 = pmov %p6711_p5 }
  0x81   : > { %5488 = vsyncadd (%p6712_p8), [#allocation9], 4294950912 }
  0x82   : > { %5490 = dma.done.wait (%p6713_p6), [#allocation12], 8192   ;;  %p6714_p10 = pmov %p6711_p5 }
  0x83   : > { %p6715_p12 = scmp.ne.s32.totalorder %s5582_s25, 0 }
  0x84   : > { %5492 = vsyncadd (%p6714_p10), [#allocation12], 4294959104  ;;  %v5521_v0 = vmov (!%p6715_p12), 0.0  }
  0x85   : > { %314 = sbr.rel (%p6715_p12) target bundleno = 140 (0x8c), region = 64  ;;  %315 = vst [vmem:[#allocation2] sm:$0xff] (!%p6715_p12), %v5521_v0  ;;  %316 = vst [vmem:[#allocation3] sm:$0xff] (!%p6715_p12), %v5521_v0 }
  0x8c PF: > { %p3802_p13 = scmp.ge.s32.totalorder %s5582_s25, 1 }
  0x8d   : > { %v343_v1 = vld [vmem:[#allocation8 + $0x8] sm:$0xff] (!%p3802_p13)  ;;  %v345_v3 = vld [vmem:[#allocation8 + $0x18] sm:$0xff] (!%p3802_p13)  ;;  %v342_v6 = vld [vmem:[#allocation8] sm:$0xff] (!%p3802_p13)  ;;  %v5522_v8 = vmov (!%p3802_p13), 0.0   ;;  %s330_s26 = ssub.s32 (!%p3802_p13), 0, %s5582_s25  ;;  %p329_p0 = scmp.lt.s32.totalorder (!%p3802_p13), %s5582_s25, 0 }
  0x8e   : > { %320 = sbr.rel (%p3802_p13) target bundleno = 422 (0x1a6), region = 68  ;;  %v347_v2 = vld [vmem:[#allocation8 + $0x28] sm:$0xff] (!%p3802_p13)  ;;  %v349_v5 = vld [vmem:[#allocation8 + $0x38] sm:$0xff] (!%p3802_p13)  ;;  %v346_v7 = vld [vmem:[#allocation8 + $0x20] sm:$0xff] (!%p3802_p13)  ;;  %492 = vmatprep.mubr.f32.mxu0 (!%p3802_p13), %v5522_v8  ;;  %605 = vmatprep.mubr.f32.mxu1 (!%p3802_p13), %v5522_v8  ;;  %s3803_s27 = smin.u32 (!%p3802_p13), %s5582_s25, %s330_s26 }
  0x8f   : > { %v3894_v4 = vpack.c.bf16 (!%p3802_p13), %v347_v2, %v343_v1  ;;  %v3926_v9 = vpack.c.bf16 (!%p3802_p13), %v349_v5, %v345_v3  ;;  %v3896_v10 = vpack.c.bf16 (!%p3802_p13), %v346_v7, %v342_v6  ;;  %v344_v11 = vld [vmem:[#allocation8 + $0x10] sm:$0xff] (!%p3802_p13)  ;;  %v351_v13 = vld [vmem:[#allocation8 + $0x48] sm:$0xff] (!%p3802_p13)  ;;  %v353_v16 = vld [vmem:[#allocation8 + $0x58] sm:$0xff] (!%p3802_p13)  ;;  %s332_s11 = sand.u32 (!%p3802_p13), 1, %s3803_s27  }
  0x90   : > { %v348_v12 = vld [vmem:[#allocation8 + $0x30] sm:$0xff] (!%p3802_p13)  ;;  %v355_v15 = vld [vmem:[#allocation8 + $0x68] sm:$0xff] (!%p3802_p13)  ;;  %v357_v17 = vld [vmem:[#allocation8 + $0x78] sm:$0xff] (!%p3802_p13)  ;;  %s333_s13 = ssub.s32 (!%p3802_p13), 0, %s332_s11 }
  0x91   : > { %3895 = vmatprep.subr.bf16.mxu0 (!%p3802_p13), %v3894_v4  ;;  %v3928_v14 = vpack.c.bf16 (!%p3802_p13), %v348_v12, %v344_v11  ;;  %3927 = vmatprep.subr.bf16.mxu1 (!%p3802_p13), %v3926_v9  ;;  %v3898_v18 = vpack.c.bf16 (!%p3802_p13), %v355_v15, %v351_v13  ;;  %v3930_v19 = vpack.c.bf16 (!%p3802_p13), %v357_v17, %v353_v16  ;;  %v350_v20 = vld [vmem:[#allocation8 + $0x40] sm:$0xff] (!%p3802_p13)  ;;  %v352_v22 = vld [vmem:[#allocation8 + $0x50] sm:$0xff] (!%p3802_p13)  ;;  %v359_v25 = vld [vmem:[#allocation8 + $0x88] sm:$0xff] (!%p3802_p13) }
  0x92   : > { %3897 = vmatpush1.bf16.msra.mxu0 (!%p3802_p13), %v3896_v10  ;;  %v354_v21 = vld [vmem:[#allocation8 + $0x60] sm:$0xff] (!%p3802_p13)  ;;  %v356_v24 = vld [vmem:[#allocation8 + $0x70] sm:$0xff] (!%p3802_p13)  ;;  %v363_v26 = vld [vmem:[#allocation8 + $0xa8] sm:$0xff] (!%p3802_p13) }
  0x93   : > { %3929 = vmatpush1.bf16.msra.mxu1 (!%p3802_p13), %v3928_v14  ;;  %v3900_v23 = vpack.c.bf16 (!%p3802_p13), %v354_v21, %v350_v20  ;;  %3899 = vmatprep.subr.bf16.mxu0 (!%p3802_p13), %v3898_v18  ;;  %v3932_v27 = vpack.c.bf16 (!%p3802_p13), %v356_v24, %v352_v22  ;;  %v3902_v28 = vpack.c.bf16 (!%p3802_p13), %v363_v26, %v359_v25  ;;  %v361_v29 = vld [vmem:[#allocation8 + $0x98] sm:$0xff] (!%p3802_p13)  ;;  %v358_v31 = vld [vmem:[#allocation8 + $0x80] sm:$0xff] (!%p3802_p13)  ;;  %v360_v34 = vld [vmem:[#allocation8 + $0x90] sm:$0xff] (!%p3802_p13) }
  0x94   : > { %3931 = vmatprep.subr.bf16.mxu1 (!%p3802_p13), %v3930_v19  ;;  %v365_v30 = vld [vmem:[#allocation8 + $0xb8] sm:$0xff] (!%p3802_p13)  ;;  %v362_v33 = vld [vmem:[#allocation8 + $0xa0] sm:$0xff] (!%p3802_p13)  ;;  %v364_v35 = vld [vmem:[#allocation8 + $0xb0] sm:$0xff] (!%p3802_p13) }
  0x95   : > { %v3934_v32 = vpack.c.bf16 %v365_v30, %v361_v29  ;;  %v3904_v36 = vpack.c.bf16 %v362_v33, %v358_v31  ;;  %v367_v37 = vld [vmem:[#allocation8 + $0xc8] sm:$0xff]  ;;  %v369_v39 = vld [vmem:[#allocation8 + $0xd8] sm:$0xff]  ;;  %v3936_v40 = vpack.c.bf16 %v364_v35, %v360_v34  ;;  %v366_v43 = vld [vmem:[#allocation8 + $0xc0] sm:$0xff]  ;;  %s6721_s13 = smov (!%p329_p0, %s333_s13), %s332_s11 }
  0x96   : > { %3901 = vmatpush1.bf16.msra.mxu0 %v3900_v23  ;;  %v371_v38 = vld [vmem:[#allocation8 + $0xe8] sm:$0xff]  ;;  %v373_v42 = vld [vmem:[#allocation8 + $0xf8] sm:$0xff]  ;;  %v370_v44 = vld [vmem:[#allocation8 + $0xe0] sm:$0xff]  ;;  %p3805_p2 = scmp.lt.s32.totalorder %s6721_s13, 0  ;;  %s339_s24 = sadd.s32 2, %s6721_s13 }
  0x97   : > { %3933 = vmatpush1.bf16.msra.mxu1 %v3932_v27  ;;  %3903 = vmatprep.subr.bf16.mxu0 %v3902_v28  ;;  %v3906_v41 = vpack.c.bf16 %v371_v38, %v367_v37  ;;  %v3938_v45 = vpack.c.bf16 %v373_v42, %v369_v39  ;;  %v368_v46 = vld [vmem:[#allocation8 + $0xd0] sm:$0xff]  ;;  %v375_v48 = vld [vmem:[#allocation8 + $0x108] sm:$0xff]  ;;  %v377_v50 = vld [vmem:[#allocation8 + $0x118] sm:$0xff]  ;;  %v3908_v52 = vpack.c.bf16 %v370_v44, %v366_v43  ;;  %v408_v43 = vlaneseq }
  0x98   : > { %3935 = vmatprep.subr.bf16.mxu1 %v3934_v32  ;;  %v372_v47 = vld [vmem:[#allocation8 + $0xf0] sm:$0xff]  ;;  %v379_v49 = vld [vmem:[#allocation8 + $0x128] sm:$0xff]  ;;  %v381_v51 = vld [vmem:[#allocation8 + $0x138] sm:$0xff]  ;;  %s6723_s24 = smov (!%p3805_p2, %s339_s24), %s6721_s13 }
  0x99   : > { %v3940_v53 = vpack.c.bf16 %v372_v47, %v368_v46  ;;  %v3910_v54 = vpack.c.bf16 %v379_v49, %v375_v48  ;;  %v374_v55 = vld [vmem:[#allocation8 + $0x100] sm:$0xff]  ;;  %v376_v57 = vld [vmem:[#allocation8 + $0x110] sm:$0xff]  ;;  %v3942_v58 = vpack.c.bf16 %v381_v51, %v377_v50  ;;  %v383_v60 = vld [vmem:[#allocation8 + $0x148] sm:$0xff]  ;;  %v409_v44 = vshrl.u32 %v408_v43, 7  ;;  %s3806_s14 = sshll.u32 %s6723_s24, 6 }
  0x9a   : > { %3905 = vmatpush1.bf16.msra.mxu0 %v3904_v36  ;;  %v378_v56 = vld [vmem:[#allocation8 + $0x120] sm:$0xff]  ;;  %v380_v59 = vld [vmem:[#allocation8 + $0x130] sm:$0xff]  ;;  %v387_v61 = vld [vmem:[#allocation8 + $0x168] sm:$0xff]  ;;  %s654_s18 = sshra.s32 %s3806_s14, 3 }
  0x9b   : > { %3937 = vmatpush1.bf16.msra.mxu1 %v3936_v40  ;;  %3907 = vmatprep.subr.bf16.mxu0 %v3906_v41  ;;  %v385_v62 = vld [vmem:[#allocation8 + $0x158] sm:$0xff]  ;;  %v3912_v0 = vpack.c.bf16 %v378_v56, %v374_v55  ;;  %v3944_v1 = vpack.c.bf16 %v380_v59, %v376_v57  ;;  %v3914_v2 = vpack.c.bf16 %v387_v61, %v383_v60  ;;  %v382_v3 = vld [vmem:[#allocation8 + $0x140] sm:$0xff]  ;;  %v384_v5 = vld [vmem:[#allocation8 + $0x150] sm:$0xff]  ;;  %v414_v47 = vsub.s32 1, %v409_v44  ;;  %s3885_s19 = sshll.u32 %s654_s18, 5 }
  0x9c   : > { %3939 = vmatprep.subr.bf16.mxu1 %v3938_v45  ;;  %v389_v63 = vld [vmem:[#allocation8 + $0x178] sm:$0xff]  ;;  %v386_v4 = vld [vmem:[#allocation8 + $0x160] sm:$0xff]  ;;  %v388_v7 = vld [vmem:[#allocation8 + $0x170] sm:$0xff]  ;;  %v410_v45 = vsub.s32 0, %v409_v44  ;;  %v422_v48 = vsub.s32 3, %v409_v44  ;;  %s5809_s28 = scalar_lea.vmem [#allocation4], %s3885_s19 }
  0x9d   : > { %v3946_v6 = vpack.c.bf16 %v389_v63, %v385_v62  ;;  %v391_v9 = vld [vmem:[#allocation8 + $0x188] sm:$0xff]  ;;  %v393_v11 = vld [vmem:[#allocation8 + $0x198] sm:$0xff]  ;;  %v3916_v13 = vpack.c.bf16 %v386_v4, %v382_v3  ;;  %v3948_v14 = vpack.c.bf16 %v388_v7, %v384_v5  ;;  %v390_v16 = vld [vmem:[#allocation8 + $0x180] sm:$0xff] }
  0x9e   : > { %3909 = vmatpush1.bf16.msra.mxu0 %v3908_v52  ;;  %v395_v10 = vld [vmem:[#allocation8 + $0x1a8] sm:$0xff]  ;;  %v397_v12 = vld [vmem:[#allocation8 + $0x1b8] sm:$0xff]  ;;  %v394_v17 = vld [vmem:[#allocation8 + $0x1a0] sm:$0xff] }
  0x9f   : > { %3941 = vmatpush1.bf16.msra.mxu1 %v3940_v53  ;;  %3911 = vmatprep.subr.bf16.mxu0 %v3910_v54  ;;  %v3918_v15 = vpack.c.bf16 %v395_v10, %v391_v9  ;;  %v392_v18 = vld [vmem:[#allocation8 + $0x190] sm:$0xff]  ;;  %v3950_v19 = vpack.c.bf16 %v397_v12, %v393_v11  ;;  %v399_v21 = vld [vmem:[#allocation8 + $0x1c8] sm:$0xff]  ;;  %v401_v23 = vld [vmem:[#allocation8 + $0x1d8] sm:$0xff]  ;;  %v3920_v25 = vpack.c.bf16 %v394_v17, %v390_v16 }
  0xa0   : > { %3943 = vmatprep.subr.bf16.mxu1 %v3942_v58  ;;  %v396_v20 = vld [vmem:[#allocation8 + $0x1b0] sm:$0xff]  ;;  %v403_v22 = vld [vmem:[#allocation8 + $0x1e8] sm:$0xff]  ;;  %v405_v24 = vld [vmem:[#allocation8 + $0x1f8] sm:$0xff] }
  0xa1   : > { %v3952_v26 = vpack.c.bf16 %v396_v20, %v392_v18  ;;  %v3922_v27 = vpack.c.bf16 %v403_v22, %v399_v21  ;;  %v398_v28 = vld [vmem:[#allocation8 + $0x1c0] sm:$0xff]  ;;  %v3954_v30 = vpack.c.bf16 %v405_v24, %v401_v23  ;;  %v400_v31 = vld [vmem:[#allocation8 + $0x1d0] sm:$0xff]  ;;  %v322_v36 = vld [vmem:[%s5751_s17 + $0x8] sm:$0xff] }
  0xa2   : > { %3913 = vmatpush1.bf16.msra.mxu0 %v3912_v0  ;;  %v402_v29 = vld [vmem:[#allocation8 + $0x1e0] sm:$0xff]  ;;  %v404_v32 = vld [vmem:[#allocation8 + $0x1f0] sm:$0xff]  ;;  %v324_v38 = vld [vmem:[%s5751_s17 + $0x18] sm:$0xff] }
  0xa3   : > { %3945 = vmatpush1.bf16.msra.mxu1 %v3944_v1  ;;  %3915 = vmatprep.subr.bf16.mxu0 %v3914_v2  ;;  %v3924_v33 = vpack.c.bf16 %v402_v29, %v398_v28  ;;  %v3956_v34 = vpack.c.bf16 %v404_v32, %v400_v31  ;;  %v321_v35 = vld [vmem:[%s5751_s17] sm:$0xff]  ;;  %v323_v37 = vld [vmem:[%s5751_s17 + $0x10] sm:$0xff]  ;;  %v326_v40 = vld [vmem:[%s5751_s17 + $0x28] sm:$0xff] }
  0xa4   : > { %3947 = vmatprep.subr.bf16.mxu1 %v3946_v6  ;;  %v325_v39 = vld [vmem:[%s5751_s17 + $0x20] sm:$0xff]  ;;  %v327_v41 = vld [vmem:[%s5751_s17 + $0x30] sm:$0xff]  ;;  %v328_v42 = vld [vmem:[%s5751_s17 + $0x38] sm:$0xff] }
  0xa5   : > { %v406_v46 = vld [vmem:[%s6697_s3] sm:$0xf] }
  0xa6   : > { %3917 = vmatpush1.bf16.msra.mxu0 %v3916_v13  ;;  %v5798_v49 = vrot.slane %v406_v46, %v410_v45  ;;  %v5802_v51 = vrot.slane %v406_v46, %v414_v47  ;;  %v5804_v52 = vrot.slane %v406_v46, %v422_v48 }
  0xa7   : > { %3949 = vmatpush1.bf16.msra.mxu1 %v3948_v14  ;;  %3919 = vmatprep.subr.bf16.mxu0 %v3918_v15 }
  0xa8   : > { %3951 = vmatprep.subr.bf16.mxu1 %v3950_v19 }
  0xaa   : > { %3921 = vmatpush1.bf16.msra.mxu0 %v3920_v25 }
  0xab   : > { %3953 = vmatpush1.bf16.msra.mxu1 %v3952_v26  ;;  %3923 = vmatprep.subr.bf16.mxu0 %v3922_v27 }
  0xac   : > { %3955 = vmatprep.subr.bf16.mxu1 %v3954_v30 }
  0xae   : > { %3925 = vmatpush1.bf16.msra.mxu0 %v3924_v33 }
  0xaf   : > { %3957 = vmatpush1.bf16.msra.mxu1 %v3956_v34 }
  0xb1   : > { %493 = vmatmul.mubr.f32.vlgmr.msra.gmra.mrb[0].mxu0 %v321_v35 }
  0xb2   : > { %606 = vmatmul.mubr.f32.vlgmr.msra.gmra.mrb[0].mxu1 %v321_v35  ;;  %498 = vmatprep.mubr.f32.mxu0 %v5522_v8 }
  0xb3   : > { %611 = vmatprep.mubr.f32.mxu1 %v5522_v8 }
  0xb5   : > { %499 = vmatmul.mubr.f32.gmra.mrb[2].mxu0 %v322_v36 }
  0xb6   : > { %612 = vmatmul.mubr.f32.gmra.mrb[2].mxu1 %v322_v36  ;;  %504 = vmatprep.mubr.f32.mxu0 %v5522_v8 }
  0xb7   : > { %617 = vmatprep.mubr.f32.mxu1 %v5522_v8 }
  0xb9   : > { %505 = vmatmul.mubr.f32.gmra.mrb[4].mxu0 %v323_v37 }
  0xba   : > { %618 = vmatmul.mubr.f32.gmra.mrb[4].mxu1 %v323_v37  ;;  %510 = vmatprep.mubr.f32.mxu0 %v5522_v8 }
  0xbb   : > { %623 = vmatprep.mubr.f32.mxu1 %v5522_v8 }
  0xbd   : > { %511 = vmatmul.mubr.f32.gmra.mrb[6].mxu0 %v324_v38 }
  0xbe   : > { %624 = vmatmul.mubr.f32.gmra.mrb[6].mxu1 %v324_v38  ;;  %516 = vmatprep.mubr.f32.mxu0 %v5522_v8 }
  0xbf   : > { %629 = vmatprep.mubr.f32.mxu1 %v5522_v8 }
  0xc1   : > { %517 = vmatmul.mubr.f32.gmra.mrb[8].mxu0 %v325_v39 }
  0xc2   : > { %630 = vmatmul.mubr.f32.gmra.mrb[8].mxu1 %v325_v39  ;;  %522 = vmatprep.mubr.f32.mxu0 %v5522_v8 }
  0xc3   : > { %635 = vmatprep.mubr.f32.mxu1 %v5522_v8 }
  0xc5   : > { %523 = vmatmul.mubr.f32.gmra.mrb[10].mxu0 %v326_v40 }
  0xc6   : > { %636 = vmatmul.mubr.f32.gmra.mrb[10].mxu1 %v326_v40  ;;  %528 = vmatprep.mubr.f32.mxu0 %v5522_v8 }
  0xc7   : > { %641 = vmatprep.mubr.f32.mxu1 %v5522_v8 }
  0xc9   : > { %529 = vmatmul.mubr.f32.gmra.mrb[12].mxu0 %v327_v41 }
  0xca   : > { %642 = vmatmul.mubr.f32.gmra.mrb[12].mxu1 %v327_v41  ;;  %534 = vmatprep.mubr.f32.mxu0 %v5522_v8 }
  0xcb   : > { %647 = vmatprep.mubr.f32.mxu1 %v5522_v8  ;;  %v418_v8 = vsub.s32 2, %v409_v44 }
  0xcd   : > { %535 = vmatmul.mubr.f32.gmra.mrb[14].mxu0 %v328_v42  ;;  %v5800_v50 = vrot.slane %v406_v46, %v418_v8 }
  0xce   : > { %648 = vmatmul.mubr.f32.gmra.mrb[14].mxu1 %v328_v42 }
 0x184   : > { %v494_v53 = vpop.f32.mrb[0].mxu0 }
 0x185   : > { %v495_v54 = vadd.f32 %v494_v53, %v5798_v49  ;;  %v607_v55 = vpop.f32.mrb[0].mxu1  ;;  %v496_v56 = vpop.f32.mrb[1].mxu0 }
 0x186   : > { %v608_v57 = vadd.f32 %v607_v55, %v5800_v50  ;;  %v497_v58 = vadd.f32 %v496_v56, %v5802_v51  ;;  %v609_v59 = vpop.f32.mrb[1].mxu1 }
 0x187   : > { %659 = vst [vmem:[%s5809_s28] sm:$0xff] %v495_v54  ;;  %v610_v60 = vadd.f32 %v609_v59, %v5804_v52 }
 0x188   : > { %661 = vst [vmem:[%s5809_s28 + $0x10] sm:$0xff] %v608_v57  ;;  %660 = vst [vmem:[%s5809_s28 + $0x8] sm:$0xff] %v497_v58  ;;  %v500_v61 = vpop.f32.mrb[2].mxu0 }
 0x189   : > { %662 = vst [vmem:[%s5809_s28 + $0x18] sm:$0xff] %v610_v60  ;;  %v501_v62 = vadd.f32 %v500_v61, %v5798_v49  ;;  %v613_v63 = vpop.f32.mrb[2].mxu1  ;;  %v502_v0 = vpop.f32.mrb[3].mxu0 }
 0x18a   : > { %v614_v1 = vadd.f32 %v613_v63, %v5800_v50  ;;  %v503_v2 = vadd.f32 %v502_v0, %v5802_v51  ;;  %v615_v3 = vpop.f32.mrb[3].mxu1 }
 0x18b   : > { %663 = vst [vmem:[%s5809_s28 + $0x20] sm:$0xff] %v501_v62  ;;  %v616_v4 = vadd.f32 %v615_v3, %v5804_v52 }
 0x18c   : > { %665 = vst [vmem:[%s5809_s28 + $0x30] sm:$0xff] %v614_v1  ;;  %664 = vst [vmem:[%s5809_s28 + $0x28] sm:$0xff] %v503_v2  ;;  %v506_v5 = vpop.f32.mrb[4].mxu0 }
 0x18d   : > { %666 = vst [vmem:[%s5809_s28 + $0x38] sm:$0xff] %v616_v4  ;;  %v507_v6 = vadd.f32 %v506_v5, %v5798_v49  ;;  %v619_v7 = vpop.f32.mrb[4].mxu1  ;;  %v508_v9 = vpop.f32.mrb[5].mxu0 }
 0x18e   : > { %v620_v10 = vadd.f32 %v619_v7, %v5800_v50  ;;  %v509_v11 = vadd.f32 %v508_v9, %v5802_v51  ;;  %v621_v12 = vpop.f32.mrb[5].mxu1 }
 0x18f   : > { %667 = vst [vmem:[%s5809_s28 + $0x40] sm:$0xff] %v507_v6  ;;  %v622_v13 = vadd.f32 %v621_v12, %v5804_v52 }
 0x190   : > { %669 = vst [vmem:[%s5809_s28 + $0x50] sm:$0xff] %v620_v10  ;;  %668 = vst [vmem:[%s5809_s28 + $0x48] sm:$0xff] %v509_v11  ;;  %v512_v14 = vpop.f32.mrb[6].mxu0 }
 0x191   : > { %670 = vst [vmem:[%s5809_s28 + $0x58] sm:$0xff] %v622_v13  ;;  %v513_v15 = vadd.f32 %v512_v14, %v5798_v49  ;;  %v625_v16 = vpop.f32.mrb[6].mxu1  ;;  %v514_v17 = vpop.f32.mrb[7].mxu0 }
 0x192   : > { %v626_v18 = vadd.f32 %v625_v16, %v5800_v50  ;;  %v515_v19 = vadd.f32 %v514_v17, %v5802_v51  ;;  %v627_v20 = vpop.f32.mrb[7].mxu1 }
 0x193   : > { %671 = vst [vmem:[%s5809_s28 + $0x60] sm:$0xff] %v513_v15  ;;  %v628_v21 = vadd.f32 %v627_v20, %v5804_v52 }
 0x194   : > { %673 = vst [vmem:[%s5809_s28 + $0x70] sm:$0xff] %v626_v18  ;;  %672 = vst [vmem:[%s5809_s28 + $0x68] sm:$0xff] %v515_v19  ;;  %v518_v22 = vpop.f32.mrb[8].mxu0 }
 0x195   : > { %674 = vst [vmem:[%s5809_s28 + $0x78] sm:$0xff] %v628_v21  ;;  %v519_v23 = vadd.f32 %v518_v22, %v5798_v49  ;;  %v631_v24 = vpop.f32.mrb[8].mxu1  ;;  %v520_v25 = vpop.f32.mrb[9].mxu0 }
 0x196   : > { %v632_v26 = vadd.f32 %v631_v24, %v5800_v50  ;;  %v521_v27 = vadd.f32 %v520_v25, %v5802_v51  ;;  %v633_v28 = vpop.f32.mrb[9].mxu1 }
 0x197   : > { %675 = vst [vmem:[%s5809_s28 + $0x80] sm:$0xff] %v519_v23  ;;  %v634_v29 = vadd.f32 %v633_v28, %v5804_v52 }
 0x198   : > { %677 = vst [vmem:[%s5809_s28 + $0x90] sm:$0xff] %v632_v26  ;;  %676 = vst [vmem:[%s5809_s28 + $0x88] sm:$0xff] %v521_v27  ;;  %v524_v30 = vpop.f32.mrb[10].mxu0 }
 0x199   : > { %678 = vst [vmem:[%s5809_s28 + $0x98] sm:$0xff] %v634_v29  ;;  %v525_v31 = vadd.f32 %v524_v30, %v5798_v49  ;;  %v637_v32 = vpop.f32.mrb[10].mxu1  ;;  %v526_v33 = vpop.f32.mrb[11].mxu0 }
 0x19a   : > { %v638_v34 = vadd.f32 %v637_v32, %v5800_v50  ;;  %v527_v35 = vadd.f32 %v526_v33, %v5802_v51  ;;  %v639_v36 = vpop.f32.mrb[11].mxu1 }
 0x19b   : > { %679 = vst [vmem:[%s5809_s28 + $0xa0] sm:$0xff] %v525_v31  ;;  %v640_v37 = vadd.f32 %v639_v36, %v5804_v52 }
 0x19c   : > { %681 = vst [vmem:[%s5809_s28 + $0xb0] sm:$0xff] %v638_v34  ;;  %680 = vst [vmem:[%s5809_s28 + $0xa8] sm:$0xff] %v527_v35  ;;  %v530_v38 = vpop.f32.mrb[12].mxu0 }
 0x19d   : > { %682 = vst [vmem:[%s5809_s28 + $0xb8] sm:$0xff] %v640_v37  ;;  %v531_v39 = vadd.f32 %v530_v38, %v5798_v49  ;;  %v643_v40 = vpop.f32.mrb[12].mxu1  ;;  %v532_v41 = vpop.f32.mrb[13].mxu0 }
 0x19e   : > { %v644_v42 = vadd.f32 %v643_v40, %v5800_v50  ;;  %v533_v43 = vadd.f32 %v532_v41, %v5802_v51  ;;  %v645_v44 = vpop.f32.mrb[13].mxu1 }
 0x19f   : > { %683 = vst [vmem:[%s5809_s28 + $0xc0] sm:$0xff] %v531_v39  ;;  %v646_v45 = vadd.f32 %v645_v44, %v5804_v52 }
 0x1a0   : > { %685 = vst [vmem:[%s5809_s28 + $0xd0] sm:$0xff] %v644_v42  ;;  %684 = vst [vmem:[%s5809_s28 + $0xc8] sm:$0xff] %v533_v43  ;;  %v536_v46 = vpop.f32.mrb[14].mxu0 }
 0x1a1   : > { %686 = vst [vmem:[%s5809_s28 + $0xd8] sm:$0xff] %v646_v45  ;;  %v537_v8 = vadd.f32 %v536_v46, %v5798_v49  ;;  %v649_v47 = vpop.f32.mrb[14].mxu1  ;;  %v538_v48 = vpop.f32.mrb[15].mxu0 }
 0x1a2   : > { %v650_v53 = vadd.f32 %v649_v47, %v5800_v50  ;;  %v539_v54 = vadd.f32 %v538_v48, %v5802_v51  ;;  %v651_v55 = vpop.f32.mrb[15].mxu1 }
 0x1a3   : > { %687 = vst [vmem:[%s5809_s28 + $0xe0] sm:$0xff] %v537_v8  ;;  %v652_v56 = vadd.f32 %v651_v55, %v5804_v52 }
 0x1a4   : > { %689 = vst [vmem:[%s5809_s28 + $0xf0] sm:$0xff] %v650_v53  ;;  %688 = vst [vmem:[%s5809_s28 + $0xe8] sm:$0xff] %v539_v54 }
 0x1a5   : > { %690 = vst [vmem:[%s5809_s28 + $0xf8] sm:$0xff] %v652_v56 }
 0x1a6 PF: > { %p3809_p3 = scmp.le.s32.totalorder %s5582_s25, 0 }
 0x1a7   : > { %v696_v57 = vld [vmem:[#allocation10 + $0x8] sm:$0xff] (!%p3809_p3)  ;;  %v695_v49 = vld [vmem:[#allocation10] sm:$0xff] (!%p3809_p3)  ;;  %v5523_v51 = vmov (!%p3809_p3), 0.0   ;;  %v698_v9 = vld [vmem:[#allocation10 + $0x18] sm:$0xff] (!%p3809_p3)  ;;  %s3810_s7 = sadd.s32 (!%p3809_p3), 4294967295, %s5582_s25  ;;  %p3855_p4 = scmp.ne.s32.totalorder (!%p3809_p3), %s5582_s25, 1 }
 0x1a8   : > { %694 = sbr.rel (%p3809_p3) target bundleno = 4600 (0x11f8), region = 72  ;;  %v700_v58 = vld [vmem:[#allocation10 + $0x28] sm:$0xff] (!%p3809_p3)  ;;  %v699_v60 = vld [vmem:[#allocation10 + $0x20] sm:$0xff] (!%p3809_p3)  ;;  %848 = vmatprep.mubr.f32.mxu0 (!%p3809_p3), %v5523_v51  ;;  %919 = vmatprep.mubr.f32.mxu1 (!%p3809_p3), %v5523_v51  ;;  %v702_v10 = vld [vmem:[#allocation10 + $0x38] sm:$0xff] (!%p3809_p3)  ;;  %s761_s10 = ssub.s32 (!%p3809_p3), 0, %s3810_s7 }
 0x1a9   : > { %v5873_v59 = vpack.c.bf16 (!%p3809_p3), %v700_v58, %v696_v57  ;;  %v704_v50 = vld [vmem:[#allocation10 + $0x48] sm:$0xff] (!%p3809_p3)  ;;  %v5877_v52 = vpack.c.bf16 (!%p3809_p3), %v699_v60, %v695_v49  ;;  %v703_v63 = vld [vmem:[#allocation10 + $0x40] sm:$0xff] (!%p3809_p3)  ;;  %v5888_v12 = vpack.c.bf16 (!%p3809_p3), %v702_v10, %v698_v9  ;;  %v697_v13 = vld [vmem:[#allocation10 + $0x10] sm:$0xff] (!%p3809_p3)  ;;  %s3811_s20 = smin.u32 (!%p3809_p3), %s3810_s7, %s761_s10  ;;  %p760_p9 = scmp.lt.s32.totalorder (!%p3809_p3), %s3810_s7, 0 }
 0x1aa   : > { %v708_v61 = vld [vmem:[#allocation10 + $0x68] sm:$0xff] (!%p3809_p3)  ;;  %v707_v0 = vld [vmem:[#allocation10 + $0x60] sm:$0xff] (!%p3809_p3)  ;;  %v701_v14 = vld [vmem:[#allocation10 + $0x30] sm:$0xff] (!%p3809_p3)  ;;  %s763_s21 = sand.u32 (!%p3809_p3), 1, %s3811_s20  }
 0x1ab   : > { %v5879_v62 = vpack.c.bf16 (!%p3809_p3), %v708_v61, %v704_v50  ;;  %v712_v1 = vld [vmem:[#allocation10 + $0x88] sm:$0xff] (!%p3809_p3)  ;;  %3959 = vmatprep.subr.bf16.mxu0 (!%p3809_p3), %v5873_v59  ;;  %v5883_v3 = vpack.c.bf16 (!%p3809_p3), %v707_v0, %v703_v63  ;;  %v711_v4 = vld [vmem:[#allocation10 + $0x80] sm:$0xff] (!%p3809_p3)  ;;  %v5890_v15 = vpack.c.bf16 (!%p3809_p3), %v701_v14, %v697_v13  ;;  %3991 = vmatprep.subr.bf16.mxu1 (!%p3809_p3), %v5888_v12  ;;  %v706_v17 = vld [vmem:[#allocation10 + $0x58] sm:$0xff] (!%p3809_p3)  ;;  %s764_s12 = ssub.s32 (!%p3809_p3), 0, %s763_s21 }
 0x1ac   : > { %v716_v2 = vld [vmem:[#allocation10 + $0xa8] sm:$0xff] (!%p3809_p3)  ;;  %3961 = vmatpush1.bf16.msra.mxu0 (!%p3809_p3), %v5877_v52  ;;  %v715_v5 = vld [vmem:[#allocation10 + $0xa0] sm:$0xff] (!%p3809_p3)  ;;  %v710_v18 = vld [vmem:[#allocation10 + $0x78] sm:$0xff] (!%p3809_p3) }
 0x1ad   : > { %3963 = vmatprep.subr.bf16.mxu0 (!%p3809_p3), %v5879_v62  ;;  %v5886_v6 = vpack.c.bf16 (!%p3809_p3), %v716_v2, %v712_v1  ;;  %v720_v7 = vld [vmem:[#allocation10 + $0xc8] sm:$0xff] (!%p3809_p3)  ;;  %v5893_v16 = vpack.c.bf16 (!%p3809_p3), %v715_v5, %v711_v4  ;;  %v705_v19 = vld [vmem:[#allocation10 + $0x50] sm:$0xff] (!%p3809_p3)  ;;  %v719_v21 = vld [vmem:[#allocation10 + $0xc0] sm:$0xff] (!%p3809_p3)  ;;  %3993 = vmatpush1.bf16.msra.mxu1 (!%p3809_p3), %v5890_v15  ;;  %v5900_v23 = vpack.c.bf16 (!%p3809_p3), %v710_v18, %v706_v17 }
 0x1ae   : > { %v724_v11 = vld [vmem:[#allocation10 + $0xe8] sm:$0xff] (!%p3809_p3)  ;;  %v723_v22 = vld [vmem:[#allocation10 + $0xe0] sm:$0xff] (!%p3809_p3)  ;;  %v709_v24 = vld [vmem:[#allocation10 + $0x70] sm:$0xff] (!%p3809_p3) }
 0x1af   : > { %v5897_v20 = vpack.c.bf16 %v724_v11, %v720_v7  ;;  %v728_v25 = vld [vmem:[#allocation10 + $0x108] sm:$0xff]  ;;  %v5902_v27 = vpack.c.bf16 %v709_v24, %v705_v19  ;;  %v714_v28 = vld [vmem:[#allocation10 + $0x98] sm:$0xff]  ;;  %3995 = vmatprep.subr.bf16.mxu1 %v5900_v23  ;;  %v713_v30 = vld [vmem:[#allocation10 + $0x90] sm:$0xff]  ;;  %v5906_v32 = vpack.c.bf16 %v723_v22, %v719_v21  ;;  %s6725_s12 = smov (!%p760_p9, %s764_s12), %s763_s21 }
 0x1b0   : > { %3965 = vmatpush1.bf16.msra.mxu0 %v5883_v3  ;;  %v732_v26 = vld [vmem:[#allocation10 + $0x128] sm:$0xff]  ;;  %v718_v29 = vld [vmem:[#allocation10 + $0xb8] sm:$0xff]  ;;  %v717_v31 = vld [vmem:[#allocation10 + $0xb0] sm:$0xff]  ;;  %p3813_p1 = scmp.lt.s32.totalorder %s6725_s12, 0  ;;  %s770_s15 = sadd.s32 2, %s6725_s12 }
 0x1b1   : > { %3967 = vmatprep.subr.bf16.mxu0 %v5886_v6  ;;  %v727_v33 = vld [vmem:[#allocation10 + $0x100] sm:$0xff]  ;;  %v5908_v35 = vpack.c.bf16 %v718_v29, %v714_v28  ;;  %v5911_v36 = vpack.c.bf16 %v732_v26, %v728_v25  ;;  %3997 = vmatpush1.bf16.msra.mxu1 %v5902_v27  ;;  %v736_v37 = vld [vmem:[#allocation10 + $0x148] sm:$0xff]  ;;  %v5914_v38 = vpack.c.bf16 %v717_v31, %v713_v30  ;;  %v722_v39 = vld [vmem:[#allocation10 + $0xd8] sm:$0xff] }
 0x1b2   : > { %v731_v34 = vld [vmem:[#allocation10 + $0x120] sm:$0xff]  ;;  %v726_v40 = vld [vmem:[#allocation10 + $0xf8] sm:$0xff]  ;;  %v740_v41 = vld [vmem:[#allocation10 + $0x168] sm:$0xff]  ;;  %s6727_s15 = smov (!%p3813_p1, %s770_s15), %s6725_s12 }
 0x1b3   : > { %3999 = vmatprep.subr.bf16.mxu1 %v5908_v35  ;;  %v5917_v42 = vpack.c.bf16 %v726_v40, %v722_v39  ;;  %v721_v43 = vld [vmem:[#allocation10 + $0xd0] sm:$0xff]  ;;  %v5920_v45 = vpack.c.bf16 %v731_v34, %v727_v33  ;;  %v730_v46 = vld [vmem:[#allocation10 + $0x118] sm:$0xff]  ;;  %v5923_v47 = vpack.c.bf16 %v740_v41, %v736_v37  ;;  %v735_v48 = vld [vmem:[#allocation10 + $0x140] sm:$0xff]  ;;  %s6008_s8 = sshll.u32 %s6727_s15, 6 }
 0x1b4   : > { %3969 = vmatpush1.bf16.msra.mxu0 %v5893_v16  ;;  %v725_v44 = vld [vmem:[#allocation10 + $0xf0] sm:$0xff]  ;;  %v734_v8 = vld [vmem:[#allocation10 + $0x138] sm:$0xff]  ;;  %v739_v53 = vld [vmem:[#allocation10 + $0x160] sm:$0xff]  ;;  %s775_s17 = sshra.s32 %s6008_s8, 3  ;;  %s954_s11 = sadd.s32 8, %s6008_s8 }
 0x1b5   : > { %3971 = vmatprep.subr.bf16.mxu0 %v5897_v20  ;;  %4001 = vmatpush1.bf16.msra.mxu1 %v5914_v38  ;;  %v744_v54 = vld [vmem:[#allocation10 + $0x188] sm:$0xff]  ;;  %v5926_v55 = vpack.c.bf16 %v725_v44, %v721_v43  ;;  %v5929_v57 = vpack.c.bf16 %v734_v8, %v730_v46  ;;  %v729_v58 = vld [vmem:[#allocation10 + $0x110] sm:$0xff]  ;;  %v738_v60 = vld [vmem:[#allocation10 + $0x158] sm:$0xff]  ;;  %v5932_v61 = vpack.c.bf16 %v739_v53, %v735_v48  ;;  %s3886_s26 = sshll.u32 %s775_s17, 5  ;;  %s955_s13 = sshra.s32 %s954_s11, 3 }
 0x1b6   : > { %v748_v56 = vld [vmem:[#allocation10 + $0x1a8] sm:$0xff]  ;;  %4003 = vmatprep.subr.bf16.mxu1 %v5917_v42  ;;  %v733_v49 = vld [vmem:[#allocation10 + $0x130] sm:$0xff]  ;;  %v742_v50 = vld [vmem:[#allocation10 + $0x178] sm:$0xff]  ;;  %s779_s27 = scalar_lea.vmem [#allocation4], %s3886_s26  ;;  %s3887_s24 = sshll.u32 %s955_s13, 5 }
 0x1b7   : > { %v5935_v63 = vpack.c.bf16 %v748_v56, %v744_v54  ;;  %v743_v0 = vld [vmem:[#allocation10 + $0x180] sm:$0xff]  ;;  %v752_v2 = vld [vmem:[#allocation10 + $0x1c8] sm:$0xff]  ;;  %v5938_v4 = vpack.c.bf16 %v733_v49, %v729_v58  ;;  %v5941_v7 = vpack.c.bf16 %v742_v50, %v738_v60  ;;  %v737_v9 = vld [vmem:[#allocation10 + $0x150] sm:$0xff]  ;;  %s959_s14 = scalar_lea.vmem [#allocation4], %s3887_s24  ;;  %s1134_s30 = sadd.s32 16, %s6008_s8 }
 0x1b8   : > { %3973 = vmatpush1.bf16.msra.mxu0 %v5906_v32  ;;  %v747_v1 = vld [vmem:[#allocation10 + $0x1a0] sm:$0xff]  ;;  %v756_v5 = vld [vmem:[#allocation10 + $0x1e8] sm:$0xff]  ;;  %v741_v10 = vld [vmem:[#allocation10 + $0x170] sm:$0xff]  ;;  %s1135_s29 = sshra.s32 %s1134_s30, 3  ;;  %s1314_s28 = sadd.s32 24, %s6008_s8 }
 0x1b9   : > { %3975 = vmatprep.subr.bf16.mxu0 %v5911_v36  ;;  %4005 = vmatpush1.bf16.msra.mxu1 %v5926_v55  ;;  %v746_v11 = vld [vmem:[#allocation10 + $0x198] sm:$0xff]  ;;  %v5944_v14 = vpack.c.bf16 %v747_v1, %v743_v0  ;;  %v5947_v17 = vpack.c.bf16 %v756_v5, %v752_v2  ;;  %v751_v18 = vld [vmem:[#allocation10 + $0x1c0] sm:$0xff]  ;;  %v5950_v21 = vpack.c.bf16 %v741_v10, %v737_v9  ;;  %v745_v24 = vld [vmem:[#allocation10 + $0x190] sm:$0xff]  ;;  %s3888_s18 = sshll.u32 %s1135_s29, 5  ;;  %s1315_s7 = sshra.s32 %s1314_s28, 3 }
 0x1ba   : > { %4007 = vmatprep.subr.bf16.mxu1 %v5929_v57  ;;  %v750_v13 = vld [vmem:[#allocation10 + $0x1b8] sm:$0xff]  ;;  %v755_v19 = vld [vmem:[#allocation10 + $0x1e0] sm:$0xff]  ;;  %v749_v25 = vld [vmem:[#allocation10 + $0x1b0] sm:$0xff]  ;;  %s1139_s19 = scalar_lea.vmem [#allocation4], %s3888_s18  ;;  %s3889_s10 = sshll.u32 %s1315_s7, 5 }
 0x1bb   : > { %v5953_v22 = vpack.c.bf16 %v750_v13, %v746_v11  ;;  %v754_v26 = vld [vmem:[#allocation10 + $0x1d8] sm:$0xff]  ;;  %v5956_v29 = vpack.c.bf16 %v755_v19, %v751_v18  ;;  %v5960_v30 = vpack.c.bf16 %v749_v25, %v745_v24  ;;  %v753_v33 = vld [vmem:[#allocation10 + $0x1d0] sm:$0xff]  ;;  %v782_v54 = vld [vmem:[%s779_s27 + $0x10] sm:$0xff]  ;;  %s1319_s20 = scalar_lea.vmem [#allocation4], %s3889_s10  ;;  %s1494_s21 = sadd.s32 32, %s6008_s8 }
 0x1bc   : > { %3977 = vmatpush1.bf16.msra.mxu0 %v5920_v45  ;;  %v758_v28 = vld [vmem:[#allocation10 + $0x1f8] sm:$0xff]  ;;  %v757_v34 = vld [vmem:[#allocation10 + $0x1f0] sm:$0xff]  ;;  %v783_v60 = vld [vmem:[%s779_s27 + $0x18] sm:$0xff]  ;;  %s1495_s12 = sshra.s32 %s1494_s21, 3  ;;  %s1674_s26 = sadd.s32 40, %s6008_s8 }
 0x1bd   : > { %3979 = vmatprep.subr.bf16.mxu0 %v5923_v47  ;;  %4009 = vmatpush1.bf16.msra.mxu1 %v5938_v4  ;;  %v5963_v31 = vpack.c.bf16 %v758_v28, %v754_v26  ;;  %v773_v37 = vld [vmem:[#allocation2] sm:$0xff]  ;;  %v5967_v39 = vpack.c.bf16 %v757_v34, %v753_v33  ;;  %v781_v41 = vld [vmem:[%s779_s27 + $0x8] sm:$0xff]  ;;  %s3890_s15 = sshll.u32 %s1495_s12, 5  ;;  %s1854_s24 = sadd.s32 48, %s6008_s8 }
 0x1be   : > { %4011 = vmatprep.subr.bf16.mxu1 %v5941_v7  ;;  %v780_v40 = vld [vmem:[%s779_s27] sm:$0xff]  ;;  %v774_v13 = vld [vmem:[#allocation3] sm:$0xff]  ;;  %s1499_s17 = scalar_lea.vmem [#allocation4], %s3890_s15  ;;  %s1675_s27 = sshra.s32 %s1674_s26, 3 }
 0x1bf   : > { %s3891_s11 = sshll.u32 %s1675_s27, 5  ;;  %s2034_s18 = sadd.s32 56, %s6008_s8 }
 0x1c0   : > { %3981 = vmatpush1.bf16.msra.mxu0 %v5932_v61  ;;  %s1679_s13 = scalar_lea.vmem [#allocation4], %s3891_s11 }
 0x1c1   : > { %3983 = vmatprep.subr.bf16.mxu0 %v5935_v63  ;;  %4013 = vmatpush1.bf16.msra.mxu1 %v5950_v21 }
 0x1c2   : > { %4015 = vmatprep.subr.bf16.mxu1 %v5953_v22 }
 0x1c4   : > { %3985 = vmatpush1.bf16.msra.mxu0 %v5944_v14 }
 0x1c5   : > { %3987 = vmatprep.subr.bf16.mxu0 %v5947_v17  ;;  %4017 = vmatpush1.bf16.msra.mxu1 %v5960_v30 }
 0x1c6   : > { %4019 = vmatprep.subr.bf16.mxu1 %v5963_v31 }
 0x1c8   : > { %3989 = vmatpush1.bf16.msra.mxu0 %v5956_v29 }
 0x1c9   : > { %4023 = vmatprep.subr.bf16.mxu0 %v5873_v59  ;;  %4021 = vmatpush1.bf16.msra.mxu1 %v5967_v39 }
 0x1ca   : > { %4055 = vmatprep.subr.bf16.mxu1 %v5888_v12 }
 0x1cb   : > { %849 = vmatmul.mubr.f32.vlgmr.msra.gmra.mrb[0].mxu0 %v773_v37 }
 0x1cc   : > { %4025 = vmatpush1.bf16.msra.mxu0 %v5877_v52  ;;  %1028 = vmatprep.mubr.f32.mxu0 %v5523_v51 }
 0x1cd   : > { %4027 = vmatprep.subr.bf16.mxu0 %v5879_v62  ;;  %920 = vmatmul.mubr.f32.vlgmr.msra.gmra.mrb[0].mxu1 %v773_v37 }
 0x1ce   : > { %4057 = vmatpush1.bf16.msra.mxu1 %v5890_v15  ;;  %1099 = vmatprep.mubr.f32.mxu1 %v5523_v51 }
 0x1cf   : > { %4059 = vmatprep.subr.bf16.mxu1 %v5900_v23 }
 0x1d0   : > { %4029 = vmatpush1.bf16.msra.mxu0 %v5883_v3 }
 0x1d1   : > { %4031 = vmatprep.subr.bf16.mxu0 %v5886_v6 }
 0x1d2   : > { %4061 = vmatpush1.bf16.msra.mxu1 %v5902_v27 }
 0x1d3   : > { %4063 = vmatprep.subr.bf16.mxu1 %v5908_v35 }
 0x1d4   : > { %4033 = vmatpush1.bf16.msra.mxu0 %v5893_v16 }
 0x1d5   : > { %4035 = vmatprep.subr.bf16.mxu0 %v5897_v20 }
 0x1d6   : > { %4065 = vmatpush1.bf16.msra.mxu1 %v5914_v38 }
 0x1d7   : > { %4067 = vmatprep.subr.bf16.mxu1 %v5917_v42 }
 0x1d8   : > { %4037 = vmatpush1.bf16.msra.mxu0 %v5906_v32 }
 0x1d9   : > { %4039 = vmatprep.subr.bf16.mxu0 %v5911_v36 }
 0x1da   : > { %4069 = vmatpush1.bf16.msra.mxu1 %v5926_v55 }
 0x1db   : > { %4071 = vmatprep.subr.bf16.mxu1 %v5929_v57 }
 0x1dc   : > { %4041 = vmatpush1.bf16.msra.mxu0 %v5920_v45 }
 0x1dd   : > { %4043 = vmatprep.subr.bf16.mxu0 %v5923_v47 }
 0x1de   : > { %4073 = vmatpush1.bf16.msra.mxu1 %v5938_v4 }
 0x1df   : > { %4075 = vmatprep.subr.bf16.mxu1 %v5941_v7 }
 0x1e0   : > { %4045 = vmatpush1.bf16.msra.mxu0 %v5932_v61 }
 0x1e1   : > { %4047 = vmatprep.subr.bf16.mxu0 %v5935_v63 }
 0x1e2   : > { %4077 = vmatpush1.bf16.msra.mxu1 %v5950_v21 }
 0x1e3   : > { %4079 = vmatprep.subr.bf16.mxu1 %v5953_v22 }
 0x1e4   : > { %4049 = vmatpush1.bf16.msra.mxu0 %v5944_v14 }
 0x1e5   : > { %4051 = vmatprep.subr.bf16.mxu0 %v5947_v17 }
 0x1e6   : > { %4081 = vmatpush1.bf16.msra.mxu1 %v5960_v30 }
 0x1e7   : > { %4083 = vmatprep.subr.bf16.mxu1 %v5963_v31 }
 0x1e8   : > { %4053 = vmatpush1.bf16.msra.mxu0 %v5956_v29 }
 0x1e9   : > { %4087 = vmatprep.subr.bf16.mxu0 %v5873_v59 }
 0x1ea   : > { %4085 = vmatpush1.bf16.msra.mxu1 %v5967_v39 }
 0x1eb   : > { %4119 = vmatprep.subr.bf16.mxu1 %v5888_v12 }
 0x29e   : > { %v850_v43 = vpop.f32.mrb[0].mxu0 }
 0x29f   : > { %v926_v44 = vadd.f32 %v850_v43, %v780_v40  ;;  %v852_v46 = vpop.f32.mrb[1].mxu0  ;;  %v960_v40 = vld [vmem:[%s959_s14] sm:$0xff] }
 0x2a0   : > { %v927_v8 = vadd.f32 %v852_v46, %v781_v41  ;;  %v921_v56 = vpop.f32.mrb[0].mxu1  ;;  %v961_v41 = vld [vmem:[%s959_s14 + $0x8] sm:$0xff] }
 0x2a1   : > { %v3817_v48 = vmul.f32 -1.442695, %v926_v44  ;;  %v923_v58 = vpop.f32.mrb[1].mxu1  ;;  %v928_v49 = vadd.f32 %v921_v56, %v782_v54 }
 0x2a2   : > { %v3818_v53 = vmul.f32 -1.442695, %v927_v8  ;;  %v929_v0 = vadd.f32 %v923_v58, %v783_v60  ;;  %v962_v58 = vld [vmem:[%s959_s14 + $0x10] sm:$0xff]  ;;  %v963_v60 = vld [vmem:[%s959_s14 + $0x18] sm:$0xff]  ;;  %s1855_s14 = sshra.s32 %s1854_s24, 3 }
 0x2a3   : > { %5069 = vpow2.f32 %v3817_v48  ;;  %v3819_v50 = vmul.f32 -1.442695, %v928_v49  ;;  %s3892_s30 = sshll.u32 %s1855_s14, 5 }
 0x2a4   : > { %5071 = vpow2.f32 %v3818_v53  ;;  %s1859_s29 = scalar_lea.vmem [#allocation4], %s3892_s30 }
 0x2a5   : > { %5073 = vpow2.f32 %v3819_v50 }
 0x2a6   : > { %5075 = vtanh.f32 %v929_v0 }
 0x2ad   : > { %v5070_v1 = vpop.eup %5069 }
 0x2ae   : > { %v5072_v2 = vpop.eup %5071  ;;  %v939_v5 = vadd.f32 1.0, %v5070_v1 }
 0x2af   : > { %v940_v9 = vadd.f32 1.0, %v5072_v2  ;;  %v5074_v10 = vpop.eup %5073 }
 0x2b0   : > { %5077 = vrcp.f32 %v939_v5  ;;  %v5076_v11 = vpop.eup %5075  ;;  %v941_v19 = vadd.f32 1.0, %v5074_v10 }
 0x2b1   : > { %5079 = vrcp.f32 %v940_v9 }
 0x2b2   : > { %5081 = vrcp.f32 %v941_v19 }
 0x2ba   : > { %v5078_v18 = vpop.eup %5077 }
 0x2bb   : > { %v5080_v24 = vpop.eup %5079  ;;  %v950_v25 = vmul.f32 %v5078_v18, %v5076_v11 }
 0x2bc   : > { %v949_v26 = vmul.f32 %v5080_v24, %v774_v13  ;;  %v5082_v33 = vpop.eup %5081 }
 0x2be   : > { %v6011_v28 = vadd.f32 %v950_v25, %v949_v26 }
 0x2c0   : > { %5083 = vtanh.f32 %v6011_v28 }
 0x2ca   : > { %v5084_v34 = vpop.eup %5083 }
 0x2cb   : > { %v953_v37 = vmul.f32 %v5084_v34, %v5082_v33 }
 0x2cd   : > { %1029 = vmatmul.mubr.f32.vlgmr.msra.gmra.mrb[2].mxu0 %v953_v37  ;;  %1100 = vmatmul.mubr.f32.vlgmr.msra.gmra.mrb[2].mxu1 %v953_v37 }
 0x2ce   : > { %4089 = vmatpush1.bf16.msra.mxu0 %v5877_v52  ;;  %4121 = vmatpush1.bf16.msra.mxu1 %v5890_v15 }
 0x2cf   : > { %4091 = vmatprep.subr.bf16.mxu0 %v5879_v62  ;;  %4123 = vmatprep.subr.bf16.mxu1 %v5900_v23 }
 0x2d0   : > { %1208 = vmatprep.mubr.f32.mxu0 %v5523_v51  ;;  %1279 = vmatprep.mubr.f32.mxu1 %v5523_v51 }
 0x2d2   : > { %4093 = vmatpush1.bf16.msra.mxu0 %v5883_v3  ;;  %4125 = vmatpush1.bf16.msra.mxu1 %v5902_v27 }
 0x2d3   : > { %4095 = vmatprep.subr.bf16.mxu0 %v5886_v6  ;;  %4127 = vmatprep.subr.bf16.mxu1 %v5908_v35 }
 0x2d6   : > { %4097 = vmatpush1.bf16.msra.mxu0 %v5893_v16  ;;  %4129 = vmatpush1.bf16.msra.mxu1 %v5914_v38 }
 0x2d7   : > { %4099 = vmatprep.subr.bf16.mxu0 %v5897_v20  ;;  %4131 = vmatprep.subr.bf16.mxu1 %v5917_v42 }
 0x2da   : > { %4101 = vmatpush1.bf16.msra.mxu0 %v5906_v32  ;;  %4133 = vmatpush1.bf16.msra.mxu1 %v5926_v55 }
 0x2db   : > { %4103 = vmatprep.subr.bf16.mxu0 %v5911_v36  ;;  %4135 = vmatprep.subr.bf16.mxu1 %v5929_v57 }
 0x2de   : > { %4105 = vmatpush1.bf16.msra.mxu0 %v5920_v45  ;;  %4137 = vmatpush1.bf16.msra.mxu1 %v5938_v4 }
 0x2df   : > { %4107 = vmatprep.subr.bf16.mxu0 %v5923_v47  ;;  %4139 = vmatprep.subr.bf16.mxu1 %v5941_v7 }
 0x2e2   : > { %4109 = vmatpush1.bf16.msra.mxu0 %v5932_v61  ;;  %4141 = vmatpush1.bf16.msra.mxu1 %v5950_v21 }
 0x2e3   : > { %4111 = vmatprep.subr.bf16.mxu0 %v5935_v63  ;;  %4143 = vmatprep.subr.bf16.mxu1 %v5953_v22 }
 0x2e6   : > { %4113 = vmatpush1.bf16.msra.mxu0 %v5944_v14  ;;  %4145 = vmatpush1.bf16.msra.mxu1 %v5960_v30 }
 0x2e7   : > { %4115 = vmatprep.subr.bf16.mxu0 %v5947_v17  ;;  %4147 = vmatprep.subr.bf16.mxu1 %v5963_v31 }
 0x2ea   : > { %4117 = vmatpush1.bf16.msra.mxu0 %v5956_v29  ;;  %4149 = vmatpush1.bf16.msra.mxu1 %v5967_v39 }
 0x2eb   : > { %4151 = vmatprep.subr.bf16.mxu0 %v5873_v59  ;;  %4183 = vmatprep.subr.bf16.mxu1 %v5888_v12 }
 0x3a0   : > { %v1030_v43 = vpop.f32.mrb[2].mxu0  ;;  %v1101_v44 = vpop.f32.mrb[2].mxu1 }
 0x3a1   : > { %v1106_v46 = vadd.f32 %v1030_v43, %v960_v40  ;;  %v1032_v8 = vpop.f32.mrb[3].mxu0  ;;  %v1103_v48 = vpop.f32.mrb[3].mxu1  ;;  %v1108_v49 = vadd.f32 %v1101_v44, %v962_v58  ;;  %v1141_v40 = vld [vmem:[%s1139_s19 + $0x8] sm:$0xff] }
 0x3a2   : > { %v1107_v53 = vadd.f32 %v1032_v8, %v961_v41  ;;  %v1109_v50 = vadd.f32 %v1103_v48, %v963_v60 }
 0x3a3   : > { %v3822_v54 = vmul.f32 -1.442695, %v1106_v46  ;;  %v3824_v0 = vmul.f32 -1.442695, %v1108_v49  ;;  %v1143_v49 = vld [vmem:[%s1139_s19 + $0x18] sm:$0xff] }
 0x3a4   : > { %v3823_v56 = vmul.f32 -1.442695, %v1107_v53 }
 0x3a5   : > { %5085 = vpow2.f32 %v3822_v54 }
 0x3a6   : > { %5087 = vpow2.f32 %v3823_v56  ;;  %v1142_v56 = vld [vmem:[%s1139_s19 + $0x10] sm:$0xff] }
 0x3a7   : > { %5089 = vtanh.f32 %v1109_v50 }
 0x3a8   : > { %5091 = vpow2.f32 %v3824_v0 }
 0x3af   : > { %v5086_v1 = vpop.eup %5085 }
 0x3b0   : > { %v1119_v2 = vadd.f32 1.0, %v5086_v1  ;;  %v5088_v5 = vpop.eup %5087 }
 0x3b1   : > { %v1120_v9 = vadd.f32 1.0, %v5088_v5  ;;  %v5090_v10 = vpop.eup %5089 }
 0x3b2   : > { %5093 = vrcp.f32 %v1119_v2  ;;  %v5092_v11 = vpop.eup %5091 }
 0x3b3   : > { %5095 = vrcp.f32 %v1120_v9  ;;  %v1121_v24 = vadd.f32 1.0, %v5092_v11 }
 0x3b5   : > { %5097 = vrcp.f32 %v1121_v24 }
 0x3bc   : > { %v5094_v13 = vpop.eup %5093 }
 0x3bd   : > { %v1130_v18 = vmul.f32 %v5094_v13, %v5090_v10  ;;  %v5096_v19 = vpop.eup %5095 }
 0x3be   : > { %v1129_v25 = vmul.f32 %v5096_v19, %v6011_v28  ;;  %v1140_v28 = vld [vmem:[%s1139_s19] sm:$0xff]  ;;  %s2035_s19 = sshra.s32 %s2034_s18, 3 }
 0x3bf   : > { %v5098_v33 = vpop.eup %5097  ;;  %s3893_s28 = sshll.u32 %s2035_s19, 5 }
 0x3c0   : > { %v6050_v26 = vadd.f32 %v1130_v18, %v1129_v25  ;;  %s2039_s7 = scalar_lea.vmem [#allocation4], %s3893_s28 }
 0x3c2   : > { %5099 = vtanh.f32 %v6050_v26 }
 0x3cc   : > { %v5100_v34 = vpop.eup %5099 }
 0x3cd   : > { %v1133_v37 = vmul.f32 %v5100_v34, %v5098_v33 }
 0x3cf   : > { %1209 = vmatmul.mubr.f32.vlgmr.msra.gmra.mrb[4].mxu0 %v1133_v37  ;;  %1280 = vmatmul.mubr.f32.vlgmr.msra.gmra.mrb[4].mxu1 %v1133_v37 }
 0x3d0   : > { %4153 = vmatpush1.bf16.msra.mxu0 %v5877_v52  ;;  %4185 = vmatpush1.bf16.msra.mxu1 %v5890_v15 }
 0x3d1   : > { %4155 = vmatprep.subr.bf16.mxu0 %v5879_v62  ;;  %4187 = vmatprep.subr.bf16.mxu1 %v5900_v23 }
 0x3d2   : > { %1388 = vmatprep.mubr.f32.mxu0 %v5523_v51  ;;  %1459 = vmatprep.mubr.f32.mxu1 %v5523_v51 }
 0x3d4   : > { %4157 = vmatpush1.bf16.msra.mxu0 %v5883_v3  ;;  %4189 = vmatpush1.bf16.msra.mxu1 %v5902_v27 }
 0x3d5   : > { %4159 = vmatprep.subr.bf16.mxu0 %v5886_v6  ;;  %4191 = vmatprep.subr.bf16.mxu1 %v5908_v35 }
 0x3d8   : > { %4161 = vmatpush1.bf16.msra.mxu0 %v5893_v16  ;;  %4193 = vmatpush1.bf16.msra.mxu1 %v5914_v38 }
 0x3d9   : > { %4163 = vmatprep.subr.bf16.mxu0 %v5897_v20  ;;  %4195 = vmatprep.subr.bf16.mxu1 %v5917_v42 }
 0x3dc   : > { %4165 = vmatpush1.bf16.msra.mxu0 %v5906_v32  ;;  %4197 = vmatpush1.bf16.msra.mxu1 %v5926_v55 }
 0x3dd   : > { %4167 = vmatprep.subr.bf16.mxu0 %v5911_v36  ;;  %4199 = vmatprep.subr.bf16.mxu1 %v5929_v57 }
 0x3e0   : > { %4169 = vmatpush1.bf16.msra.mxu0 %v5920_v45  ;;  %4201 = vmatpush1.bf16.msra.mxu1 %v5938_v4 }
 0x3e1   : > { %4171 = vmatprep.subr.bf16.mxu0 %v5923_v47  ;;  %4203 = vmatprep.subr.bf16.mxu1 %v5941_v7 }
 0x3e4   : > { %4173 = vmatpush1.bf16.msra.mxu0 %v5932_v61  ;;  %4205 = vmatpush1.bf16.msra.mxu1 %v5950_v21 }
 0x3e5   : > { %4175 = vmatprep.subr.bf16.mxu0 %v5935_v63  ;;  %4207 = vmatprep.subr.bf16.mxu1 %v5953_v22 }
 0x3e8   : > { %4177 = vmatpush1.bf16.msra.mxu0 %v5944_v14  ;;  %4209 = vmatpush1.bf16.msra.mxu1 %v5960_v30 }
 0x3e9   : > { %4179 = vmatprep.subr.bf16.mxu0 %v5947_v17  ;;  %4211 = vmatprep.subr.bf16.mxu1 %v5963_v31 }
 0x3ec   : > { %4181 = vmatpush1.bf16.msra.mxu0 %v5956_v29  ;;  %4213 = vmatpush1.bf16.msra.mxu1 %v5967_v39 }
 0x3ed   : > { %4215 = vmatprep.subr.bf16.mxu0 %v5873_v59  ;;  %4247 = vmatprep.subr.bf16.mxu1 %v5888_v12 }
 0x4a2   : > { %v1210_v41 = vpop.f32.mrb[4].mxu0  ;;  %v1281_v43 = vpop.f32.mrb[4].mxu1 }
 0x4a3   : > { %v1286_v44 = vadd.f32 %v1210_v41, %v1140_v28  ;;  %v1212_v46 = vpop.f32.mrb[5].mxu0  ;;  %v1283_v8 = vpop.f32.mrb[5].mxu1  ;;  %v1288_v58 = vadd.f32 %v1281_v43, %v1142_v56  ;;  %v1321_v28 = vld [vmem:[%s1319_s20 + $0x8] sm:$0xff] }
 0x4a4   : > { %v1287_v48 = vadd.f32 %v1212_v46, %v1141_v40  ;;  %v1289_v60 = vadd.f32 %v1283_v8, %v1143_v49 }
 0x4a5   : > { %v3827_v53 = vmul.f32 -1.442695, %v1286_v44  ;;  %v3829_v50 = vmul.f32 -1.442695, %v1288_v58  ;;  %v1323_v58 = vld [vmem:[%s1319_s20 + $0x18] sm:$0xff] }
 0x4a6   : > { %v3828_v54 = vmul.f32 -1.442695, %v1287_v48 }
 0x4a7   : > { %5101 = vpow2.f32 %v3827_v53 }
 0x4a8   : > { %5103 = vpow2.f32 %v3828_v54  ;;  %v1322_v54 = vld [vmem:[%s1319_s20 + $0x10] sm:$0xff] }
 0x4a9   : > { %5105 = vtanh.f32 %v1289_v60 }
 0x4aa   : > { %5107 = vpow2.f32 %v3829_v50 }
 0x4b1   : > { %v5102_v0 = vpop.eup %5101 }
 0x4b2   : > { %v1299_v1 = vadd.f32 1.0, %v5102_v0  ;;  %v5104_v2 = vpop.eup %5103 }
 0x4b3   : > { %v1300_v5 = vadd.f32 1.0, %v5104_v2  ;;  %v5106_v9 = vpop.eup %5105 }
 0x4b4   : > { %5109 = vrcp.f32 %v1299_v1  ;;  %v5108_v10 = vpop.eup %5107 }
 0x4b5   : > { %5111 = vrcp.f32 %v1300_v5  ;;  %v1301_v19 = vadd.f32 1.0, %v5108_v10 }
 0x4b7   : > { %5113 = vrcp.f32 %v1301_v19 }
 0x4be   : > { %v5110_v11 = vpop.eup %5109 }
 0x4bf   : > { %v1310_v13 = vmul.f32 %v5110_v11, %v5106_v9  ;;  %v5112_v18 = vpop.eup %5111 }
 0x4c0   : > { %v1309_v24 = vmul.f32 %v5112_v18, %v6050_v26  ;;  %v1320_v26 = vld [vmem:[%s1319_s20] sm:$0xff] }
 0x4c1   : > { %v5114_v33 = vpop.eup %5113 }
 0x4c2   : > { %v6089_v25 = vadd.f32 %v1310_v13, %v1309_v24 }
 0x4c4   : > { %5115 = vtanh.f32 %v6089_v25 }
 0x4ce   : > { %v5116_v34 = vpop.eup %5115 }
 0x4cf   : > { %v1313_v37 = vmul.f32 %v5116_v34, %v5114_v33 }
 0x4d1   : > { %1389 = vmatmul.mubr.f32.vlgmr.msra.gmra.mrb[6].mxu0 %v1313_v37  ;;  %1460 = vmatmul.mubr.f32.vlgmr.msra.gmra.mrb[6].mxu1 %v1313_v37 }
 0x4d2   : > { %4217 = vmatpush1.bf16.msra.mxu0 %v5877_v52  ;;  %4249 = vmatpush1.bf16.msra.mxu1 %v5890_v15 }
 0x4d3   : > { %4219 = vmatprep.subr.bf16.mxu0 %v5879_v62  ;;  %4251 = vmatprep.subr.bf16.mxu1 %v5900_v23 }
 0x4d4   : > { %1568 = vmatprep.mubr.f32.mxu0 %v5523_v51  ;;  %1639 = vmatprep.mubr.f32.mxu1 %v5523_v51 }
 0x4d6   : > { %4221 = vmatpush1.bf16.msra.mxu0 %v5883_v3  ;;  %4253 = vmatpush1.bf16.msra.mxu1 %v5902_v27 }
 0x4d7   : > { %4223 = vmatprep.subr.bf16.mxu0 %v5886_v6  ;;  %4255 = vmatprep.subr.bf16.mxu1 %v5908_v35 }
 0x4da   : > { %4225 = vmatpush1.bf16.msra.mxu0 %v5893_v16  ;;  %4257 = vmatpush1.bf16.msra.mxu1 %v5914_v38 }
 0x4db   : > { %4227 = vmatprep.subr.bf16.mxu0 %v5897_v20  ;;  %4259 = vmatprep.subr.bf16.mxu1 %v5917_v42 }
 0x4de   : > { %4229 = vmatpush1.bf16.msra.mxu0 %v5906_v32  ;;  %4261 = vmatpush1.bf16.msra.mxu1 %v5926_v55 }
 0x4df   : > { %4231 = vmatprep.subr.bf16.mxu0 %v5911_v36  ;;  %4263 = vmatprep.subr.bf16.mxu1 %v5929_v57 }
 0x4e2   : > { %4233 = vmatpush1.bf16.msra.mxu0 %v5920_v45  ;;  %4265 = vmatpush1.bf16.msra.mxu1 %v5938_v4 }
 0x4e3   : > { %4235 = vmatprep.subr.bf16.mxu0 %v5923_v47  ;;  %4267 = vmatprep.subr.bf16.mxu1 %v5941_v7 }
 0x4e6   : > { %4237 = vmatpush1.bf16.msra.mxu0 %v5932_v61  ;;  %4269 = vmatpush1.bf16.msra.mxu1 %v5950_v21 }
 0x4e7   : > { %4239 = vmatprep.subr.bf16.mxu0 %v5935_v63  ;;  %4271 = vmatprep.subr.bf16.mxu1 %v5953_v22 }
 0x4ea   : > { %4241 = vmatpush1.bf16.msra.mxu0 %v5944_v14  ;;  %4273 = vmatpush1.bf16.msra.mxu1 %v5960_v30 }
 0x4eb   : > { %4243 = vmatprep.subr.bf16.mxu0 %v5947_v17  ;;  %4275 = vmatprep.subr.bf16.mxu1 %v5963_v31 }
 0x4ee   : > { %4245 = vmatpush1.bf16.msra.mxu0 %v5956_v29  ;;  %4277 = vmatpush1.bf16.msra.mxu1 %v5967_v39 }
 0x4ef   : > { %4279 = vmatprep.subr.bf16.mxu0 %v5873_v59  ;;  %4311 = vmatprep.subr.bf16.mxu1 %v5888_v12 }
 0x5a4   : > { %v1390_v40 = vpop.f32.mrb[6].mxu0  ;;  %v1461_v41 = vpop.f32.mrb[6].mxu1 }
 0x5a5   : > { %v1466_v43 = vadd.f32 %v1390_v40, %v1320_v26  ;;  %v1392_v44 = vpop.f32.mrb[7].mxu0  ;;  %v1463_v46 = vpop.f32.mrb[7].mxu1  ;;  %v1468_v56 = vadd.f32 %v1461_v41, %v1322_v54  ;;  %v1501_v26 = vld [vmem:[%s1499_s17 + $0x8] sm:$0xff] }
 0x5a6   : > { %v1467_v8 = vadd.f32 %v1392_v44, %v1321_v28  ;;  %v1469_v49 = vadd.f32 %v1463_v46, %v1323_v58 }
 0x5a7   : > { %v3832_v48 = vmul.f32 -1.442695, %v1466_v43  ;;  %v3834_v60 = vmul.f32 -1.442695, %v1468_v56  ;;  %v1503_v56 = vld [vmem:[%s1499_s17 + $0x18] sm:$0xff] }
 0x5a8   : > { %v3833_v53 = vmul.f32 -1.442695, %v1467_v8 }
 0x5a9   : > { %5117 = vpow2.f32 %v3832_v48 }
 0x5aa   : > { %5119 = vpow2.f32 %v3833_v53  ;;  %v1502_v53 = vld [vmem:[%s1499_s17 + $0x10] sm:$0xff] }
 0x5ab   : > { %5121 = vtanh.f32 %v1469_v49 }
 0x5ac   : > { %5123 = vpow2.f32 %v3834_v60 }
 0x5b3   : > { %v5118_v50 = vpop.eup %5117 }
 0x5b4   : > { %v1479_v0 = vadd.f32 1.0, %v5118_v50  ;;  %v5120_v1 = vpop.eup %5119 }
 0x5b5   : > { %v1480_v2 = vadd.f32 1.0, %v5120_v1  ;;  %v5122_v5 = vpop.eup %5121 }
 0x5b6   : > { %5125 = vrcp.f32 %v1479_v0  ;;  %v5124_v9 = vpop.eup %5123 }
 0x5b7   : > { %5127 = vrcp.f32 %v1480_v2  ;;  %v1481_v18 = vadd.f32 1.0, %v5124_v9 }
 0x5b9   : > { %5129 = vrcp.f32 %v1481_v18 }
 0x5c0   : > { %v5126_v10 = vpop.eup %5125 }
 0x5c1   : > { %v1490_v11 = vmul.f32 %v5126_v10, %v5122_v5  ;;  %v5128_v13 = vpop.eup %5127 }
 0x5c2   : > { %v1489_v19 = vmul.f32 %v5128_v13, %v6089_v25  ;;  %v1500_v25 = vld [vmem:[%s1499_s17] sm:$0xff] }
 0x5c3   : > { %v5130_v33 = vpop.eup %5129 }
 0x5c4   : > { %v6128_v24 = vadd.f32 %v1490_v11, %v1489_v19 }
 0x5c6   : > { %5131 = vtanh.f32 %v6128_v24 }
 0x5d0   : > { %v5132_v34 = vpop.eup %5131 }
 0x5d1   : > { %v1493_v37 = vmul.f32 %v5132_v34, %v5130_v33 }
 0x5d3   : > { %1569 = vmatmul.mubr.f32.vlgmr.msra.gmra.mrb[8].mxu0 %v1493_v37  ;;  %1640 = vmatmul.mubr.f32.vlgmr.msra.gmra.mrb[8].mxu1 %v1493_v37 }
 0x5d4   : > { %4281 = vmatpush1.bf16.msra.mxu0 %v5877_v52  ;;  %4313 = vmatpush1.bf16.msra.mxu1 %v5890_v15 }
 0x5d5   : > { %4283 = vmatprep.subr.bf16.mxu0 %v5879_v62  ;;  %4315 = vmatprep.subr.bf16.mxu1 %v5900_v23 }
 0x5d6   : > { %1748 = vmatprep.mubr.f32.mxu0 %v5523_v51  ;;  %1819 = vmatprep.mubr.f32.mxu1 %v5523_v51 }
 0x5d8   : > { %4285 = vmatpush1.bf16.msra.mxu0 %v5883_v3  ;;  %4317 = vmatpush1.bf16.msra.mxu1 %v5902_v27 }
 0x5d9   : > { %4287 = vmatprep.subr.bf16.mxu0 %v5886_v6  ;;  %4319 = vmatprep.subr.bf16.mxu1 %v5908_v35 }
 0x5dc   : > { %4289 = vmatpush1.bf16.msra.mxu0 %v5893_v16  ;;  %4321 = vmatpush1.bf16.msra.mxu1 %v5914_v38 }
 0x5dd   : > { %4291 = vmatprep.subr.bf16.mxu0 %v5897_v20  ;;  %4323 = vmatprep.subr.bf16.mxu1 %v5917_v42 }
 0x5e0   : > { %4293 = vmatpush1.bf16.msra.mxu0 %v5906_v32  ;;  %4325 = vmatpush1.bf16.msra.mxu1 %v5926_v55 }
 0x5e1   : > { %4295 = vmatprep.subr.bf16.mxu0 %v5911_v36  ;;  %4327 = vmatprep.subr.bf16.mxu1 %v5929_v57 }
 0x5e4   : > { %4297 = vmatpush1.bf16.msra.mxu0 %v5920_v45  ;;  %4329 = vmatpush1.bf16.msra.mxu1 %v5938_v4 }
 0x5e5   : > { %4299 = vmatprep.subr.bf16.mxu0 %v5923_v47  ;;  %4331 = vmatprep.subr.bf16.mxu1 %v5941_v7 }
 0x5e8   : > { %4301 = vmatpush1.bf16.msra.mxu0 %v5932_v61  ;;  %4333 = vmatpush1.bf16.msra.mxu1 %v5950_v21 }
 0x5e9   : > { %4303 = vmatprep.subr.bf16.mxu0 %v5935_v63  ;;  %4335 = vmatprep.subr.bf16.mxu1 %v5953_v22 }
 0x5ec   : > { %4305 = vmatpush1.bf16.msra.mxu0 %v5944_v14  ;;  %4337 = vmatpush1.bf16.msra.mxu1 %v5960_v30 }
 0x5ed   : > { %4307 = vmatprep.subr.bf16.mxu0 %v5947_v17  ;;  %4339 = vmatprep.subr.bf16.mxu1 %v5963_v31 }
 0x5f0   : > { %4309 = vmatpush1.bf16.msra.mxu0 %v5956_v29  ;;  %4341 = vmatpush1.bf16.msra.mxu1 %v5967_v39 }
 0x5f1   : > { %4343 = vmatprep.subr.bf16.mxu0 %v5873_v59  ;;  %4375 = vmatprep.subr.bf16.mxu1 %v5888_v12 }
 0x6a6   : > { %v1570_v28 = vpop.f32.mrb[8].mxu0  ;;  %v1641_v40 = vpop.f32.mrb[8].mxu1 }
 0x6a7   : > { %v1646_v41 = vadd.f32 %v1570_v28, %v1500_v25  ;;  %v1572_v43 = vpop.f32.mrb[9].mxu0  ;;  %v1643_v44 = vpop.f32.mrb[9].mxu1  ;;  %v1648_v54 = vadd.f32 %v1641_v40, %v1502_v53  ;;  %v1681_v25 = vld [vmem:[%s1679_s13 + $0x8] sm:$0xff]  ;;  %v1683_v53 = vld [vmem:[%s1679_s13 + $0x18] sm:$0xff] }
 0x6a8   : > { %v1647_v46 = vadd.f32 %v1572_v43, %v1501_v26  ;;  %v1649_v58 = vadd.f32 %v1643_v44, %v1503_v56 }
 0x6a9   : > { %v3837_v8 = vmul.f32 -1.442695, %v1646_v41  ;;  %v3839_v49 = vmul.f32 -1.442695, %v1648_v54 }
 0x6aa   : > { %v3838_v48 = vmul.f32 -1.442695, %v1647_v46 }
 0x6ab   : > { %5133 = vpow2.f32 %v3837_v8 }
 0x6ac   : > { %5135 = vpow2.f32 %v3838_v48  ;;  %v1682_v48 = vld [vmem:[%s1679_s13 + $0x10] sm:$0xff] }
 0x6ad   : > { %5137 = vtanh.f32 %v1649_v58 }
 0x6ae   : > { %5139 = vpow2.f32 %v3839_v49 }
 0x6b5   : > { %v5134_v60 = vpop.eup %5133 }
 0x6b6   : > { %v1659_v50 = vadd.f32 1.0, %v5134_v60  ;;  %v5136_v0 = vpop.eup %5135 }
 0x6b7   : > { %v1660_v1 = vadd.f32 1.0, %v5136_v0  ;;  %v5138_v2 = vpop.eup %5137 }
 0x6b8   : > { %5141 = vrcp.f32 %v1659_v50  ;;  %v5140_v5 = vpop.eup %5139 }
 0x6b9   : > { %5143 = vrcp.f32 %v1660_v1  ;;  %v1661_v13 = vadd.f32 1.0, %v5140_v5 }
 0x6bb   : > { %5145 = vrcp.f32 %v1661_v13 }
 0x6c2   : > { %v5142_v9 = vpop.eup %5141 }
 0x6c3   : > { %v1670_v10 = vmul.f32 %v5142_v9, %v5138_v2  ;;  %v5144_v11 = vpop.eup %5143 }
 0x6c4   : > { %v1669_v18 = vmul.f32 %v5144_v11, %v6128_v24  ;;  %v1680_v24 = vld [vmem:[%s1679_s13] sm:$0xff] }
 0x6c5   : > { %v5146_v33 = vpop.eup %5145 }
 0x6c6   : > { %v6167_v19 = vadd.f32 %v1670_v10, %v1669_v18 }
 0x6c8   : > { %5147 = vtanh.f32 %v6167_v19 }
 0x6d2   : > { %v5148_v34 = vpop.eup %5147 }
 0x6d3   : > { %v1673_v37 = vmul.f32 %v5148_v34, %v5146_v33 }
 0x6d5   : > { %1749 = vmatmul.mubr.f32.vlgmr.msra.gmra.mrb[10].mxu0 %v1673_v37  ;;  %1820 = vmatmul.mubr.f32.vlgmr.msra.gmra.mrb[10].mxu1 %v1673_v37 }
 0x6d6   : > { %4345 = vmatpush1.bf16.msra.mxu0 %v5877_v52  ;;  %4377 = vmatpush1.bf16.msra.mxu1 %v5890_v15 }
 0x6d7   : > { %4347 = vmatprep.subr.bf16.mxu0 %v5879_v62  ;;  %4379 = vmatprep.subr.bf16.mxu1 %v5900_v23 }
 0x6d8   : > { %1928 = vmatprep.mubr.f32.mxu0 %v5523_v51  ;;  %1999 = vmatprep.mubr.f32.mxu1 %v5523_v51 }
 0x6da   : > { %4349 = vmatpush1.bf16.msra.mxu0 %v5883_v3  ;;  %4381 = vmatpush1.bf16.msra.mxu1 %v5902_v27 }
 0x6db   : > { %4351 = vmatprep.subr.bf16.mxu0 %v5886_v6  ;;  %4383 = vmatprep.subr.bf16.mxu1 %v5908_v35 }
 0x6de   : > { %4353 = vmatpush1.bf16.msra.mxu0 %v5893_v16  ;;  %4385 = vmatpush1.bf16.msra.mxu1 %v5914_v38 }
 0x6df   : > { %4355 = vmatprep.subr.bf16.mxu0 %v5897_v20  ;;  %4387 = vmatprep.subr.bf16.mxu1 %v5917_v42 }
 0x6e2   : > { %4357 = vmatpush1.bf16.msra.mxu0 %v5906_v32  ;;  %4389 = vmatpush1.bf16.msra.mxu1 %v5926_v55 }
 0x6e3   : > { %4359 = vmatprep.subr.bf16.mxu0 %v5911_v36  ;;  %4391 = vmatprep.subr.bf16.mxu1 %v5929_v57 }
 0x6e6   : > { %4361 = vmatpush1.bf16.msra.mxu0 %v5920_v45  ;;  %4393 = vmatpush1.bf16.msra.mxu1 %v5938_v4 }
 0x6e7   : > { %4363 = vmatprep.subr.bf16.mxu0 %v5923_v47  ;;  %4395 = vmatprep.subr.bf16.mxu1 %v5941_v7 }
 0x6ea   : > { %4365 = vmatpush1.bf16.msra.mxu0 %v5932_v61  ;;  %4397 = vmatpush1.bf16.msra.mxu1 %v5950_v21 }
 0x6eb   : > { %4367 = vmatprep.subr.bf16.mxu0 %v5935_v63  ;;  %4399 = vmatprep.subr.bf16.mxu1 %v5953_v22 }
 0x6ee   : > { %4369 = vmatpush1.bf16.msra.mxu0 %v5944_v14  ;;  %4401 = vmatpush1.bf16.msra.mxu1 %v5960_v30 }
 0x6ef   : > { %4371 = vmatprep.subr.bf16.mxu0 %v5947_v17  ;;  %4403 = vmatprep.subr.bf16.mxu1 %v5963_v31 }
 0x6f2   : > { %4373 = vmatpush1.bf16.msra.mxu0 %v5956_v29  ;;  %4405 = vmatpush1.bf16.msra.mxu1 %v5967_v39 }
 0x6f3   : > { %4407 = vmatprep.subr.bf16.mxu0 %v5873_v59  ;;  %4439 = vmatprep.subr.bf16.mxu1 %v5888_v12 }
 0x7a8   : > { %v1750_v26 = vpop.f32.mrb[10].mxu0  ;;  %v1821_v28 = vpop.f32.mrb[10].mxu1 }
 0x7a9   : > { %v1826_v40 = vadd.f32 %v1750_v26, %v1680_v24  ;;  %v1752_v41 = vpop.f32.mrb[11].mxu0  ;;  %v1823_v43 = vpop.f32.mrb[11].mxu1  ;;  %v1828_v59 = vadd.f32 %v1821_v28, %v1682_v48 }
 0x7aa   : > { %v1827_v44 = vadd.f32 %v1752_v41, %v1681_v25  ;;  %v1829_v12 = vadd.f32 %v1823_v43, %v1683_v53  ;;  %v2042_v43 = vld [vmem:[%s2039_s7 + $0x10] sm:$0xff] }
 0x7ab   : > { %v3842_v46 = vmul.f32 -1.442695, %v1826_v40  ;;  %v3844_v54 = vmul.f32 -1.442695, %v1828_v59 }
 0x7ac   : > { %v3843_v8 = vmul.f32 -1.442695, %v1827_v44 }
 0x7ad   : > { %5149 = vpow2.f32 %v3842_v46  ;;  %v2043_v46 = vld [vmem:[%s2039_s7 + $0x18] sm:$0xff] }
 0x7ae   : > { %5151 = vpow2.f32 %v3843_v8 }
 0x7af   : > { %5153 = vtanh.f32 %v1829_v12 }
 0x7b0   : > { %5155 = vpow2.f32 %v3844_v54 }
 0x7b7   : > { %v5150_v56 = vpop.eup %5149 }
 0x7b8   : > { %v1839_v58 = vadd.f32 1.0, %v5150_v56  ;;  %v5152_v49 = vpop.eup %5151 }
 0x7b9   : > { %v1840_v60 = vadd.f32 1.0, %v5152_v49  ;;  %v5154_v50 = vpop.eup %5153 }
 0x7ba   : > { %5157 = vrcp.f32 %v1839_v58  ;;  %v5156_v0 = vpop.eup %5155 }
 0x7bb   : > { %5159 = vrcp.f32 %v1840_v60  ;;  %v1841_v9 = vadd.f32 1.0, %v5156_v0 }
 0x7bd   : > { %5161 = vrcp.f32 %v1841_v9 }
 0x7c4   : > { %v5158_v1 = vpop.eup %5157 }
 0x7c5   : > { %v1850_v2 = vmul.f32 %v5158_v1, %v5154_v50  ;;  %v5160_v5 = vpop.eup %5159 }
 0x7c6   : > { %v1849_v10 = vmul.f32 %v5160_v5, %v6167_v19  ;;  %v2041_v19 = vld [vmem:[%s2039_s7 + $0x8] sm:$0xff] }
 0x7c7   : > { %v5162_v13 = vpop.eup %5161 }
 0x7c8   : > { %v6206_v11 = vadd.f32 %v1850_v2, %v1849_v10 }
 0x7ca   : > { %5163 = vtanh.f32 %v6206_v11 }
 0x7d4   : > { %v5164_v18 = vpop.eup %5163 }
 0x7d5   : > { %v1853_v33 = vmul.f32 %v5164_v18, %v5162_v13  ;;  %v2225_v13 = vld [vmem:[#allocation11 + $0x28] sm:$0xff] (!%p3855_p4)  ;;  %v2220_v18 = vld [vmem:[#allocation11] sm:$0xff] (!%p3855_p4) }
 0x7d7   : > { %1929 = vmatmul.mubr.f32.vlgmr.msra.gmra.mrb[12].mxu0 %v1853_v33  ;;  %2000 = vmatmul.mubr.f32.vlgmr.msra.gmra.mrb[12].mxu1 %v1853_v33 }
 0x7d8   : > { %4409 = vmatpush1.bf16.msra.mxu0 %v5877_v52  ;;  %4441 = vmatpush1.bf16.msra.mxu1 %v5890_v15  ;;  %v1861_v52 = vld [vmem:[%s1859_s29 + $0x8] sm:$0xff] }
 0x7d9   : > { %4411 = vmatprep.subr.bf16.mxu0 %v5879_v62  ;;  %4443 = vmatprep.subr.bf16.mxu1 %v5900_v23 }
 0x7da   : > { %2108 = vmatprep.mubr.f32.mxu0 %v5523_v51  ;;  %2179 = vmatprep.mubr.f32.mxu1 %v5523_v51  ;;  %v1860_v51 = vld [vmem:[%s1859_s29] sm:$0xff] }
 0x7dc   : > { %4413 = vmatpush1.bf16.msra.mxu0 %v5883_v3  ;;  %4445 = vmatpush1.bf16.msra.mxu1 %v5902_v27 }
 0x7dd   : > { %4415 = vmatprep.subr.bf16.mxu0 %v5886_v6  ;;  %4447 = vmatprep.subr.bf16.mxu1 %v5908_v35 }
 0x7e0   : > { %4417 = vmatpush1.bf16.msra.mxu0 %v5893_v16  ;;  %4449 = vmatpush1.bf16.msra.mxu1 %v5914_v38 }
 0x7e1   : > { %4419 = vmatprep.subr.bf16.mxu0 %v5897_v20  ;;  %4451 = vmatprep.subr.bf16.mxu1 %v5917_v42 }
 0x7e4   : > { %4421 = vmatpush1.bf16.msra.mxu0 %v5906_v32  ;;  %4453 = vmatpush1.bf16.msra.mxu1 %v5926_v55  ;;  %v1862_v32 = vld [vmem:[%s1859_s29 + $0x10] sm:$0xff] }
 0x7e5   : > { %4423 = vmatprep.subr.bf16.mxu0 %v5911_v36  ;;  %4455 = vmatprep.subr.bf16.mxu1 %v5929_v57  ;;  %v1863_v36 = vld [vmem:[%s1859_s29 + $0x18] sm:$0xff] }
 0x7e8   : > { %4425 = vmatpush1.bf16.msra.mxu0 %v5920_v45  ;;  %4457 = vmatpush1.bf16.msra.mxu1 %v5938_v4 }
 0x7e9   : > { %4427 = vmatprep.subr.bf16.mxu0 %v5923_v47  ;;  %4459 = vmatprep.subr.bf16.mxu1 %v5941_v7 }
 0x7ec   : > { %4429 = vmatpush1.bf16.msra.mxu0 %v5932_v61  ;;  %4461 = vmatpush1.bf16.msra.mxu1 %v5950_v21 }
 0x7ed   : > { %4431 = vmatprep.subr.bf16.mxu0 %v5935_v63  ;;  %4463 = vmatprep.subr.bf16.mxu1 %v5953_v22 }
 0x7f0   : > { %4433 = vmatpush1.bf16.msra.mxu0 %v5944_v14  ;;  %4465 = vmatpush1.bf16.msra.mxu1 %v5960_v30 }
 0x7f1   : > { %4435 = vmatprep.subr.bf16.mxu0 %v5947_v17  ;;  %4467 = vmatprep.subr.bf16.mxu1 %v5963_v31 }
 0x7f4   : > { %4437 = vmatpush1.bf16.msra.mxu0 %v5956_v29  ;;  %4469 = vmatpush1.bf16.msra.mxu1 %v5967_v39  ;;  %v2040_v39 = vld [vmem:[%s2039_s7] sm:$0xff] }
 0x8aa   : > { %v1930_v62 = vpop.f32.mrb[12].mxu0  ;;  %v2001_v3 = vpop.f32.mrb[12].mxu1 }
 0x8ab   : > { %v2006_v6 = vadd.f32 %v1930_v62, %v1860_v51  ;;  %v1932_v15 = vpop.f32.mrb[13].mxu0  ;;  %v2003_v16 = vpop.f32.mrb[13].mxu1  ;;  %v2008_v35 = vadd.f32 %v2001_v3, %v1862_v32  ;;  %v2224_v51 = vld [vmem:[#allocation11 + $0x20] sm:$0xff] (!%p3855_p4)  ;;  %v2233_v62 = vld [vmem:[#allocation11 + $0x68] sm:$0xff] (!%p3855_p4)  ;;  %v5524_v3 = vmov (!%p3855_p4), 0.0  }
 0x8ac   : > { %v2007_v20 = vadd.f32 %v1932_v15, %v1861_v52  ;;  %v2009_v38 = vadd.f32 %v2003_v16, %v1863_v36  ;;  %v2229_v52 = vld [vmem:[#allocation11 + $0x48] sm:$0xff] (!%p3855_p4)  ;;  %v2228_v16 = vld [vmem:[#allocation11 + $0x40] sm:$0xff] (!%p3855_p4) }
 0x8ad   : > { %v3847_v23 = vmul.f32 -1.442695, %v2006_v6  ;;  %v3849_v42 = vmul.f32 -1.442695, %v2008_v35  ;;  %v6256_v6 = vpack.c.bf16 (!%p3855_p4), %v2224_v51, %v2220_v18  ;;  %v6258_v15 = vpack.c.bf16 (!%p3855_p4), %v2233_v62, %v2229_v52  ;;  %v2236_v35 = vld [vmem:[#allocation11 + $0x80] sm:$0xff] (!%p3855_p4)  ;;  %v2254_v51 = vld [vmem:[#allocation11 + $0x110] sm:$0xff] (!%p3855_p4) }
 0x8ae   : > { %v3848_v27 = vmul.f32 -1.442695, %v2007_v20  ;;  %v2232_v20 = vld [vmem:[#allocation11 + $0x60] sm:$0xff] (!%p3855_p4)  ;;  %v2258_v52 = vld [vmem:[#allocation11 + $0x130] sm:$0xff] (!%p3855_p4)  ;;  %v2263_v62 = vld [vmem:[#allocation11 + $0x158] sm:$0xff] (!%p3855_p4) }
 0x8af   : > { %5165 = vpow2.f32 %v3847_v23  ;;  %v2237_v23 = vld [vmem:[#allocation11 + $0x88] sm:$0xff] (!%p3855_p4)  ;;  %v6262_v32 = vpack.c.bf16 (!%p3855_p4), %v2232_v20, %v2228_v16  ;;  %v2240_v36 = vld [vmem:[#allocation11 + $0xa0] sm:$0xff] (!%p3855_p4)  ;;  %v2267_v16 = vld [vmem:[#allocation11 + $0x178] sm:$0xff] (!%p3855_p4) }
 0x8b0   : > { %5167 = vpow2.f32 %v3848_v27  ;;  %v2241_v27 = vld [vmem:[#allocation11 + $0xa8] sm:$0xff] (!%p3855_p4) }
 0x8b1   : > { %5169 = vtanh.f32 %v2009_v38  ;;  %v6265_v38 = vpack.c.bf16 (!%p3855_p4), %v2241_v27, %v2237_v23  ;;  %v2268_v27 = vld [vmem:[#allocation11 + $0x180] sm:$0xff] (!%p3855_p4) }
 0x8b2   : > { %5171 = vpow2.f32 %v3849_v42  ;;  %v2245_v42 = vld [vmem:[#allocation11 + $0xc8] sm:$0xff] (!%p3855_p4) }
 0x8b9   : > { %v5166_v45 = vpop.eup %5165 }
 0x8ba   : > { %v2019_v47 = vadd.f32 1.0, %v5166_v45  ;;  %v5168_v55 = vpop.eup %5167  ;;  %v2223_v45 = vld [vmem:[#allocation11 + $0x18] sm:$0xff] (!%p3855_p4) }
 0x8bb   : > { %v2020_v57 = vadd.f32 1.0, %v5168_v55  ;;  %v5170_v61 = vpop.eup %5169  ;;  %v2249_v55 = vld [vmem:[#allocation11 + $0xe8] sm:$0xff] (!%p3855_p4) }
 0x8bc   : > { %5173 = vrcp.f32 %v2019_v47  ;;  %v5172_v63 = vpop.eup %5171  ;;  %v2227_v47 = vld [vmem:[#allocation11 + $0x38] sm:$0xff] (!%p3855_p4) }
 0x8bd   : > { %5175 = vrcp.f32 %v2020_v57  ;;  %v2021_v17 = vadd.f32 1.0, %v5172_v63  ;;  %v6267_v57 = vpack.c.bf16 (!%p3855_p4), %v2227_v47, %v2223_v45  ;;  %v2226_v63 = vld [vmem:[#allocation11 + $0x30] sm:$0xff] (!%p3855_p4)  ;;  %v2281_v45 = vld [vmem:[#allocation11 + $0x1e8] sm:$0xff] (!%p3855_p4)  ;;  %v6320_v47 = vpack.c.bf16 (!%p3855_p4), %v2267_v16, %v2263_v62 }
 0x8bf   : > { %5177 = vrcp.f32 %v2021_v17  ;;  %4503 = vmatprep.subr.bf16.mxu1 (!%p3855_p4), %v6267_v57  ;;  %v2235_v17 = vld [vmem:[#allocation11 + $0x78] sm:$0xff] (!%p3855_p4) }
 0x8c6   : > { %v5174_v4 = vpop.eup %5173 }
 0x8c7   : > { %v2030_v7 = vmul.f32 %v5174_v4, %v5170_v61  ;;  %v5176_v14 = vpop.eup %5175  ;;  %v2222_v61 = vld [vmem:[#allocation11 + $0x10] sm:$0xff] (!%p3855_p4) }
 0x8c8   : > { %v2029_v21 = vmul.f32 %v5176_v14, %v6206_v11  ;;  %v2221_v11 = vld [vmem:[#allocation11 + $0x8] sm:$0xff] (!%p3855_p4)  ;;  %v6269_v4 = vpack.c.bf16 (!%p3855_p4), %v2226_v63, %v2222_v61  ;;  %v2231_v14 = vld [vmem:[#allocation11 + $0x58] sm:$0xff] (!%p3855_p4)  ;;  %v2266_v61 = vld [vmem:[#allocation11 + $0x170] sm:$0xff] (!%p3855_p4) }
 0x8c9   : > { %v5178_v29 = vpop.eup %5177  ;;  %v6252_v33 = vpack.c.bf16 (!%p3855_p4), %v2225_v13, %v2221_v11  ;;  %v2273_v13 = vld [vmem:[#allocation11 + $0x1a8] sm:$0xff] (!%p3855_p4)  ;;  %v2271_v63 = vld [vmem:[#allocation11 + $0x198] sm:$0xff] (!%p3855_p4) }
 0x8ca   : > { %v2031_v22 = vadd.f32 %v2030_v7, %v2029_v21  ;;  %v6272_v7 = vpack.c.bf16 (!%p3855_p4), %v2240_v36, %v2236_v35  ;;  %v2230_v21 = vld [vmem:[#allocation11 + $0x50] sm:$0xff] (!%p3855_p4)  ;;  %v2272_v35 = vld [vmem:[#allocation11 + $0x1a0] sm:$0xff] (!%p3855_p4)  ;;  %v2277_v36 = vld [vmem:[#allocation11 + $0x1c8] sm:$0xff] (!%p3855_p4) }
 0x8cb   : > { %4471 = vmatprep.subr.bf16.mxu0 (!%p3855_p4), %v6252_v33 }
 0x8cc   : > { %5179 = vtanh.f32 %v2031_v22 }
 0x8d6   : > { %v5180_v30 = vpop.eup %5179 }
 0x8d7   : > { %v2033_v31 = vmul.f32 %v5180_v30, %v5178_v29  ;;  %v2244_v29 = vld [vmem:[#allocation11 + $0xc0] sm:$0xff] (!%p3855_p4) }
 0x8d8   : > { %v2248_v30 = vld [vmem:[#allocation11 + $0xe0] sm:$0xff] (!%p3855_p4) }
 0x8d9   : > { %2109 = vmatmul.mubr.f32.vlgmr.msra.gmra.mrb[14].mxu0 %v2033_v31  ;;  %2180 = vmatmul.mubr.f32.vlgmr.msra.gmra.mrb[14].mxu1 %v2033_v31  ;;  %v6279_v31 = vpack.c.bf16 (!%p3855_p4), %v2235_v17, %v2231_v14  ;;  %v2275_v14 = vld [vmem:[#allocation11 + $0x1b8] sm:$0xff] (!%p3855_p4)  ;;  %v6323_v17 = vpack.c.bf16 (!%p3855_p4), %v2272_v35, %v2268_v27 }
 0x8da   : > { %2370 = vmatprep.mubr.f32.mxu0 (!%p3855_p4), %v5524_v3  ;;  %2441 = vmatprep.mubr.f32.mxu1 (!%p3855_p4), %v5524_v3 }
 0x8db   : > { %4473 = vmatpush1.bf16.msra.mxu0 (!%p3855_p4), %v6256_v6  ;;  %4505 = vmatpush1.bf16.msra.mxu1 (!%p3855_p4), %v6269_v4 }
 0x8dc   : > { %4475 = vmatprep.subr.bf16.mxu0 (!%p3855_p4), %v6258_v15  ;;  %4507 = vmatprep.subr.bf16.mxu1 (!%p3855_p4), %v6279_v31 }
 0x8df   : > { %4477 = vmatpush1.bf16.msra.mxu0 (!%p3855_p4), %v6262_v32 }
 0x8e0   : > { %4479 = vmatprep.subr.bf16.mxu0 (!%p3855_p4), %v6265_v38 }
 0x8e3   : > { %4481 = vmatpush1.bf16.msra.mxu0 (!%p3855_p4), %v6272_v7 }
 0x9ac   : > { %v2110_v34 = vpop.f32.mrb[14].mxu0  ;;  %v2181_v37 = vpop.f32.mrb[14].mxu1 }
 0x9ad   : > { %v2186_v24 = vadd.f32 %v2110_v34, %v2040_v39  ;;  %v2112_v25 = vpop.f32.mrb[15].mxu0  ;;  %v2183_v26 = vpop.f32.mrb[15].mxu1  ;;  %v2188_v44 = vadd.f32 %v2181_v37, %v2042_v43  ;;  %v2234_v39 = vld [vmem:[#allocation11 + $0x70] sm:$0xff] (!%p3855_p4)  ;;  %v2257_v34 = vld [vmem:[#allocation11 + $0x128] sm:$0xff] (!%p3855_p4)  ;;  %v2256_v43 = vld [vmem:[#allocation11 + $0x120] sm:$0xff] (!%p3855_p4) }
 0x9ae   : > { %v2187_v28 = vadd.f32 %v2112_v25, %v2041_v19  ;;  %v2189_v8 = vadd.f32 %v2183_v26, %v2043_v46  ;;  %v2253_v19 = vld [vmem:[#allocation11 + $0x108] sm:$0xff] (!%p3855_p4)  ;;  %v6281_v37 = vpack.c.bf16 (!%p3855_p4), %v2234_v39, %v2230_v21  ;;  %v2243_v25 = vld [vmem:[#allocation11 + $0xb8] sm:$0xff] (!%p3855_p4)  ;;  %v2238_v26 = vld [vmem:[#allocation11 + $0x90] sm:$0xff] (!%p3855_p4)  ;;  %v6326_v21 = vpack.c.bf16 (!%p3855_p4), %v2281_v45, %v2277_v36 }
 0x9af   : > { %v3852_v40 = vmul.f32 -1.442695, %v2186_v24  ;;  %v3854_v48 = vmul.f32 -1.442695, %v2188_v44  ;;  %v2239_v24 = vld [vmem:[#allocation11 + $0x98] sm:$0xff] (!%p3855_p4)  ;;  %v6290_v46 = vpack.c.bf16 (!%p3855_p4), %v2257_v34, %v2253_v19  ;;  %v6332_v19 = vpack.c.bf16 (!%p3855_p4), %v2275_v14, %v2271_v63  ;;  %v2270_v34 = vld [vmem:[#allocation11 + $0x190] sm:$0xff] (!%p3855_p4) }
 0x9b0   : > { %v3853_v41 = vmul.f32 -1.442695, %v2187_v28  ;;  %v2242_v28 = vld [vmem:[#allocation11 + $0xb0] sm:$0xff] (!%p3855_p4)  ;;  %v6287_v44 = vpack.c.bf16 (!%p3855_p4), %v2243_v25, %v2239_v24  ;;  %4509 = vmatpush1.bf16.msra.mxu1 (!%p3855_p4), %v6281_v37  ;;  %v2279_v25 = vld [vmem:[#allocation11 + $0x1d8] sm:$0xff] (!%p3855_p4) }
 0x9b1   : > { %5181 = vpow2.f32 %v3852_v40  ;;  %v6285_v40 = vpack.c.bf16 (!%p3855_p4), %v2248_v30, %v2244_v29  ;;  %v2276_v29 = vld [vmem:[#allocation11 + $0x1c0] sm:$0xff] (!%p3855_p4)  ;;  %v2274_v24 = vld [vmem:[#allocation11 + $0x1b0] sm:$0xff] (!%p3855_p4) }
 0x9b2   : > { %5183 = vpow2.f32 %v3853_v41  ;;  %v2252_v41 = vld [vmem:[#allocation11 + $0x100] sm:$0xff] (!%p3855_p4)  ;;  %4511 = vmatprep.subr.bf16.mxu1 (!%p3855_p4), %v6287_v44 }
 0x9b3   : > { %5185 = vtanh.f32 %v2189_v8  ;;  %v2261_v8 = vld [vmem:[#allocation11 + $0x148] sm:$0xff] (!%p3855_p4)  ;;  %v2280_v30 = vld [vmem:[#allocation11 + $0x1e0] sm:$0xff] (!%p3855_p4) }
 0x9b4   : > { %5187 = vpow2.f32 %v3854_v48  ;;  %v6293_v48 = vpack.c.bf16 (!%p3855_p4), %v2242_v28, %v2238_v26  ;;  %v2283_v26 = vld [vmem:[#allocation11 + $0x1f8] sm:$0xff] (!%p3855_p4)  ;;  %v6335_v28 = vpack.c.bf16 (!%p3855_p4), %v2280_v30, %v2276_v29 }
 0x9b6   : > { %4513 = vmatpush1.bf16.msra.mxu1 (!%p3855_p4), %v6293_v48 }
 0x9bb   : > { %v5182_v59 = vpop.eup %5181 }
 0x9bc   : > { %v2199_v53 = vadd.f32 1.0, %v5182_v59  ;;  %v5184_v12 = vpop.eup %5183  ;;  %v2247_v59 = vld [vmem:[#allocation11 + $0xd8] sm:$0xff] (!%p3855_p4) }
 0x9bd   : > { %v2200_v54 = vadd.f32 1.0, %v5184_v12  ;;  %v5186_v56 = vpop.eup %5185  ;;  %v2265_v12 = vld [vmem:[#allocation11 + $0x168] sm:$0xff] (!%p3855_p4) }
 0x9be   : > { %5189 = vrcp.f32 %v2199_v53  ;;  %v5188_v58 = vpop.eup %5187  ;;  %v2251_v53 = vld [vmem:[#allocation11 + $0xf8] sm:$0xff] (!%p3855_p4) }
 0x9bf   : > { %5191 = vrcp.f32 %v2200_v54  ;;  %v2201_v0 = vadd.f32 1.0, %v5188_v58  ;;  %v6296_v54 = vpack.c.bf16 (!%p3855_p4), %v2251_v53, %v2247_v59  ;;  %v2250_v58 = vld [vmem:[#allocation11 + $0xf0] sm:$0xff] (!%p3855_p4) }
 0x9c0   : > { %v2282_v59 = vld [vmem:[#allocation11 + $0x1f0] sm:$0xff] (!%p3855_p4) }
 0x9c1   : > { %5193 = vrcp.f32 %v2201_v0  ;;  %v6302_v0 = vpack.c.bf16 (!%p3855_p4), %v2265_v12, %v2261_v8  ;;  %4515 = vmatprep.subr.bf16.mxu1 (!%p3855_p4), %v6296_v54  ;;  %v2278_v8 = vld [vmem:[#allocation11 + $0x1d0] sm:$0xff] (!%p3855_p4) }
 0x9c2   : > { %v6346_v53 = vpack.c.bf16 (!%p3855_p4), %v2282_v59, %v2278_v8 }
 0x9c8   : > { %v5190_v49 = vpop.eup %5189 }
 0x9c9   : > { %v2210_v60 = vmul.f32 %v5190_v49, %v5186_v56  ;;  %v5192_v50 = vpop.eup %5191  ;;  %v2246_v56 = vld [vmem:[#allocation11 + $0xd0] sm:$0xff] (!%p3855_p4)  ;;  %v6299_v49 = vpack.c.bf16 (!%p3855_p4), %v2256_v43, %v2252_v41  ;;  %v6339_v41 = vpack.c.bf16 (!%p3855_p4), %v2274_v24, %v2270_v34  ;;  %v6342_v43 = vpack.c.bf16 (!%p3855_p4), %v2283_v26, %v2279_v25 }
 0x9ca   : > { %v2209_v1 = vmul.f32 %v5192_v50, %v2031_v22  ;;  %v6276_v22 = vpack.c.bf16 (!%p3855_p4), %v2249_v55, %v2245_v42  ;;  %v2259_v50 = vld [vmem:[#allocation11 + $0x138] sm:$0xff] (!%p3855_p4)  ;;  %v6305_v11 = vpack.c.bf16 (!%p3855_p4), %v2250_v58, %v2246_v56  ;;  %v6317_v42 = vpack.c.bf16 (!%p3855_p4), %v2258_v52, %v2254_v51  ;;  %v2262_v55 = vld [vmem:[#allocation11 + $0x150] sm:$0xff] (!%p3855_p4) }
 0x9cb   : > { %v5194_v5 = vpop.eup %5193  ;;  %v6329_v39 = vpack.c.bf16 (!%p3855_p4), %v2266_v61, %v2262_v55  ;;  %v2284_v58 = vld [vmem:[%s6699_s5] sm:$0xf] (!%p3855_p4) }
 0x9cc   : > { %v6244_v2 = vadd.f32 %v2210_v60, %v2209_v1  ;;  %4483 = vmatprep.subr.bf16.mxu0 (!%p3855_p4), %v6276_v22  ;;  %v2255_v60 = vld [vmem:[#allocation11 + $0x118] sm:$0xff] (!%p3855_p4)  ;;  %v2260_v1 = vld [vmem:[#allocation11 + $0x140] sm:$0xff] (!%p3855_p4)  ;;  %4517 = vmatpush1.bf16.msra.mxu1 (!%p3855_p4), %v6305_v11 }
 0x9cd   : > { %4485 = vmatpush1.bf16.msra.mxu0 (!%p3855_p4), %v6285_v40  ;;  %v6308_v18 = vpack.c.bf16 (!%p3855_p4), %v2259_v50, %v2255_v60 }
 0x9ce   : > { %5195 = vtanh.f32 %v6244_v2  ;;  %2215 = vst [vmem:[#allocation3] sm:$0xff] %v6244_v2  ;;  %4487 = vmatprep.subr.bf16.mxu0 (!%p3855_p4), %v6290_v46 }
 0x9cf   : > { %4519 = vmatprep.subr.bf16.mxu1 (!%p3855_p4), %v6308_v18 }
 0x9d0   : > { %4521 = vmatpush1.bf16.msra.mxu1 (!%p3855_p4), %v6317_v42 }
 0x9d1   : > { %4489 = vmatpush1.bf16.msra.mxu0 (!%p3855_p4), %v6299_v49  ;;  %4523 = vmatprep.subr.bf16.mxu1 (!%p3855_p4), %v6320_v47 }
 0x9d2   : > { %4491 = vmatprep.subr.bf16.mxu0 (!%p3855_p4), %v6302_v0 }
 0x9d4   : > { %4525 = vmatpush1.bf16.msra.mxu1 (!%p3855_p4), %v6329_v39 }
 0x9d5   : > { %2219 = sbr.rel (%p3855_p4) target bundleno = 4600 (0x11f8), region = 76  ;;  %4527 = vmatprep.subr.bf16.mxu1 (!%p3855_p4), %v6332_v19 }
 0x9d8   : > { %v5196_v9 = vpop.eup %5195  ;;  %4529 = vmatpush1.bf16.msra.mxu1 (!%p3855_p4), %v6339_v41 }
 0x9d9   : > { %v6248_v10 = vmul.f32 %v5196_v9, %v5194_v5  ;;  %v2264_v5 = vld [vmem:[#allocation11 + $0x160] sm:$0xff] (!%p3855_p4)  ;;  %v2269_v9 = vld [vmem:[#allocation11 + $0x188] sm:$0xff] (!%p3855_p4)  ;;  %4531 = vmatprep.subr.bf16.mxu1 (!%p3855_p4), %v6342_v43 }
 0x9da   : > { %v6311_v20 = vpack.c.bf16 (!%p3855_p4), %v2264_v5, %v2260_v1  ;;  %v6314_v23 = vpack.c.bf16 (!%p3855_p4), %v2273_v13, %v2269_v9 }
 0x9db   : > { %2214 = vst [vmem:[#allocation2] sm:$0xff] %v6248_v10 }
 0x9dc   : > { %4493 = vmatpush1.bf16.msra.mxu0 %v6311_v20  ;;  %4533 = vmatpush1.bf16.msra.mxu1 %v6346_v53 }
 0x9dd   : > { %4495 = vmatprep.subr.bf16.mxu0 %v6314_v23  ;;  %4567 = vmatprep.subr.bf16.mxu1 %v6267_v57 }
 0x9df   : > { %2442 = vmatmul.mubr.f32.vlgmr.msra.gmra.mrb[0].mxu1 %v6248_v10 }
 0x9e0   : > { %4497 = vmatpush1.bf16.msra.mxu0 %v6323_v17  ;;  %4569 = vmatpush1.bf16.msra.mxu1 %v6269_v4 }
 0x9e1   : > { %4499 = vmatprep.subr.bf16.mxu0 %v6326_v21  ;;  %4571 = vmatprep.subr.bf16.mxu1 %v6279_v31 }
 0x9e2   : > { %2612 = vmatprep.mubr.f32.mxu1 %v5524_v3 }
 0x9e4   : > { %4501 = vmatpush1.bf16.msra.mxu0 %v6335_v28  ;;  %4573 = vmatpush1.bf16.msra.mxu1 %v6281_v37 }
 0x9e5   : > { %4535 = vmatprep.subr.bf16.mxu0 %v6252_v33  ;;  %4575 = vmatprep.subr.bf16.mxu1 %v6287_v44 }
 0x9e7   : > { %2371 = vmatmul.mubr.f32.vlgmr.msra.gmra.mrb[0].mxu0 %v6248_v10  ;;  %v2286_v10 = vlaneseq }
 0x9e8   : > { %4537 = vmatpush1.bf16.msra.mxu0 %v6256_v6  ;;  %2541 = vmatprep.mubr.f32.mxu0 %v5524_v3 }
 0x9e9   : > { %4539 = vmatprep.subr.bf16.mxu0 %v6258_v15  ;;  %4577 = vmatpush1.bf16.msra.mxu1 %v6293_v48  ;;  %v2287_v12 = vshrl.u32 %v2286_v10, 7 }
 0x9ea   : > { %4579 = vmatprep.subr.bf16.mxu1 %v6296_v54 }
 0x9eb   : > { %v2288_v56 = vsub.s32 0, %v2287_v12  ;;  %v2292_v60 = vsub.s32 1, %v2287_v12  ;;  %v2296_v5 = vsub.s32 2, %v2287_v12  ;;  %v2300_v35 = vsub.s32 3, %v2287_v12 }
 0x9ec   : > { %4541 = vmatpush1.bf16.msra.mxu0 %v6262_v32 }
 0x9ed   : > { %4543 = vmatprep.subr.bf16.mxu0 %v6265_v38  ;;  %4581 = vmatpush1.bf16.msra.mxu1 %v6305_v11  ;;  %v6391_v50 = vrot.slane %v2284_v58, %v2288_v56  ;;  %v6393_v1 = vrot.slane %v2284_v58, %v2292_v60  ;;  %v6397_v16 = vrot.slane %v2284_v58, %v2296_v5 }
 0x9ee   : > { %4583 = vmatprep.subr.bf16.mxu1 %v6308_v18  ;;  %v6400_v61 = vrot.slane %v2284_v58, %v2300_v35 }
 0x9f0   : > { %4545 = vmatpush1.bf16.msra.mxu0 %v6272_v7 }
 0x9f1   : > { %4547 = vmatprep.subr.bf16.mxu0 %v6276_v22  ;;  %4585 = vmatpush1.bf16.msra.mxu1 %v6317_v42 }
 0x9f2   : > { %4587 = vmatprep.subr.bf16.mxu1 %v6320_v47 }
 0x9f4   : > { %4549 = vmatpush1.bf16.msra.mxu0 %v6285_v40 }
 0x9f5   : > { %4551 = vmatprep.subr.bf16.mxu0 %v6290_v46  ;;  %4589 = vmatpush1.bf16.msra.mxu1 %v6329_v39 }
 0x9f6   : > { %4591 = vmatprep.subr.bf16.mxu1 %v6332_v19 }
 0x9f8   : > { %4553 = vmatpush1.bf16.msra.mxu0 %v6299_v49 }
 0x9f9   : > { %4555 = vmatprep.subr.bf16.mxu0 %v6302_v0  ;;  %4593 = vmatpush1.bf16.msra.mxu1 %v6339_v41 }
 0x9fa   : > { %4595 = vmatprep.subr.bf16.mxu1 %v6342_v43 }
 0x9fc   : > { %4557 = vmatpush1.bf16.msra.mxu0 %v6311_v20 }
 0x9fd   : > { %4559 = vmatprep.subr.bf16.mxu0 %v6314_v23  ;;  %4597 = vmatpush1.bf16.msra.mxu1 %v6346_v53 }
 0x9fe   : > { %4631 = vmatprep.subr.bf16.mxu1 %v6267_v57 }
 0xa00   : > { %4561 = vmatpush1.bf16.msra.mxu0 %v6323_v17 }
 0xa01   : > { %4563 = vmatprep.subr.bf16.mxu0 %v6326_v21 }
 0xa04   : > { %4565 = vmatpush1.bf16.msra.mxu0 %v6335_v28 }
 0xa05   : > { %4599 = vmatprep.subr.bf16.mxu0 %v6252_v33 }
 0xab2   : > { %v2443_v36 = vpop.f32.mrb[0].mxu1 }
 0xab3   : > { %v2445_v45 = vpop.f32.mrb[1].mxu1  ;;  %v2450_v55 = vadd.f32 %v2443_v36, %v6397_v16 }
 0xab4   : > { %v2451_v14 = vadd.f32 %v2445_v45, %v6400_v61 }
 0xab5   : > { %v3858_v63 = vmul.f32 -1.442695, %v2450_v55 }
 0xaba   : > { %v2372_v9 = vpop.f32.mrb[0].mxu0 }
 0xabb   : > { %v2448_v13 = vadd.f32 %v2372_v9, %v6391_v50  ;;  %v2374_v51 = vpop.f32.mrb[1].mxu0 }
 0xabc   : > { %v2449_v52 = vadd.f32 %v2374_v51, %v6393_v1 }
 0xabd   : > { %v3856_v62 = vmul.f32 -1.442695, %v2448_v13 }
 0xabe   : > { %v3857_v27 = vmul.f32 -1.442695, %v2449_v52 }
 0xabf   : > { %5197 = vpow2.f32 %v3856_v62 }
 0xac0   : > { %5199 = vpow2.f32 %v3857_v27 }
 0xac1   : > { %5201 = vpow2.f32 %v3858_v63 }
 0xac2   : > { %5203 = vtanh.f32 %v2451_v14 }
 0xac9   : > { %v5198_v29 = vpop.eup %5197 }
 0xaca   : > { %v5200_v30 = vpop.eup %5199  ;;  %v2461_v34 = vadd.f32 1.0, %v5198_v29 }
 0xacb   : > { %v2462_v24 = vadd.f32 1.0, %v5200_v30  ;;  %v5202_v25 = vpop.eup %5201 }
 0xacc   : > { %5205 = vrcp.f32 %v2461_v34  ;;  %v5204_v26 = vpop.eup %5203  ;;  %v2463_v59 = vadd.f32 1.0, %v5202_v25 }
 0xacd   : > { %5207 = vrcp.f32 %v2462_v24 }
 0xace   : > { %5209 = vrcp.f32 %v2463_v59 }
 0xad6   : > { %v5206_v8 = vpop.eup %5205 }
 0xad7   : > { %v5208_v10 = vpop.eup %5207  ;;  %v2472_v12 = vmul.f32 %v5206_v8, %v5204_v26 }
 0xad8   : > { %v2471_v56 = vmul.f32 %v5208_v10, %v6244_v2  ;;  %v5210_v60 = vpop.eup %5209 }
 0xada   : > { %v6404_v58 = vadd.f32 %v2472_v12, %v2471_v56 }
 0xadc   : > { %5211 = vtanh.f32 %v6404_v58 }
 0xae6   : > { %v5212_v5 = vpop.eup %5211 }
 0xae7   : > { %v2475_v9 = vmul.f32 %v5212_v5, %v5210_v60 }
 0xae9   : > { %2476 = vst [vmem:[#allocation13] sm:$0xff] %v2475_v9  ;;  %2542 = vmatmul.mubr.f32.vlgmr.msra.gmra.mrb[2].mxu0 %v2475_v9  ;;  %2613 = vmatmul.mubr.f32.vlgmr.msra.gmra.mrb[2].mxu1 %v2475_v9 }
 0xaea   : > { %4601 = vmatpush1.bf16.msra.mxu0 %v6256_v6  ;;  %4633 = vmatpush1.bf16.msra.mxu1 %v6269_v4 }
 0xaeb   : > { %4603 = vmatprep.subr.bf16.mxu0 %v6258_v15  ;;  %4635 = vmatprep.subr.bf16.mxu1 %v6279_v31 }
 0xaec   : > { %2713 = vmatprep.mubr.f32.mxu0 %v5524_v3  ;;  %2784 = vmatprep.mubr.f32.mxu1 %v5524_v3 }
 0xaee   : > { %4605 = vmatpush1.bf16.msra.mxu0 %v6262_v32  ;;  %4637 = vmatpush1.bf16.msra.mxu1 %v6281_v37 }
 0xaef   : > { %4607 = vmatprep.subr.bf16.mxu0 %v6265_v38  ;;  %4639 = vmatprep.subr.bf16.mxu1 %v6287_v44 }
 0xaf2   : > { %4609 = vmatpush1.bf16.msra.mxu0 %v6272_v7  ;;  %4641 = vmatpush1.bf16.msra.mxu1 %v6293_v48 }
 0xaf3   : > { %4611 = vmatprep.subr.bf16.mxu0 %v6276_v22  ;;  %4643 = vmatprep.subr.bf16.mxu1 %v6296_v54 }
 0xaf6   : > { %4613 = vmatpush1.bf16.msra.mxu0 %v6285_v40  ;;  %4645 = vmatpush1.bf16.msra.mxu1 %v6305_v11 }
 0xaf7   : > { %4615 = vmatprep.subr.bf16.mxu0 %v6290_v46  ;;  %4647 = vmatprep.subr.bf16.mxu1 %v6308_v18 }
 0xafa   : > { %4617 = vmatpush1.bf16.msra.mxu0 %v6299_v49  ;;  %4649 = vmatpush1.bf16.msra.mxu1 %v6317_v42 }
 0xafb   : > { %4619 = vmatprep.subr.bf16.mxu0 %v6302_v0  ;;  %4651 = vmatprep.subr.bf16.mxu1 %v6320_v47 }
 0xafe   : > { %4621 = vmatpush1.bf16.msra.mxu0 %v6311_v20  ;;  %4653 = vmatpush1.bf16.msra.mxu1 %v6329_v39 }
 0xaff   : > { %4623 = vmatprep.subr.bf16.mxu0 %v6314_v23  ;;  %4655 = vmatprep.subr.bf16.mxu1 %v6332_v19 }
 0xb02   : > { %4625 = vmatpush1.bf16.msra.mxu0 %v6323_v17  ;;  %4657 = vmatpush1.bf16.msra.mxu1 %v6339_v41 }
 0xb03   : > { %4627 = vmatprep.subr.bf16.mxu0 %v6326_v21  ;;  %4659 = vmatprep.subr.bf16.mxu1 %v6342_v43 }
 0xb06   : > { %4629 = vmatpush1.bf16.msra.mxu0 %v6335_v28  ;;  %4661 = vmatpush1.bf16.msra.mxu1 %v6346_v53 }
 0xb07   : > { %4663 = vmatprep.subr.bf16.mxu0 %v6252_v33  ;;  %4695 = vmatprep.subr.bf16.mxu1 %v6267_v57 }
 0xbbc   : > { %v2543_v2 = vpop.f32.mrb[2].mxu0  ;;  %v2614_v13 = vpop.f32.mrb[2].mxu1 }
 0xbbd   : > { %v2619_v51 = vadd.f32 %v2543_v2, %v6391_v50  ;;  %v2545_v52 = vpop.f32.mrb[3].mxu0  ;;  %v2616_v62 = vpop.f32.mrb[3].mxu1  ;;  %v2621_v45 = vadd.f32 %v2614_v13, %v6397_v16 }
 0xbbe   : > { %v2620_v27 = vadd.f32 %v2545_v52, %v6393_v1  ;;  %v2622_v55 = vadd.f32 %v2616_v62, %v6400_v61 }
 0xbbf   : > { %v3859_v35 = vmul.f32 -1.442695, %v2619_v51  ;;  %v3861_v63 = vmul.f32 -1.442695, %v2621_v45 }
 0xbc0   : > { %v3860_v36 = vmul.f32 -1.442695, %v2620_v27 }
 0xbc1   : > { %5213 = vpow2.f32 %v3859_v35 }
 0xbc2   : > { %5215 = vpow2.f32 %v3860_v36 }
 0xbc3   : > { %5217 = vtanh.f32 %v2622_v55 }
 0xbc4   : > { %5219 = vpow2.f32 %v3861_v63 }
 0xbcb   : > { %v5214_v14 = vpop.eup %5213 }
 0xbcc   : > { %v2632_v29 = vadd.f32 1.0, %v5214_v14  ;;  %v5216_v30 = vpop.eup %5215 }
 0xbcd   : > { %v2633_v34 = vadd.f32 1.0, %v5216_v30  ;;  %v5218_v24 = vpop.eup %5217 }
 0xbce   : > { %5221 = vrcp.f32 %v2632_v29  ;;  %v5220_v25 = vpop.eup %5219 }
 0xbcf   : > { %5223 = vrcp.f32 %v2633_v34  ;;  %v2634_v10 = vadd.f32 1.0, %v5220_v25 }
 0xbd1   : > { %5225 = vrcp.f32 %v2634_v10 }
 0xbd8   : > { %v5222_v26 = vpop.eup %5221 }
 0xbd9   : > { %v2643_v8 = vmul.f32 %v5222_v26, %v5218_v24  ;;  %v5224_v59 = vpop.eup %5223 }
 0xbda   : > { %v2642_v12 = vmul.f32 %v5224_v59, %v6404_v58 }
 0xbdb   : > { %v5226_v60 = vpop.eup %5225 }
 0xbdc   : > { %v6446_v56 = vadd.f32 %v2643_v8, %v2642_v12 }
 0xbde   : > { %5227 = vtanh.f32 %v6446_v56 }
 0xbe8   : > { %v5228_v5 = vpop.eup %5227 }
 0xbe9   : > { %v2646_v9 = vmul.f32 %v5228_v5, %v5226_v60 }
 0xbeb   : > { %2648 = vst [vmem:[#allocation13 + $0x8] sm:$0xff] %v2646_v9  ;;  %2714 = vmatmul.mubr.f32.vlgmr.msra.gmra.mrb[4].mxu0 %v2646_v9  ;;  %2785 = vmatmul.mubr.f32.vlgmr.msra.gmra.mrb[4].mxu1 %v2646_v9 }
 0xbec   : > { %4665 = vmatpush1.bf16.msra.mxu0 %v6256_v6  ;;  %4697 = vmatpush1.bf16.msra.mxu1 %v6269_v4 }
 0xbed   : > { %4667 = vmatprep.subr.bf16.mxu0 %v6258_v15  ;;  %4699 = vmatprep.subr.bf16.mxu1 %v6279_v31 }
 0xbee   : > { %2885 = vmatprep.mubr.f32.mxu0 %v5524_v3  ;;  %2956 = vmatprep.mubr.f32.mxu1 %v5524_v3 }
 0xbf0   : > { %4669 = vmatpush1.bf16.msra.mxu0 %v6262_v32  ;;  %4701 = vmatpush1.bf16.msra.mxu1 %v6281_v37 }
 0xbf1   : > { %4671 = vmatprep.subr.bf16.mxu0 %v6265_v38  ;;  %4703 = vmatprep.subr.bf16.mxu1 %v6287_v44 }
 0xbf4   : > { %4673 = vmatpush1.bf16.msra.mxu0 %v6272_v7  ;;  %4705 = vmatpush1.bf16.msra.mxu1 %v6293_v48 }
 0xbf5   : > { %4675 = vmatprep.subr.bf16.mxu0 %v6276_v22  ;;  %4707 = vmatprep.subr.bf16.mxu1 %v6296_v54 }
 0xbf8   : > { %4677 = vmatpush1.bf16.msra.mxu0 %v6285_v40  ;;  %4709 = vmatpush1.bf16.msra.mxu1 %v6305_v11 }
 0xbf9   : > { %4679 = vmatprep.subr.bf16.mxu0 %v6290_v46  ;;  %4711 = vmatprep.subr.bf16.mxu1 %v6308_v18 }
 0xbfc   : > { %4681 = vmatpush1.bf16.msra.mxu0 %v6299_v49  ;;  %4713 = vmatpush1.bf16.msra.mxu1 %v6317_v42 }
 0xbfd   : > { %4683 = vmatprep.subr.bf16.mxu0 %v6302_v0  ;;  %4715 = vmatprep.subr.bf16.mxu1 %v6320_v47 }
 0xc00   : > { %4685 = vmatpush1.bf16.msra.mxu0 %v6311_v20  ;;  %4717 = vmatpush1.bf16.msra.mxu1 %v6329_v39 }
 0xc01   : > { %4687 = vmatprep.subr.bf16.mxu0 %v6314_v23  ;;  %4719 = vmatprep.subr.bf16.mxu1 %v6332_v19 }
 0xc04   : > { %4689 = vmatpush1.bf16.msra.mxu0 %v6323_v17  ;;  %4721 = vmatpush1.bf16.msra.mxu1 %v6339_v41 }
 0xc05   : > { %4691 = vmatprep.subr.bf16.mxu0 %v6326_v21  ;;  %4723 = vmatprep.subr.bf16.mxu1 %v6342_v43 }
 0xc08   : > { %4693 = vmatpush1.bf16.msra.mxu0 %v6335_v28  ;;  %4725 = vmatpush1.bf16.msra.mxu1 %v6346_v53 }
 0xc09   : > { %4727 = vmatprep.subr.bf16.mxu0 %v6252_v33  ;;  %4759 = vmatprep.subr.bf16.mxu1 %v6267_v57 }
 0xcbe   : > { %v2715_v58 = vpop.f32.mrb[4].mxu0  ;;  %v2786_v2 = vpop.f32.mrb[4].mxu1 }
 0xcbf   : > { %v2791_v13 = vadd.f32 %v2715_v58, %v6391_v50  ;;  %v2717_v51 = vpop.f32.mrb[5].mxu0  ;;  %v2788_v52 = vpop.f32.mrb[5].mxu1  ;;  %v2793_v36 = vadd.f32 %v2786_v2, %v6397_v16 }
 0xcc0   : > { %v2792_v62 = vadd.f32 %v2717_v51, %v6393_v1  ;;  %v2794_v45 = vadd.f32 %v2788_v52, %v6400_v61 }
 0xcc1   : > { %v3862_v27 = vmul.f32 -1.442695, %v2791_v13  ;;  %v3864_v55 = vmul.f32 -1.442695, %v2793_v36 }
 0xcc2   : > { %v3863_v35 = vmul.f32 -1.442695, %v2792_v62 }
 0xcc3   : > { %5229 = vpow2.f32 %v3862_v27 }
 0xcc4   : > { %5231 = vpow2.f32 %v3863_v35 }
 0xcc5   : > { %5233 = vtanh.f32 %v2794_v45 }
 0xcc6   : > { %5235 = vpow2.f32 %v3864_v55 }
 0xccd   : > { %v5230_v63 = vpop.eup %5229 }
 0xcce   : > { %v2804_v14 = vadd.f32 1.0, %v5230_v63  ;;  %v5232_v29 = vpop.eup %5231 }
 0xccf   : > { %v2805_v30 = vadd.f32 1.0, %v5232_v29  ;;  %v5234_v34 = vpop.eup %5233 }
 0xcd0   : > { %5237 = vrcp.f32 %v2804_v14  ;;  %v5236_v24 = vpop.eup %5235 }
 0xcd1   : > { %5239 = vrcp.f32 %v2805_v30  ;;  %v2806_v59 = vadd.f32 1.0, %v5236_v24 }
 0xcd3   : > { %5241 = vrcp.f32 %v2806_v59 }
 0xcda   : > { %v5238_v25 = vpop.eup %5237 }
 0xcdb   : > { %v2815_v26 = vmul.f32 %v5238_v25, %v5234_v34  ;;  %v5240_v8 = vpop.eup %5239 }
 0xcdc   : > { %v2814_v10 = vmul.f32 %v5240_v8, %v6446_v56 }
 0xcdd   : > { %v5242_v60 = vpop.eup %5241 }
 0xcde   : > { %v6488_v12 = vadd.f32 %v2815_v26, %v2814_v10 }
 0xce0   : > { %5243 = vtanh.f32 %v6488_v12 }
 0xcea   : > { %v5244_v5 = vpop.eup %5243 }
 0xceb   : > { %v2818_v9 = vmul.f32 %v5244_v5, %v5242_v60 }
 0xced   : > { %2820 = vst [vmem:[#allocation13 + $0x10] sm:$0xff] %v2818_v9  ;;  %2886 = vmatmul.mubr.f32.vlgmr.msra.gmra.mrb[6].mxu0 %v2818_v9  ;;  %2957 = vmatmul.mubr.f32.vlgmr.msra.gmra.mrb[6].mxu1 %v2818_v9 }
 0xcee   : > { %4729 = vmatpush1.bf16.msra.mxu0 %v6256_v6  ;;  %4761 = vmatpush1.bf16.msra.mxu1 %v6269_v4 }
 0xcef   : > { %4731 = vmatprep.subr.bf16.mxu0 %v6258_v15  ;;  %4763 = vmatprep.subr.bf16.mxu1 %v6279_v31 }
 0xcf0   : > { %3057 = vmatprep.mubr.f32.mxu0 %v5524_v3  ;;  %3128 = vmatprep.mubr.f32.mxu1 %v5524_v3 }
 0xcf2   : > { %4733 = vmatpush1.bf16.msra.mxu0 %v6262_v32  ;;  %4765 = vmatpush1.bf16.msra.mxu1 %v6281_v37 }
 0xcf3   : > { %4735 = vmatprep.subr.bf16.mxu0 %v6265_v38  ;;  %4767 = vmatprep.subr.bf16.mxu1 %v6287_v44 }
 0xcf6   : > { %4737 = vmatpush1.bf16.msra.mxu0 %v6272_v7  ;;  %4769 = vmatpush1.bf16.msra.mxu1 %v6293_v48 }
 0xcf7   : > { %4739 = vmatprep.subr.bf16.mxu0 %v6276_v22  ;;  %4771 = vmatprep.subr.bf16.mxu1 %v6296_v54 }
 0xcfa   : > { %4741 = vmatpush1.bf16.msra.mxu0 %v6285_v40  ;;  %4773 = vmatpush1.bf16.msra.mxu1 %v6305_v11 }
 0xcfb   : > { %4743 = vmatprep.subr.bf16.mxu0 %v6290_v46  ;;  %4775 = vmatprep.subr.bf16.mxu1 %v6308_v18 }
 0xcfe   : > { %4745 = vmatpush1.bf16.msra.mxu0 %v6299_v49  ;;  %4777 = vmatpush1.bf16.msra.mxu1 %v6317_v42 }
 0xcff   : > { %4747 = vmatprep.subr.bf16.mxu0 %v6302_v0  ;;  %4779 = vmatprep.subr.bf16.mxu1 %v6320_v47 }
 0xd02   : > { %4749 = vmatpush1.bf16.msra.mxu0 %v6311_v20  ;;  %4781 = vmatpush1.bf16.msra.mxu1 %v6329_v39 }
 0xd03   : > { %4751 = vmatprep.subr.bf16.mxu0 %v6314_v23  ;;  %4783 = vmatprep.subr.bf16.mxu1 %v6332_v19 }
 0xd06   : > { %4753 = vmatpush1.bf16.msra.mxu0 %v6323_v17  ;;  %4785 = vmatpush1.bf16.msra.mxu1 %v6339_v41 }
 0xd07   : > { %4755 = vmatprep.subr.bf16.mxu0 %v6326_v21  ;;  %4787 = vmatprep.subr.bf16.mxu1 %v6342_v43 }
 0xd0a   : > { %4757 = vmatpush1.bf16.msra.mxu0 %v6335_v28  ;;  %4789 = vmatpush1.bf16.msra.mxu1 %v6346_v53 }
 0xd0b   : > { %4791 = vmatprep.subr.bf16.mxu0 %v6252_v33  ;;  %4823 = vmatprep.subr.bf16.mxu1 %v6267_v57 }
 0xdc0   : > { %v2887_v56 = vpop.f32.mrb[6].mxu0  ;;  %v2958_v58 = vpop.f32.mrb[6].mxu1 }
 0xdc1   : > { %v2963_v2 = vadd.f32 %v2887_v56, %v6391_v50  ;;  %v2889_v13 = vpop.f32.mrb[7].mxu0  ;;  %v2960_v51 = vpop.f32.mrb[7].mxu1  ;;  %v2965_v35 = vadd.f32 %v2958_v58, %v6397_v16 }
 0xdc2   : > { %v2964_v52 = vadd.f32 %v2889_v13, %v6393_v1  ;;  %v2966_v36 = vadd.f32 %v2960_v51, %v6400_v61 }
 0xdc3   : > { %v3865_v62 = vmul.f32 -1.442695, %v2963_v2  ;;  %v3867_v45 = vmul.f32 -1.442695, %v2965_v35 }
 0xdc4   : > { %v3866_v27 = vmul.f32 -1.442695, %v2964_v52 }
 0xdc5   : > { %5245 = vpow2.f32 %v3865_v62 }
 0xdc6   : > { %5247 = vpow2.f32 %v3866_v27 }
 0xdc7   : > { %5249 = vtanh.f32 %v2966_v36 }
 0xdc8   : > { %5251 = vpow2.f32 %v3867_v45 }
 0xdcf   : > { %v5246_v55 = vpop.eup %5245 }
 0xdd0   : > { %v2976_v63 = vadd.f32 1.0, %v5246_v55  ;;  %v5248_v14 = vpop.eup %5247 }
 0xdd1   : > { %v2977_v29 = vadd.f32 1.0, %v5248_v14  ;;  %v5250_v30 = vpop.eup %5249 }
 0xdd2   : > { %5253 = vrcp.f32 %v2976_v63  ;;  %v5252_v34 = vpop.eup %5251 }
 0xdd3   : > { %5255 = vrcp.f32 %v2977_v29  ;;  %v2978_v8 = vadd.f32 1.0, %v5252_v34 }
 0xdd5   : > { %5257 = vrcp.f32 %v2978_v8 }
 0xddc   : > { %v5254_v24 = vpop.eup %5253 }
 0xddd   : > { %v2987_v25 = vmul.f32 %v5254_v24, %v5250_v30  ;;  %v5256_v26 = vpop.eup %5255 }
 0xdde   : > { %v2986_v59 = vmul.f32 %v5256_v26, %v6488_v12 }
 0xddf   : > { %v5258_v60 = vpop.eup %5257 }
 0xde0   : > { %v6530_v10 = vadd.f32 %v2987_v25, %v2986_v59 }
 0xde2   : > { %5259 = vtanh.f32 %v6530_v10 }
 0xdec   : > { %v5260_v5 = vpop.eup %5259 }
 0xded   : > { %v2990_v9 = vmul.f32 %v5260_v5, %v5258_v60 }
 0xdef   : > { %2992 = vst [vmem:[#allocation13 + $0x18] sm:$0xff] %v2990_v9  ;;  %3058 = vmatmul.mubr.f32.vlgmr.msra.gmra.mrb[8].mxu0 %v2990_v9  ;;  %3129 = vmatmul.mubr.f32.vlgmr.msra.gmra.mrb[8].mxu1 %v2990_v9 }
 0xdf0   : > { %4793 = vmatpush1.bf16.msra.mxu0 %v6256_v6  ;;  %4825 = vmatpush1.bf16.msra.mxu1 %v6269_v4 }
 0xdf1   : > { %4795 = vmatprep.subr.bf16.mxu0 %v6258_v15  ;;  %4827 = vmatprep.subr.bf16.mxu1 %v6279_v31 }
 0xdf2   : > { %3229 = vmatprep.mubr.f32.mxu0 %v5524_v3  ;;  %3300 = vmatprep.mubr.f32.mxu1 %v5524_v3 }
 0xdf4   : > { %4797 = vmatpush1.bf16.msra.mxu0 %v6262_v32  ;;  %4829 = vmatpush1.bf16.msra.mxu1 %v6281_v37 }
 0xdf5   : > { %4799 = vmatprep.subr.bf16.mxu0 %v6265_v38  ;;  %4831 = vmatprep.subr.bf16.mxu1 %v6287_v44 }
 0xdf8   : > { %4801 = vmatpush1.bf16.msra.mxu0 %v6272_v7  ;;  %4833 = vmatpush1.bf16.msra.mxu1 %v6293_v48 }
 0xdf9   : > { %4803 = vmatprep.subr.bf16.mxu0 %v6276_v22  ;;  %4835 = vmatprep.subr.bf16.mxu1 %v6296_v54 }
 0xdfc   : > { %4805 = vmatpush1.bf16.msra.mxu0 %v6285_v40  ;;  %4837 = vmatpush1.bf16.msra.mxu1 %v6305_v11 }
 0xdfd   : > { %4807 = vmatprep.subr.bf16.mxu0 %v6290_v46  ;;  %4839 = vmatprep.subr.bf16.mxu1 %v6308_v18 }
 0xe00   : > { %4809 = vmatpush1.bf16.msra.mxu0 %v6299_v49  ;;  %4841 = vmatpush1.bf16.msra.mxu1 %v6317_v42 }
 0xe01   : > { %4811 = vmatprep.subr.bf16.mxu0 %v6302_v0  ;;  %4843 = vmatprep.subr.bf16.mxu1 %v6320_v47 }
 0xe04   : > { %4813 = vmatpush1.bf16.msra.mxu0 %v6311_v20  ;;  %4845 = vmatpush1.bf16.msra.mxu1 %v6329_v39 }
 0xe05   : > { %4815 = vmatprep.subr.bf16.mxu0 %v6314_v23  ;;  %4847 = vmatprep.subr.bf16.mxu1 %v6332_v19 }
 0xe08   : > { %4817 = vmatpush1.bf16.msra.mxu0 %v6323_v17  ;;  %4849 = vmatpush1.bf16.msra.mxu1 %v6339_v41 }
 0xe09   : > { %4819 = vmatprep.subr.bf16.mxu0 %v6326_v21  ;;  %4851 = vmatprep.subr.bf16.mxu1 %v6342_v43 }
 0xe0c   : > { %4821 = vmatpush1.bf16.msra.mxu0 %v6335_v28  ;;  %4853 = vmatpush1.bf16.msra.mxu1 %v6346_v53 }
 0xe0d   : > { %4855 = vmatprep.subr.bf16.mxu0 %v6252_v33  ;;  %4887 = vmatprep.subr.bf16.mxu1 %v6267_v57 }
 0xec2   : > { %v3059_v12 = vpop.f32.mrb[8].mxu0  ;;  %v3130_v56 = vpop.f32.mrb[8].mxu1 }
 0xec3   : > { %v3135_v58 = vadd.f32 %v3059_v12, %v6391_v50  ;;  %v3061_v2 = vpop.f32.mrb[9].mxu0  ;;  %v3132_v13 = vpop.f32.mrb[9].mxu1  ;;  %v3137_v27 = vadd.f32 %v3130_v56, %v6397_v16 }
 0xec4   : > { %v3136_v51 = vadd.f32 %v3061_v2, %v6393_v1  ;;  %v3138_v35 = vadd.f32 %v3132_v13, %v6400_v61 }
 0xec5   : > { %v3868_v52 = vmul.f32 -1.442695, %v3135_v58  ;;  %v3870_v36 = vmul.f32 -1.442695, %v3137_v27 }
 0xec6   : > { %v3869_v62 = vmul.f32 -1.442695, %v3136_v51 }
 0xec7   : > { %5261 = vpow2.f32 %v3868_v52 }
 0xec8   : > { %5263 = vpow2.f32 %v3869_v62 }
 0xec9   : > { %5265 = vtanh.f32 %v3138_v35 }
 0xeca   : > { %5267 = vpow2.f32 %v3870_v36 }
 0xed1   : > { %v5262_v45 = vpop.eup %5261 }
 0xed2   : > { %v3148_v55 = vadd.f32 1.0, %v5262_v45  ;;  %v5264_v63 = vpop.eup %5263 }
 0xed3   : > { %v3149_v14 = vadd.f32 1.0, %v5264_v63  ;;  %v5266_v29 = vpop.eup %5265 }
 0xed4   : > { %5269 = vrcp.f32 %v3148_v55  ;;  %v5268_v30 = vpop.eup %5267 }
 0xed5   : > { %5271 = vrcp.f32 %v3149_v14  ;;  %v3150_v26 = vadd.f32 1.0, %v5268_v30 }
 0xed7   : > { %5273 = vrcp.f32 %v3150_v26 }
 0xede   : > { %v5270_v34 = vpop.eup %5269 }
 0xedf   : > { %v3159_v24 = vmul.f32 %v5270_v34, %v5266_v29  ;;  %v5272_v25 = vpop.eup %5271 }
 0xee0   : > { %v3158_v8 = vmul.f32 %v5272_v25, %v6530_v10 }
 0xee1   : > { %v5274_v60 = vpop.eup %5273 }
 0xee2   : > { %v6572_v59 = vadd.f32 %v3159_v24, %v3158_v8 }
 0xee4   : > { %5275 = vtanh.f32 %v6572_v59 }
 0xeee   : > { %v5276_v5 = vpop.eup %5275 }
 0xeef   : > { %v3162_v9 = vmul.f32 %v5276_v5, %v5274_v60 }
 0xef1   : > { %3164 = vst [vmem:[#allocation13 + $0x20] sm:$0xff] %v3162_v9  ;;  %3230 = vmatmul.mubr.f32.vlgmr.msra.gmra.mrb[10].mxu0 %v3162_v9  ;;  %3301 = vmatmul.mubr.f32.vlgmr.msra.gmra.mrb[10].mxu1 %v3162_v9 }
 0xef2   : > { %4857 = vmatpush1.bf16.msra.mxu0 %v6256_v6  ;;  %4889 = vmatpush1.bf16.msra.mxu1 %v6269_v4 }
 0xef3   : > { %4859 = vmatprep.subr.bf16.mxu0 %v6258_v15  ;;  %4891 = vmatprep.subr.bf16.mxu1 %v6279_v31 }
 0xef4   : > { %3401 = vmatprep.mubr.f32.mxu0 %v5524_v3  ;;  %3472 = vmatprep.mubr.f32.mxu1 %v5524_v3 }
 0xef6   : > { %4861 = vmatpush1.bf16.msra.mxu0 %v6262_v32  ;;  %4893 = vmatpush1.bf16.msra.mxu1 %v6281_v37 }
 0xef7   : > { %4863 = vmatprep.subr.bf16.mxu0 %v6265_v38  ;;  %4895 = vmatprep.subr.bf16.mxu1 %v6287_v44 }
 0xefa   : > { %4865 = vmatpush1.bf16.msra.mxu0 %v6272_v7  ;;  %4897 = vmatpush1.bf16.msra.mxu1 %v6293_v48 }
 0xefb   : > { %4867 = vmatprep.subr.bf16.mxu0 %v6276_v22  ;;  %4899 = vmatprep.subr.bf16.mxu1 %v6296_v54 }
 0xefe   : > { %4869 = vmatpush1.bf16.msra.mxu0 %v6285_v40  ;;  %4901 = vmatpush1.bf16.msra.mxu1 %v6305_v11 }
 0xeff   : > { %4871 = vmatprep.subr.bf16.mxu0 %v6290_v46  ;;  %4903 = vmatprep.subr.bf16.mxu1 %v6308_v18 }
 0xf02   : > { %4873 = vmatpush1.bf16.msra.mxu0 %v6299_v49  ;;  %4905 = vmatpush1.bf16.msra.mxu1 %v6317_v42 }
 0xf03   : > { %4875 = vmatprep.subr.bf16.mxu0 %v6302_v0  ;;  %4907 = vmatprep.subr.bf16.mxu1 %v6320_v47 }
 0xf06   : > { %4877 = vmatpush1.bf16.msra.mxu0 %v6311_v20  ;;  %4909 = vmatpush1.bf16.msra.mxu1 %v6329_v39 }
 0xf07   : > { %4879 = vmatprep.subr.bf16.mxu0 %v6314_v23  ;;  %4911 = vmatprep.subr.bf16.mxu1 %v6332_v19 }
 0xf0a   : > { %4881 = vmatpush1.bf16.msra.mxu0 %v6323_v17  ;;  %4913 = vmatpush1.bf16.msra.mxu1 %v6339_v41 }
 0xf0b   : > { %4883 = vmatprep.subr.bf16.mxu0 %v6326_v21  ;;  %4915 = vmatprep.subr.bf16.mxu1 %v6342_v43 }
 0xf0e   : > { %4885 = vmatpush1.bf16.msra.mxu0 %v6335_v28  ;;  %4917 = vmatpush1.bf16.msra.mxu1 %v6346_v53 }
 0xf0f   : > { %4919 = vmatprep.subr.bf16.mxu0 %v6252_v33  ;;  %4951 = vmatprep.subr.bf16.mxu1 %v6267_v57 }
 0xfc4   : > { %v3231_v10 = vpop.f32.mrb[10].mxu0  ;;  %v3302_v12 = vpop.f32.mrb[10].mxu1 }
 0xfc5   : > { %v3307_v56 = vadd.f32 %v3231_v10, %v6391_v50  ;;  %v3233_v58 = vpop.f32.mrb[11].mxu0  ;;  %v3304_v2 = vpop.f32.mrb[11].mxu1  ;;  %v3309_v62 = vadd.f32 %v3302_v12, %v6397_v16 }
 0xfc6   : > { %v3308_v13 = vadd.f32 %v3233_v58, %v6393_v1  ;;  %v3310_v27 = vadd.f32 %v3304_v2, %v6400_v61 }
 0xfc7   : > { %v3871_v51 = vmul.f32 -1.442695, %v3307_v56  ;;  %v3873_v35 = vmul.f32 -1.442695, %v3309_v62 }
 0xfc8   : > { %v3872_v52 = vmul.f32 -1.442695, %v3308_v13 }
 0xfc9   : > { %5277 = vpow2.f32 %v3871_v51 }
 0xfca   : > { %5279 = vpow2.f32 %v3872_v52 }
 0xfcb   : > { %5281 = vtanh.f32 %v3310_v27 }
 0xfcc   : > { %5283 = vpow2.f32 %v3873_v35 }
 0xfd3   : > { %v5278_v33 = vpop.eup %5277 }
 0xfd4   : > { %v3320_v36 = vadd.f32 1.0, %v5278_v33  ;;  %v5280_v57 = vpop.eup %5279 }
 0xfd5   : > { %v3321_v45 = vadd.f32 1.0, %v5280_v57  ;;  %v5282_v55 = vpop.eup %5281 }
 0xfd6   : > { %5285 = vrcp.f32 %v3320_v36  ;;  %v5284_v63 = vpop.eup %5283 }
 0xfd7   : > { %5287 = vrcp.f32 %v3321_v45  ;;  %v3322_v34 = vadd.f32 1.0, %v5284_v63 }
 0xfd9   : > { %5289 = vrcp.f32 %v3322_v34 }
 0xfe0   : > { %v5286_v14 = vpop.eup %5285 }
 0xfe1   : > { %v3331_v29 = vmul.f32 %v5286_v14, %v5282_v55  ;;  %v5288_v30 = vpop.eup %5287 }
 0xfe2   : > { %v3330_v24 = vmul.f32 %v5288_v30, %v6572_v59 }
 0xfe3   : > { %v5290_v26 = vpop.eup %5289 }
 0xfe4   : > { %v6614_v25 = vadd.f32 %v3331_v29, %v3330_v24 }
 0xfe6   : > { %5291 = vtanh.f32 %v6614_v25 }
 0xff0   : > { %v5292_v8 = vpop.eup %5291 }
 0xff1   : > { %v3334_v60 = vmul.f32 %v5292_v8, %v5290_v26 }
 0xff3   : > { %3336 = vst [vmem:[#allocation13 + $0x28] sm:$0xff] %v3334_v60  ;;  %3402 = vmatmul.mubr.f32.vlgmr.msra.gmra.mrb[12].mxu0 %v3334_v60  ;;  %3473 = vmatmul.mubr.f32.vlgmr.msra.gmra.mrb[12].mxu1 %v3334_v60 }
 0xff4   : > { %4921 = vmatpush1.bf16.msra.mxu0 %v6256_v6  ;;  %4953 = vmatpush1.bf16.msra.mxu1 %v6269_v4 }
 0xff5   : > { %4923 = vmatprep.subr.bf16.mxu0 %v6258_v15  ;;  %4955 = vmatprep.subr.bf16.mxu1 %v6279_v31 }
 0xff6   : > { %3573 = vmatprep.mubr.f32.mxu0 %v5524_v3  ;;  %3644 = vmatprep.mubr.f32.mxu1 %v5524_v3 }
 0xff8   : > { %4925 = vmatpush1.bf16.msra.mxu0 %v6262_v32  ;;  %4957 = vmatpush1.bf16.msra.mxu1 %v6281_v37 }
 0xff9   : > { %4927 = vmatprep.subr.bf16.mxu0 %v6265_v38  ;;  %4959 = vmatprep.subr.bf16.mxu1 %v6287_v44 }
 0xffc   : > { %4929 = vmatpush1.bf16.msra.mxu0 %v6272_v7  ;;  %4961 = vmatpush1.bf16.msra.mxu1 %v6293_v48 }
 0xffd   : > { %4931 = vmatprep.subr.bf16.mxu0 %v6276_v22  ;;  %4963 = vmatprep.subr.bf16.mxu1 %v6296_v54 }
0x1000   : > { %4933 = vmatpush1.bf16.msra.mxu0 %v6285_v40  ;;  %4965 = vmatpush1.bf16.msra.mxu1 %v6305_v11 }
0x1001   : > { %4935 = vmatprep.subr.bf16.mxu0 %v6290_v46  ;;  %4967 = vmatprep.subr.bf16.mxu1 %v6308_v18 }
0x1004   : > { %4937 = vmatpush1.bf16.msra.mxu0 %v6299_v49  ;;  %4969 = vmatpush1.bf16.msra.mxu1 %v6317_v42 }
0x1005   : > { %4939 = vmatprep.subr.bf16.mxu0 %v6302_v0  ;;  %4971 = vmatprep.subr.bf16.mxu1 %v6320_v47 }
0x1008   : > { %4941 = vmatpush1.bf16.msra.mxu0 %v6311_v20  ;;  %4973 = vmatpush1.bf16.msra.mxu1 %v6329_v39 }
0x1009   : > { %4943 = vmatprep.subr.bf16.mxu0 %v6314_v23  ;;  %4975 = vmatprep.subr.bf16.mxu1 %v6332_v19 }
0x100c   : > { %4945 = vmatpush1.bf16.msra.mxu0 %v6323_v17  ;;  %4977 = vmatpush1.bf16.msra.mxu1 %v6339_v41 }
0x100d   : > { %4947 = vmatprep.subr.bf16.mxu0 %v6326_v21  ;;  %4979 = vmatprep.subr.bf16.mxu1 %v6342_v43 }
0x1010   : > { %4949 = vmatpush1.bf16.msra.mxu0 %v6335_v28  ;;  %4981 = vmatpush1.bf16.msra.mxu1 %v6346_v53 }
0x10c6   : > { %v3403_v3 = vpop.f32.mrb[12].mxu0  ;;  %v3474_v6 = vpop.f32.mrb[12].mxu1 }
0x10c7   : > { %v3479_v15 = vadd.f32 %v3403_v3, %v6391_v50  ;;  %v3405_v32 = vpop.f32.mrb[13].mxu0  ;;  %v3476_v38 = vpop.f32.mrb[13].mxu1  ;;  %v3481_v31 = vadd.f32 %v3474_v6, %v6397_v16 }
0x10c8   : > { %v3480_v4 = vadd.f32 %v3405_v32, %v6393_v1  ;;  %v3482_v37 = vadd.f32 %v3476_v38, %v6400_v61 }
0x10c9   : > { %v3874_v7 = vmul.f32 -1.442695, %v3479_v15  ;;  %v3876_v40 = vmul.f32 -1.442695, %v3481_v31 }
0x10ca   : > { %v3875_v22 = vmul.f32 -1.442695, %v3480_v4 }
0x10cb   : > { %5293 = vpow2.f32 %v3874_v7 }
0x10cc   : > { %5295 = vpow2.f32 %v3875_v22 }
0x10cd   : > { %5297 = vtanh.f32 %v3482_v37 }
0x10ce   : > { %5299 = vpow2.f32 %v3876_v40 }
0x10d5   : > { %v5294_v44 = vpop.eup %5293 }
0x10d6   : > { %v3492_v46 = vadd.f32 1.0, %v5294_v44  ;;  %v5296_v48 = vpop.eup %5295 }
0x10d7   : > { %v3493_v54 = vadd.f32 1.0, %v5296_v48  ;;  %v5298_v49 = vpop.eup %5297 }
0x10d8   : > { %5301 = vrcp.f32 %v3492_v46  ;;  %v5300_v0 = vpop.eup %5299 }
0x10d9   : > { %5303 = vrcp.f32 %v3493_v54  ;;  %v3494_v23 = vadd.f32 1.0, %v5300_v0 }
0x10db   : > { %5305 = vrcp.f32 %v3494_v23 }
0x10e2   : > { %v5302_v11 = vpop.eup %5301 }
0x10e3   : > { %v3503_v18 = vmul.f32 %v5302_v11, %v5298_v49  ;;  %v5304_v20 = vpop.eup %5303 }
0x10e4   : > { %v3502_v42 = vmul.f32 %v5304_v20, %v6614_v25 }
0x10e5   : > { %v5306_v17 = vpop.eup %5305 }
0x10e6   : > { %v3504_v47 = vadd.f32 %v3503_v18, %v3502_v42 }
0x10e8   : > { %5307 = vtanh.f32 %v3504_v47 }
0x10f2   : > { %v5308_v21 = vpop.eup %5307 }
0x10f3   : > { %v3506_v39 = vmul.f32 %v5308_v21, %v5306_v17 }
0x10f5   : > { %3508 = vst [vmem:[#allocation13 + $0x30] sm:$0xff] %v3506_v39  ;;  %3574 = vmatmul.mubr.f32.vlgmr.msra.gmra.mrb[14].mxu0 %v3506_v39  ;;  %3645 = vmatmul.mubr.f32.vlgmr.msra.gmra.mrb[14].mxu1 %v3506_v39 }
0x11c8   : > { %v3575_v19 = vpop.f32.mrb[14].mxu0  ;;  %v3646_v28 = vpop.f32.mrb[14].mxu1 }
0x11c9   : > { %v3651_v41 = vadd.f32 %v3575_v19, %v6391_v50  ;;  %v3577_v43 = vpop.f32.mrb[15].mxu0  ;;  %v3648_v53 = vpop.f32.mrb[15].mxu1  ;;  %v3653_v10 = vadd.f32 %v3646_v28, %v6397_v16 }
0x11ca   : > { %v3652_v59 = vadd.f32 %v3577_v43, %v6393_v1  ;;  %v3654_v12 = vadd.f32 %v3648_v53, %v6400_v61 }
0x11cb   : > { %v3877_v5 = vmul.f32 -1.442695, %v3651_v41  ;;  %v3879_v56 = vmul.f32 -1.442695, %v3653_v10 }
0x11cc   : > { %v3878_v9 = vmul.f32 -1.442695, %v3652_v59 }
0x11cd   : > { %5309 = vpow2.f32 %v3877_v5 }
0x11ce   : > { %5311 = vpow2.f32 %v3878_v9 }
0x11cf   : > { %5313 = vtanh.f32 %v3654_v12 }
0x11d0   : > { %5315 = vpow2.f32 %v3879_v56 }
0x11d7   : > { %v5310_v58 = vpop.eup %5309 }
0x11d8   : > { %v3664_v2 = vadd.f32 1.0, %v5310_v58  ;;  %v5312_v13 = vpop.eup %5311 }
0x11d9   : > { %v3665_v50 = vadd.f32 1.0, %v5312_v13  ;;  %v5314_v51 = vpop.eup %5313 }
0x11da   : > { %5317 = vrcp.f32 %v3664_v2  ;;  %v5316_v52 = vpop.eup %5315 }
0x11db   : > { %5319 = vrcp.f32 %v3665_v50  ;;  %v3666_v35 = vadd.f32 1.0, %v5316_v52 }
0x11dd   : > { %5321 = vrcp.f32 %v3666_v35 }
0x11e4   : > { %v5318_v1 = vpop.eup %5317 }
0x11e5   : > { %v3675_v62 = vmul.f32 %v5318_v1, %v5314_v51  ;;  %v5320_v27 = vpop.eup %5319 }
0x11e6   : > { %v3674_v33 = vmul.f32 %v5320_v27, %v3504_v47 }
0x11e7   : > { %v5322_v16 = vpop.eup %5321 }
0x11e8   : > { %v3676_v36 = vadd.f32 %v3675_v62, %v3674_v33 }
0x11ea   : > { %5323 = vtanh.f32 %v3676_v36 }
0x11f4   : > { %v5324_v61 = vpop.eup %5323 }
0x11f5   : > { %v3678_v57 = vmul.f32 %v5324_v61, %v5322_v16 }
0x11f7   : > { %3680 = vst [vmem:[#allocation13 + $0x38] sm:$0xff] %v3678_v57 }
0x11f8 PF: > { %p5021_p7 = scmp.eq.s32.totalorder %s5582_s25, 1  ;;  %s5525_s20 = smov [#allocation13]  }
0x11f9   : > { %s3687_s21 = sshll.u32 %s5525_s20, 4  ;;  %s3688_s21 = int_to_ptr.vmem [resolvable:$true] %s3687_s21 }
0x11fa   : > { %s5439_s12 = scalar_lea.vmem %s3688_s21, 1024  ;;  %p5446_p6 = scmp.lt.s32.totalorder %s3688_s21, %s3688_s21 }
0x11fb   : > { %p5440_p11 = scmp.ne.s32.totalorder %s3688_s21, %s5439_s12  ;;  %p5447_p10 = scmp.lt.s32.totalorder %s5439_s12, %s5439_s12 }
0x11fd   : > { %p5441_p5 = pnand %p5440_p11, %p5021_p7  ;;  %p5448_p12 = por %p5447_p10, %p5446_p6 }
0x11ff   : > { %p5442_p8 = pneg %p5441_p5 }
0x1201   : > { %p5449_p13 = pnand %p5448_p12, %p5442_p8 }
0x1203   : > { %5452 = shalt.err (!%p5449_p13)
}
0x1204   : > { %s5453_s26 = scalar_lea.hbm %s6700_s6, 1024 }
0x1205   : > { %p5454_p0 = scmp.ne.s32.totalorder %s6700_s6, %s5453_s26  ;;  %p5459_p9 = scmp.lt.u32.totalorder %s5453_s26, %s6700_s6 }
0x1207   : > { %p5455_p2 = pnand %p5454_p0, %p5021_p7 }
0x1209   : > { %p5456_p3 = pneg %p5455_p2 }
0x120b   : > { %p5461_p1 = pnand %p5459_p9, %p5456_p3 }
0x120d   : > { %5464 = shalt.err (!%p5461_p1)
}
0x120e   : > { %s5526_s14 = smov 128   ;;  %s5527_s30 = smov 8  }
0x120f   : > { %4997 = dma.vmem_to_hbm [thread:$0]  (%p5021_p7), %s3688_s21, 1024, %s6700_s6, [#allocation7], %s5526_s14, %s5526_s14, %s5527_s30  }
0x1210   : > { %5494 = dma.done.wait (%p5021_p7), [#allocation7], 1024  }
0x1211   : > { %5496 = vsyncadd (%p5021_p7), [#allocation7], 4294966272 }
0x1212 PF: > { %p19_p4 = scmp.ge.s32.totalorder %s5694_s16, 4   ;;  %s6716_s21 = smov %s5503_s22 }
0x1213   : > { %s6717_s22 = smov %s5507_s23  ;;  %s6718_s23 = smov %s5707_s9 }
0x1214   : > { %s6719_s24 = smov %s5694_s16  ;;  %21 = sbr.rel (!%p19_p4) target bundleno = 6 (0x6), region = 125 }
0x121b   :  { %3703 = vsyncpa [#allocation6], 1 }
0x121c   :  { %3705 = vsyncpa [#allocation6 + $0x1], 1 }
0x121d   :  { %3706 = vsyncpa [#allocation9], 1 }
0x121e   :  { %3707 = vsyncpa [#allocation12], 1 }
0x121f   :  { %3708 = vsyncpa [#allocation7], 1 }
0x1220   :  { %3710 = vsyncpa [#allocation7 + $0x1], 1 }

</bundles_post_ra>
